<compile_context>
chip_gen: v6e
topology: v6e:2x2x1
jax: 0.10.0
libtpu: 0.0.40
codegen_flags: <defaults>
</compile_context>

<pallas_src>
import jax
import jax.numpy as jnp
from jax import lax
from jax.experimental import pallas as pl
from jax.experimental.pallas import tpu as pltpu

EPS = 1e-5        # PyTorch BatchNorm default eps
COUT_PAD = 8      # pad dec_conv2 Cout 3 -> 8 (one sublane), NOT 128


# ---------------------------- Pallas kernels ----------------------------

def _mlp_kernel(x_ref, w1_ref, b1_ref, w2_ref, b2_ref, out_ref):
    # lin1 (+ folded BN1) + ReLU (tiny: B x 1024, recomputed per column tile
    # so the streamed axis stays "parallel"), then the streamed lin2
    # (+ folded BN2) column tile + ReLU.  bf16 MXU operands, f32 accumulation.
    h1 = jnp.dot(x_ref[...], w1_ref[...], preferred_element_type=jnp.float32)
    h1 = jnp.maximum(h1 + b1_ref[...], 0.0)
    h2 = jnp.dot(h1.astype(jnp.bfloat16), w2_ref[...],
                 preferred_element_type=jnp.float32)
    out_ref[...] = jnp.maximum(h2 + b2_ref[...], 0.0).astype(out_ref.dtype)


def _decoder_deconv_kernel(x_ref, w1p_ref, s3_ref, sh3_ref, w2p_ref, b2_ref,
                           out_ref, xpad_sc, midpad_sc):
    # Fused dec_conv1 + BN3 + ReLU + dec_conv2 + sigmoid*256 for ONE batch
    # sample per grid step; all intermediates stay in VMEM.
    #  x_ref   : (1, h0, w0, c0)  bf16   NHWC input of dec_conv1
    #  w1p_ref : (4, 4*c0, c1)    bf16   tap-fused per-phase weights, conv1
    #  w2p_ref : (4, 4*c1, c2p)   bf16   tap-fused per-phase weights, conv2
    #                                    (c2p = 8, real Cout = 3)
    #  out_ref : (1, 2*h0, 2*w0, 4*c2p) f32   phase-major output
    #  xpad_sc / midpad_sc : bf16 zero-halo scratches.
    _, h0, w0, c0 = x_ref.shape
    c1 = s3_ref.shape[-1]
    h1, w1 = 2 * h0, 2 * w0
    c2p = b2_ref.shape[-1]

    def offs(p):  # input offsets contributing to sub-pixel phase p
        return (0, -1) if p == 0 else (0, 1)

    def phase_matmul(pad_ref, wp_ref, py, px, hh, ww, cin, cout):
        # Pack the 4 taps of phase (py, px) along the channel axis and do a
        # single MXU matmul with K = 4*cin.  pad_ref is already bf16 -> no
        # per-phase casts.
        blocks = []
        for dy in offs(py):
            for dx in offs(px):
                blocks.append(pad_ref[:, 1 + dy:1 + dy + hh,
                                      1 + dx:1 + dx + ww, :])
        patch = jnp.concatenate(blocks, axis=-1).reshape(hh * ww, 4 * cin)
        acc = jnp.dot(patch, wp_ref[2 * py + px],
                      preferred_element_type=jnp.float32)
        return acc.reshape(1, hh, ww, cout)

    def zero_halo(pad_ref, hh, ww, cc):
        # Zero only the 1-wide border (4 thin slabs); interior is written once.
        z_row = jnp.zeros((1, 1, ww + 2, cc), pad_ref.dtype)
        z_col = jnp.zeros((1, hh, 1, cc), pad_ref.dtype)
        pad_ref[:, 0:1, :, :] = z_row
        pad_ref[:, hh + 1:hh + 2, :, :] = z_row
        pad_ref[:, 1:1 + hh, 0:1, :] = z_col
        pad_ref[:, 1:1 + hh, ww + 1:ww + 2, :] = z_col

    def interleave(y00, y01, y10, y11, hh, ww, cc):
        # full[2my+py, 2mx+px] = y[py][px][my, mx]  (pure VMEM value ops;
        # only used for the mid activation, whose spatial interleave genuinely
        # mixes the conv1 phases for conv2's tap windows).
        r0 = jnp.stack([y00, y01], axis=3).reshape(1, hh, 2 * ww, cc)
        r1 = jnp.stack([y10, y11], axis=3).reshape(1, hh, 2 * ww, cc)
        return jnp.stack([r0, r1], axis=2).reshape(1, 2 * hh, 2 * ww, cc)

    # ---- dec_conv1 input: zero halo + single interior write (bf16) ----
    zero_halo(xpad_sc, h0, w0, c0)
    xpad_sc[:, 1:1 + h0, 1:1 + w0, :] = x_ref[...]

    # ---- dec_conv1 (tap-fused, K = 4*c0) + folded BN3 + ReLU ----
    s3 = s3_ref[0]
    sh3 = sh3_ref[0]
    y1 = [[None, None], [None, None]]
    for py in range(2):
        for px in range(2):
            acc = phase_matmul(xpad_sc, w1p_ref, py, px, h0, w0, c0, c1)
            y1[py][px] = jnp.maximum(acc * s3 + sh3, 0.0)

    # ---- assemble + zero-halo the mid activation entirely in VMEM ----
    zero_halo(midpad_sc, h1, w1, c1)
    mid = interleave(y1[0][0], y1[0][1], y1[1][0], y1[1][1], h0, w0, c1)
    midpad_sc[:, 1:1 + h1, 1:1 + w1, :] = mid.astype(midpad_sc.dtype)

    # ---- dec_conv2 (tap-fused, K = 4*c1, Cout padded only to 8) ----
    # sigmoid runs on 8 channels (not 128); each phase is stored directly
    # into its lane slice of the phase-major output block (no interleave).
    b2 = b2_ref[0]
    for py in range(2):
        for px in range(2):
            p = 2 * py + px
            acc = phase_matmul(midpad_sc, w2p_ref, py, px, h1, w1, c1, c2p)
            out_ref[:, :, :, p * c2p:(p + 1) * c2p] = (
                jax.nn.sigmoid(acc + b2) * 256.0)


# ------------------------------ wrappers ---------------------------------

def _pick_tile(f1, f2):
    # Largest lin2 column tile that (a) divides F2, (b) is a multiple of 128
    # (lane-dense), (c) keeps the double-buffered bf16 weight tile <= ~4 MiB
    # (comfortably inside v5e's 16 MiB default scoped VMEM), and (d) leaves
    # >= 2 tiles so the "parallel" axis can feed both v7x TensorCores.
    best = None
    for tn in range(128, f2, 128):
        if f2 % tn == 0 and f1 * tn * 2 <= 2 * 1024 * 1024 and f2 // tn >= 2:
            best = tn
    return best if best is not None else f2


def _mlp_call(x, w1, b1, w2, b2):
    B, D = x.shape
    F1 = w1.shape[1]
    F2 = w2.shape[1]
    TN = _pick_tile(F1, F2)
    return pl.pallas_call(
        _mlp_kernel,
        out_shape=jax.ShapeDtypeStruct((B, F2), jnp.bfloat16),
        grid=(F2 // TN,),
        in_specs=[
            pl.BlockSpec((B, D), lambda j: (0, 0)),
            pl.BlockSpec((D, F1), lambda j: (0, 0)),
            pl.BlockSpec((1, F1), lambda j: (0, 0)),
            pl.BlockSpec((F1, TN), lambda j: (0, j)),   # streamed weight tile
            pl.BlockSpec((1, TN), lambda j: (0, j)),
        ],
        out_specs=pl.BlockSpec((B, TN), lambda j: (0, j)),
        compiler_params=pltpu.CompilerParams(
            dimension_semantics=("parallel",)),
    )(x, w1, b1, w2, b2)


def _pack_deconv_weight(w_ct, cout_pad=None):
    # PyTorch ConvTranspose2d weight [Cin, Cout, kH, kW] -> tap-fused per-phase
    # weights [4 (= 2*py+px), 4*Cin, Cout(_padded)], bf16.
    w = jnp.transpose(w_ct, (2, 3, 0, 1))   # [kH, kW, Cin, Cout]
    cout = w.shape[-1]

    def taps(p):  # (input offset, kernel index) per sub-pixel phase
        return ((0, 1), (-1, 3)) if p == 0 else ((0, 2), (1, 0))

    phases = []
    for py in range(2):
        for px in range(2):
            blocks = [w[ky, kx] for _, ky in taps(py) for _, kx in taps(px)]
            phases.append(jnp.concatenate(blocks, axis=0))      # [4*Cin, Cout]
    wp = jnp.stack(phases, axis=0)                              # [4, 4*Cin, Cout]
    if cout_pad is not None and cout_pad > cout:
        wp = jnp.pad(wp, ((0, 0), (0, 0), (0, cout_pad - cout)))
    return wp.astype(jnp.bfloat16)


def _decoder_deconv_call(x_nhwc, w1p, s3, sh3, w2p, b2p):
    B, h0, w0, c0 = x_nhwc.shape
    c1 = w1p.shape[-1]
    c2p = w2p.shape[-1]
    h1, w1 = 2 * h0, 2 * w0
    return pl.pallas_call(
        _decoder_deconv_kernel,
        out_shape=jax.ShapeDtypeStruct((B, h1, w1, 4 * c2p), jnp.float32),
        grid=(B,),                                  # batch-parallel (v7x 2-TC)
        in_specs=[
            pl.BlockSpec((1, h0, w0, c0), lambda b: (b, 0, 0, 0)),
            pl.BlockSpec(w1p.shape, lambda b: (0, 0, 0)),
            pl.BlockSpec((1, c1), lambda b: (0, 0)),
            pl.BlockSpec((1, c1), lambda b: (0, 0)),
            pl.BlockSpec(w2p.shape, lambda b: (0, 0, 0)),
            pl.BlockSpec((1, c2p), lambda b: (0, 0)),
        ],
        out_specs=pl.BlockSpec((1, h1, w1, 4 * c2p), lambda b: (b, 0, 0, 0)),
        scratch_shapes=[
            pltpu.VMEM((1, h0 + 2, w0 + 2, c0), jnp.bfloat16),   # padded input
            pltpu.VMEM((1, h1 + 2, w1 + 2, c1), jnp.bfloat16),   # padded mid
        ],
        compiler_params=pltpu.CompilerParams(
            dimension_semantics=("parallel",)),
    )(x_nhwc, w1p, s3.reshape(1, c1), sh3.reshape(1, c1),
      w2p, b2p.reshape(1, c2p))


def infogan_decoder_forward(x, p, width, height):
    """x: [B, latent_dim]. Returns [B, 3, width, height] (NCHW)."""
    B = x.shape[0]
    d2, d3 = width // 4, height // 4
    c_mid = 128

    # ---- fold eval-mode BN1 / BN2 into the Linear layers (bf16 MXU weights) ----
    s1 = p["bn1_g"] / jnp.sqrt(p["bn1_v"] + EPS)
    w1f = (p["w1"] * s1).astype(jnp.bfloat16)
    b1f = ((p["b1"] - p["bn1_m"]) * s1 + p["bn1_b"]).reshape(1, -1)

    s2 = p["bn2_g"] / jnp.sqrt(p["bn2_v"] + EPS)
    w2f = p["w2"] * s2
    b2f = (p["b2"] - p["bn2_m"]) * s2 + p["bn2_b"]

    # Permute lin2 columns once (free, weight-side) so the MLP output is
    # already NHWC-flattened: the wrapper reshape is layout-free and there is
    # no HBM transpose between the two pallas_calls.
    perm = (jnp.arange(c_mid)[None, None, :] * (d2 * d3)
            + jnp.arange(d2)[:, None, None] * d3
            + jnp.arange(d3)[None, :, None]).reshape(-1)
    w2f = w2f[:, perm].astype(jnp.bfloat16)
    b2f = b2f[perm].reshape(1, -1)

    h = _mlp_call(x.astype(jnp.bfloat16), w1f, b1f, w2f, b2f)  # bf16 (B, F2)
    # dropout == Identity (dropout prob == 0)
    net = h.reshape(B, d2, d3, c_mid)                          # NHWC, no transpose

    # ---- dec_conv1 + BN3 (eval, folded) + ReLU + dec_conv2 + sigmoid*256 ----
    s3 = p["bn3_g"] / jnp.sqrt(p["bn3_v"] + EPS)
    sh3 = (p["cb1"] - p["bn3_m"]) * s3 + p["bn3_b"]
    w1p = _pack_deconv_weight(p["cw1"])                        # (4, 512, 64)
    cout = p["cw2"].shape[1]                                   # 3
    w2p = _pack_deconv_weight(p["cw2"], cout_pad=COUT_PAD)     # (4, 256, 8)
    b2p = jnp.pad(p["cb2"], (0, COUT_PAD - cout))

    y = _decoder_deconv_call(net, w1p, s3, sh3, w2p, b2p)      # (B, 2d2, 2d3, 32)

    # Tiny depth-to-space (phase-major -> spatial) + NCHW, done in the wrapper.
    y = y.reshape(B, 2 * d2, 2 * d3, 2, 2, COUT_PAD)           # (b, m, n, py, px, c)
    y = jnp.transpose(y, (0, 5, 1, 3, 2, 4)).reshape(B, COUT_PAD, 4 * d2, 4 * d3)
    return y[:, :cout]                                         # (B, 3, width, height)


# ---------------------- pure-JAX reference (for checking) ----------------------

def _deconv_ref(x_nhwc, w_ct, b):
    # ConvTranspose2d(k=4,s=2,p=1) == dilated conv with flipped kernel, pad=2.
    k = jnp.transpose(w_ct, (2, 3, 0, 1))[::-1, ::-1]  # [kH,kW,Cin,Cout] flipped
    y = lax.conv_general_dilated(
        x_nhwc, k, window_strides=(1, 1), padding=((2, 2), (2, 2)),
        lhs_dilation=(2, 2), dimension_numbers=("NHWC", "HWIO", "NHWC"))
    return y + b


def forward_ref(x, p, width, height):
    B = x.shape[0]

    def bn(h, g, bt, m, v):
        return (h - m) / jnp.sqrt(v + EPS) * g + bt

    h = x @ p["w1"] + p["b1"]
    h = jnp.maximum(bn(h, p["bn1_g"], p["bn1_b"], p["bn1_m"], p["bn1_v"]), 0.0)
    h = h @ p["w2"] + p["b2"]
    h = jnp.maximum(bn(h, p["bn2_g"], p["bn2_b"], p["bn2_m"], p["bn2_v"]), 0.0)
    d2, d3 = width // 4, height // 4
    net = jnp.transpose(h.reshape(B, 128, d2, d3), (0, 2, 3, 1))
    net = _deconv_ref(net, p["cw1"], p["cb1"])
    net = jnp.maximum(bn(net, p["bn3_g"], p["bn3_b"], p["bn3_m"], p["bn3_v"]), 0.0)
    net = _deconv_ref(net, p["cw2"], p["cb2"])
    net = jax.nn.sigmoid(net) * 256.0
    return jnp.transpose(net, (0, 3, 1, 2))


# ------------------------------- main -------------------------------------

if __name__ == "__main__":
    latent_dim, width, height, batch = 8, 16, 16, 2
    f2 = 128 * (width // 4) * (height // 4)

    key = jax.random.PRNGKey(0)
    ks = jax.random.split(key, 24)

    def n(k, shape, s=0.05):
        return s * jax.random.normal(k, shape, jnp.float32)

    def u(k, shape):
        return jax.random.uniform(k, shape, jnp.float32, 0.5, 1.5)

    params = dict(
        w1=n(ks[0], (latent_dim, 1024)), b1=n(ks[1], (1024,)),
        bn1_g=u(ks[2], (1024,)), bn1_b=n(ks[3], (1024,)),
        bn1_m=n(ks[4], (1024,)), bn1_v=u(ks[5], (1024,)),
        w2=n(ks[6], (1024, f2)), b2=n(ks[7], (f2,)),
        bn2_g=u(ks[8], (f2,)), bn2_b=n(ks[9], (f2,)),
        bn2_m=n(ks[10], (f2,)), bn2_v=u(ks[11], (f2,)),
        cw1=n(ks[12], (128, 64, 4, 4)), cb1=n(ks[13], (64,)),
        bn3_g=u(ks[14], (64,)), bn3_b=n(ks[15], (64,)),
        bn3_m=n(ks[16], (64,)), bn3_v=u(ks[17], (64,)),
        cw2=n(ks[18], (64, 3, 4, 4)), cb2=n(ks[19], (3,)),
    )
    x = jax.random.normal(ks[20], (batch, latent_dim), jnp.float32)

    out = jax.block_until_ready(infogan_decoder_forward(x, params, width, height))
    ref = jax.block_until_ready(forward_ref(x, params, width, height))

    assert out.shape == (batch, 3, width, height), out.shape
    err = float(jnp.max(jnp.abs(out - ref)))
    # Tolerance widened vs f32 reference because MXU operands / intermediate
    # activations are bf16 (output scale 0..256, so 1.0 abs ~= 0.4% full scale).
    assert err < 1.0, f"max abs error vs reference: {err}"
    print("KERNEL_OK")
</pallas_src>

<mosaic_0001>
module attributes {stable_mosaic.version = 11 : i64} {
  func.func @_mlp_kernel(%arg0: i32, %arg1: memref<2x8xbf16, #tpu.memory_space<vmem>>, %arg2: memref<8x1024xbf16, #tpu.memory_space<vmem>>, %arg3: memref<1x1024xf32, #tpu.memory_space<vmem>>, %arg4: memref<1024x1024xbf16, #tpu.memory_space<vmem>>, %arg5: memref<1x1024xf32, #tpu.memory_space<vmem>>, %arg6: memref<2x1024xbf16, #tpu.memory_space<vmem>>) attributes {dimension_semantics = [#tpu.dimension_semantics<parallel>], iteration_bounds = array<i64: 2>, scalar_prefetch = 0 : i64, scratch_operands = 0 : i64, tpu.core_type = #tpu.core_type<tc>, window_params = [{pipeline_mode = #tpu.pipeline_mode<synchronous>, transform_indices = @transform_0, window_bounds = array<i64: 2, 8>}, {pipeline_mode = #tpu.pipeline_mode<synchronous>, transform_indices = @transform_1, window_bounds = array<i64: 8, 1024>}, {pipeline_mode = #tpu.pipeline_mode<synchronous>, transform_indices = @transform_2, window_bounds = array<i64: 1, 1024>}, {transform_indices = @transform_3, window_bounds = array<i64: 1024, 1024>}, {transform_indices = @transform_4, window_bounds = array<i64: 1, 1024>}, {transform_indices = @transform_5, window_bounds = array<i64: 2, 1024>}]} {
    %c0 = arith.constant 0 : index
    %c0_0 = arith.constant 0 : index
    %0 = vector.load %arg1[%c0, %c0_0] : memref<2x8xbf16, #tpu.memory_space<vmem>>, vector<2x8xbf16>
    %c0_1 = arith.constant 0 : index
    %c0_2 = arith.constant 0 : index
    %1 = vector.load %arg2[%c0_1, %c0_2] : memref<8x1024xbf16, #tpu.memory_space<vmem>>, vector<8x1024xbf16>
    %cst = arith.constant dense<0.000000e+00> : vector<2x1024xf32>
    %2 = tpu.matmul %0, %1, %cst {dimension_numbers = #tpu.dot_dimension_numbers<[1], [0], [0], [1], [0, 0, 1, 1], [], []>} : vector<2x8xbf16>, vector<8x1024xbf16>, vector<2x1024xf32> -> vector<2x1024xf32>
    %c0_3 = arith.constant 0 : index
    %c0_4 = arith.constant 0 : index
    %3 = vector.load %arg3[%c0_3, %c0_4] : memref<1x1024xf32, #tpu.memory_space<vmem>>, vector<1x1024xf32>
    %4 = vector.broadcast %3 : vector<1x1024xf32> to vector<2x1024xf32>
    %5 = arith.addf %2, %4 : vector<2x1024xf32>
    %cst_5 = arith.constant 0.000000e+00 : f32
    %6 = vector.broadcast %cst_5 : f32 to vector<2x1024xf32>
    %7 = arith.maximumf %5, %6 : vector<2x1024xf32>
    %8 = arith.truncf %7 : vector<2x1024xf32> to vector<2x1024xbf16>
    %c0_6 = arith.constant 0 : index
    %c0_7 = arith.constant 0 : index
    %9 = vector.load %arg4[%c0_6, %c0_7] : memref<1024x1024xbf16, #tpu.memory_space<vmem>>, vector<1024x1024xbf16>
    %cst_8 = arith.constant dense<0.000000e+00> : vector<2x1024xf32>
    %10 = tpu.matmul %8, %9, %cst_8 {dimension_numbers = #tpu.dot_dimension_numbers<[1], [0], [0], [1], [0, 0, 1, 1], [], []>} : vector<2x1024xbf16>, vector<1024x1024xbf16>, vector<2x1024xf32> -> vector<2x1024xf32>
    %c0_9 = arith.constant 0 : index
    %c0_10 = arith.constant 0 : index
    %11 = vector.load %arg5[%c0_9, %c0_10] : memref<1x1024xf32, #tpu.memory_space<vmem>>, vector<1x1024xf32>
    %12 = vector.broadcast %11 : vector<1x1024xf32> to vector<2x1024xf32>
    %13 = arith.addf %10, %12 : vector<2x1024xf32>
    %cst_11 = arith.constant 0.000000e+00 : f32
    %14 = vector.broadcast %cst_11 : f32 to vector<2x1024xf32>
    %15 = arith.maximumf %13, %14 : vector<2x1024xf32>
    %16 = arith.truncf %15 : vector<2x1024xf32> to vector<2x1024xbf16>
    %c0_12 = arith.constant 0 : index
    %c0_13 = arith.constant 0 : index
    %17 = vector.load %arg6[%c0_12, %c0_13] : memref<2x1024xbf16, #tpu.memory_space<vmem>>, vector<2x1024xbf16>
    tpu.vector_store %arg6[%c0_12, %c0_13], %16 {strides = array<i32>} : memref<2x1024xbf16, #tpu.memory_space<vmem>>, vector<2x1024xbf16>,
    return
  }
  func.func @transform_0(%arg0: i32) -> (i32, i32) {
    %c0_i32 = arith.constant 0 : i32
    %c0_i32_0 = arith.constant 0 : i32
    %c0_i32_1 = arith.constant 0 : i32
    return %c0_i32, %c0_i32_0 : i32, i32
  }
  func.func @transform_1(%arg0: i32) -> (i32, i32) {
    %c0_i32 = arith.constant 0 : i32
    %c0_i32_0 = arith.constant 0 : i32
    %c0_i32_1 = arith.constant 0 : i32
    return %c0_i32, %c0_i32_0 : i32, i32
  }
  func.func @transform_2(%arg0: i32) -> (i32, i32) {
    %c0_i32 = arith.constant 0 : i32
    %c0_i32_0 = arith.constant 0 : i32
    %c0_i32_1 = arith.constant 0 : i32
    return %c0_i32, %c0_i32_0 : i32, i32
  }
  func.func @transform_3(%arg0: i32) -> (i32, i32) {
    %c0_i32 = arith.constant 0 : i32
    %c0_i32_0 = arith.constant 0 : i32
    return %c0_i32, %arg0 : i32, i32
  }
  func.func @transform_4(%arg0: i32) -> (i32, i32) {
    %c0_i32 = arith.constant 0 : i32
    %c0_i32_0 = arith.constant 0 : i32
    return %c0_i32, %arg0 : i32, i32
  }
  func.func @transform_5(%arg0: i32) -> (i32, i32) {
    %c0_i32 = arith.constant 0 : i32
    %c0_i32_0 = arith.constant 0 : i32
    return %c0_i32, %arg0 : i32, i32
  }
}

</mosaic_0001>

<bundles_post_ra>
// kernel: tpu_custom_call.1
= control target key start
LH: loop header
LB: loop body
LE: loop exit
PB: predicated region body
PF: predicated region fallthrough
CT: control target
= control target key end

     0   :  { %s6387_s0 = inlined_call_operand.hbm [shape: bf16[2,8], index: 0, kind: input, shape index: {}]   ;;  %s6388_s1 = inlined_call_operand.hbm [shape: bf16[8,1024], index: 1, kind: input, shape index: {}]   ;;  %s6389_s2 = inlined_call_operand.hbm [shape: f32[1,1024], index: 2, kind: input, shape index: {}]   ;;  %s6390_s3 = inlined_call_operand.hbm [shape: bf16[1024,2048], index: 3, kind: input, shape index: {}]   ;;  %s6391_s4 = inlined_call_operand.hbm [shape: f32[1,2048], index: 4, kind: input, shape index: {}]   ;;  %s6392_s5 = inlined_call_operand.hbm [shape: bf16[2,2048], index: 5, kind: output, shape index: {}]  }
   0x1   :  { %6402 = sst [smem:[#allocation16_spill]] %s6388_s1 }
   0x2   :  { %10 = vsyncpa [#allocation3], 0 }
   0x3   :  { %11 = vsyncpa [#allocation6], 0 }
   0x4   :  { %12 = vsyncpa [#allocation9], 0 }
   0x5   :  { %14 = vsyncpa [#allocation9 + $0x1], 0 }
   0x6   :  { %15 = vsyncpa [#allocation4], 0 }
   0x7   :  { %17 = vsyncpa [#allocation4 + $0x1], 0  ;;  %s5481_s18 = smov 0   ;;  %s5483_s19 = smov 0  }
   0x8   :  { %s5485_s20 = smov 0   ;;  %s5487_s21 = smov 0  }
   0x9 LB: > { %s5502_s22 = sadd.s32 4294967295, %s5438_s21   ;;  %s4577_s23 = sadd.s32 4294967294, %s5438_s21   ;;  %s5438_s21 = sphi %s5487_s21, %s6430_s21   ;;  %s5434_s20 = sphi %s5485_s20, %s6429_s20   ;;  %s5430_s19 = sphi %s5483_s19, %s6428_s19   ;;  %s5426_s18 = sphi %s5481_s18, %s6427_s18  }
   0xa   : > { %s5506_s24 = sadd.s32 1, %s5438_s21   ;;  %s93_s25 = sadd.s32 1, %s5434_s20 }
   0xb   : > { %s90_s26 = ssub.s32 %s5438_s21, %s5506_s24  ;;  %p100_p0 = scmp.ne.s32.totalorder %s5434_s20, %s5430_s19 }
   0xc   : > { %p91_p1 = scmp.eq.s32.totalorder %s90_s26, 0  ;;  %p101_p2 = scmp.eq.s32.totalorder %s5438_s21, 0 }
   0xd   : > { %p106_p3 = scmp.ne.s32.totalorder %s5430_s19, %s5426_s18  ;;  %p6393_p4 = scmp.eq.s32.totalorder %s5502_s22, 0 }
   0xe   : > { %s5518_s27 = scalar_select %p91_p1, %s5434_s20, %s93_s25  }
   0xf   : > { %p5520_p5 = por %p101_p2, %p100_p0  ;;  %p5526_p6 = por %p6393_p4, %p106_p3 }
  0x10   : > { %p156_p7 = scmp.eq.s32.totalorder %s5502_s22, 1  ;;  %p162_p8 = scmp.eq.s32.totalorder %s4577_s23, 1 }
  0x11   : > { %s6404_s29 = scalar_select %p5526_p6, 1, 0 }
  0x12   : > { %p4578_p9 = scmp.ge.s32.totalorder %s5438_s21, 1  ;;  %p169_p10 = scmp.lt.s32.totalorder %s5438_s21, 3 }
  0x13   : > { %p5533_p11 = por %p156_p7, %p100_p0  ;;  %p5537_p12 = por %p162_p8, %p106_p3 }
  0x14   : > { %p5541_p13 = pnand %p4578_p9, %p169_p10  ;;  %s5440_s8 = smov [#allocation5]  }
  0x15   : > { %s6405_s30 = scalar_select %p5533_p11, 1, 0 }
  0x16   : > { %s6406_s6 = scalar_select %p5537_p12, 1, 0 }
  0x17   : > { %s6407_s7 = scalar_select %p5541_p13, 1, 0 }
  0x18   : > { %p5154_p2 = pneg %p5541_p13  ;;  %s193_s9 = sshll.u32 %s5440_s8, 4  ;;  %s194_s9 = int_to_ptr.vmem [resolvable:$true] %s193_s9 }
  0x19   : > { %p5178_p4 = scmp.lt.s32.totalorder %s5438_s21, 2  ;;  %p6408_p0 = scmp.eq.s32.totalorder %s5502_s22, 0 }
  0x1a   : > { %s215_s11 = sand.u32 1, %s5438_s21   ;;  %s6395_s13 = sand.u32 1, %s5434_s20  }
  0x1b   : > { %p5551_p7 = pnand %p5154_p2, %p6408_p0  ;;  %p5558_p3 = pnand %p5178_p4, %p5520_p5 }
  0x1c   : > { %s5243_s14 = scalar_lea.vmem %s194_s9, 512  ;;  %p5251_p0 = scmp.lt.s32.totalorder %s194_s9, %s194_s9 }
  0x1d   : > { %s6410_s12 = scalar_select %p5558_p3, 1, 0 }
  0x1e   : > { %p6396_p8 = pneg %p5551_p7  ;;  %p5244_p9 = scmp.ne.s32.totalorder %s194_s9, %s5243_s14 }
  0x1f   : > { %p5252_p1 = scmp.lt.s32.totalorder %s5243_s14, %s5243_s14 }
  0x20   : > { %p5246_p10 = pnand %p5244_p9, %p6396_p8 }
  0x21   : > { %p5253_p12 = por %p5252_p1, %p5251_p0 }
  0x22   : > { %p5247_p2 = pneg %p5246_p10 }
  0x24   : > { %p5254_p11 = pnand %p5253_p12, %p5247_p2 }
  0x26   : > { %5257 = shalt.err (!%p5254_p11)
}
  0x27   : > { %s6411_s1 = sld [smem:[#allocation16_spill]]  ;;  %s4583_s17 = sshll.u32 %s6395_s13, 12 }
  0x28   : > { %s5133_s23 = sshll.u32 %s5438_s21, 9  ;;  %s219_s8 = scalar_lea.vmem [#allocation8], %s4583_s17 }
  0x29   : > { %s5579_s28 = scalar_lea.hbm %s6390_s3, %s5133_s23  ;;  %s226_s14 = sshll.u32 %s219_s8, 4  ;;  %s5581_s14 = int_to_ptr.vmem [resolvable:$true] %s226_s14 }
  0x2a   : > { %s5583_s15 = scalar_lea.sflag [#allocation9], %s215_s11  ;;  %s5258_s16 = scalar_lea.hbm %s5579_s28, 65536 }
  0x2b   : > { %p5259_p4 = scmp.ne.s32.totalorder %s5579_s28, %s5258_s16  ;;  %p6399_p5 = pneg %p5558_p3 }
  0x2c   : > { %s5263_s25 = scalar_lea.hbm %s6390_s3, 131072  ;;  %p5264_p1 = scmp.lt.s32.totalorder %s5579_s28, %s6390_s3 }
  0x2d   : > { %5160 = dma.hbm_to_vmem [thread:$0]  (!%p5551_p7), %s6411_s1, 512, %s194_s9, [#allocation6]  }
  0x2e   : > { %p5261_p11 = pnand %p6399_p5, %p5259_p4  ;;  %p5265_p9 = scmp.lt.s32.totalorder %s5263_s25, %s5258_s16 }
  0x30   : > { %p5262_p12 = pneg %p5261_p11  ;;  %p5266_p10 = por %p5265_p9, %p5264_p1 }
  0x32   : > { %p5267_p2 = pnand %p5266_p10, %p5262_p12 }
  0x34   : > { %5270 = shalt.err (!%p5267_p2)
}
  0x35   : > { %s5271_s11 = scalar_lea.vmem %s5581_s14, 65536  ;;  %s5441_s17 = smov [#allocation8]  }
  0x36   : > { %p5272_p0 = scmp.ne.s32.totalorder %s5581_s14, %s5271_s11  ;;  %s5276_s8 = sshll.u32 %s5441_s17, 4  ;;  %s5277_s8 = int_to_ptr.vmem [resolvable:$false] %s5276_s8 }
  0x37   : > { %s5278_s9 = scalar_lea.vmem %s5277_s8, 131072  ;;  %p5279_p8 = scmp.lt.s32.totalorder %s5581_s14, %s5277_s8 }
  0x38   : > { %p5274_p4 = pnand %p5272_p0, %p6399_p5  ;;  %p5280_p6 = scmp.lt.s32.totalorder %s5278_s9, %s5271_s11 }
  0x3a   : > { %p5275_p11 = pneg %p5274_p4  ;;  %p5281_p13 = por %p5280_p6, %p5279_p8 }
  0x3c   : > { %p5282_p1 = pnand %p5281_p13, %p5275_p11 }
  0x3e   : > { %5285 = shalt.err (!%p5282_p1)
}
  0x3f   : > { %s5442_s13 = smov 1024   ;;  %s5443_s16 = smov 512  }
  0x40   : > { %s5444_s23 = smov 32   ;;  %s5445_s25 = smov [#allocation2]  }
  0x41   : > { %5167 = dma.hbm_to_vmem [thread:$0]  (!%p5558_p3), %s5579_s28, 65536, %s5581_s14, %s5583_s15, %s5442_s13, %s5443_s16, %s5444_s23  }
  0x42   : > { %s182_s26 = sshll.u32 %s5445_s25, 4  ;;  %s5446_s17 = smov [#allocation7]   ;;  %s183_s26 = int_to_ptr.vmem [resolvable:$true] %s182_s26 }
  0x43   : > { %s204_s1 = sshll.u32 %s5446_s17, 4  ;;  %s5297_s11 = scalar_lea.vmem %s183_s26, 16  ;;  %s205_s1 = int_to_ptr.vmem [resolvable:$true] %s204_s1 }
  0x44   : > { %p5298_p6 = scmp.ne.s32.totalorder %s183_s26, %s5297_s11  ;;  %p6412_p13 = pneg %p5551_p7 }
  0x45   : > { %s5304_s8 = scalar_lea.vmem %s183_s26, 32  ;;  %p5305_p9 = scmp.lt.s32.totalorder %s183_s26, %s183_s26 }
  0x46   : > { %p5300_p8 = pnand %p5298_p6, %p6412_p13  ;;  %p5306_p10 = scmp.lt.s32.totalorder %s5304_s8, %s5297_s11 }
  0x48   : > { %p5301_p12 = pneg %p5300_p8  ;;  %p5307_p2 = por %p5306_p10, %p5305_p9 }
  0x4a   : > { %p5308_p0 = pnand %p5307_p2, %p5301_p12 }
  0x4c   : > { %5311 = shalt.err (!%p5308_p0)
}
  0x4d   : > { %5157 = dma.hbm_to_vmem [thread:$0]  (!%p5551_p7), %s6387_s0, 16, %s183_s26, [#allocation3]  }
  0x4e   : > { %s5323_s9 = scalar_lea.vmem %s205_s1, 128  ;;  %p6413_p11 = pmov %p6412_p13 }
  0x4f   : > { %p5324_p4 = scmp.ne.s32.totalorder %s205_s1, %s5323_s9  ;;  %p5331_p13 = scmp.lt.s32.totalorder %s205_s1, %s205_s1 }
  0x50   : > { %p5332_p8 = scmp.lt.s32.totalorder %s5323_s9, %s5323_s9 }
  0x51   : > { %p5326_p1 = pnand %p5324_p4, %p6413_p11 }
  0x52   : > { %p5333_p5 = por %p5332_p8, %p5331_p13 }
  0x53   : > { %p5327_p6 = pneg %p5326_p1 }
  0x55   : > { %p5334_p3 = pnand %p5333_p5, %p5327_p6 }
  0x57   : > { %5337 = shalt.err (!%p5334_p3)
}
  0x58   : > { %5163 = dma.hbm_to_vmem [thread:$0]  (!%p5551_p7), %s6389_s2, 128, %s205_s1, [#allocation6]  }
  0x59   : > { %s6414_s23 = sand.u32 1, %s5434_s20   ;;  %s5134_s26 = sshll.u32 %s5438_s21, 7 }
  0x5a   : > { %s4586_s25 = sshll.u32 %s6414_s23, 3  ;;  %s246_s8 = scalar_lea.hbm %s6391_s4, %s5134_s26 }
  0x5b   : > { %s240_s28 = scalar_lea.vmem [#allocation10], %s4586_s25  ;;  %s5338_s9 = scalar_lea.hbm %s246_s8, 128 }
  0x5c   : > { %s248_s14 = sshll.u32 %s240_s28, 4  ;;  %p5339_p3 = scmp.ne.s32.totalorder %s246_s8, %s5338_s9  ;;  %s249_s14 = int_to_ptr.vmem [resolvable:$true] %s248_s14 }
  0x5d   : > { %p6415_p5 = scmp.ne.s32.totalorder %s6410_s12, 0  ;;  %s5343_s1 = scalar_lea.hbm %s6391_s4, 256 }
  0x5e   : > { %p5344_p7 = scmp.lt.s32.totalorder %s246_s8, %s6391_s4  ;;  %p5345_p2 = scmp.lt.s32.totalorder %s5343_s1, %s5338_s9 }
  0x5f   : > { %p6416_p12 = pneg %p6415_p5 }
  0x60   : > { %p5346_p0 = por %p5345_p2, %p5344_p7 }
  0x61   : > { %p5341_p9 = pnand %p5339_p3, %p6416_p12 }
  0x63   : > { %p5342_p10 = pneg %p5341_p9 }
  0x65   : > { %p5347_p4 = pnand %p5346_p0, %p5342_p10 }
  0x67   : > { %5350 = shalt.err (!%p5347_p4)
}
  0x68   : > { %s5351_s25 = scalar_lea.vmem %s249_s14, 128  ;;  %p6417_p1 = pmov %p6416_p12 }
  0x69   : > { %p5352_p11 = scmp.ne.s32.totalorder %s249_s14, %s5351_s25  ;;  %s5447_s26 = smov [#allocation10]  }
  0x6a   : > { %s5356_s17 = sshll.u32 %s5447_s26, 4  ;;  %s5357_s17 = int_to_ptr.vmem [resolvable:$false] %s5356_s17 }
  0x6b   : > { %p5354_p6 = pnand %p5352_p11, %p6417_p1  ;;  %s5358_s11 = scalar_lea.vmem %s5357_s17, 256 }
  0x6c   : > { %p5359_p8 = scmp.lt.s32.totalorder %s249_s14, %s5357_s17  ;;  %p5360_p3 = scmp.lt.s32.totalorder %s5358_s11, %s5351_s25 }
  0x6d   : > { %p5355_p13 = pneg %p5354_p6 }
  0x6e   : > { %p5361_p12 = por %p5360_p3, %p5359_p8 }
  0x70   : > { %p5362_p9 = pnand %p5361_p12, %p5355_p13 }
  0x72   : > { %5365 = shalt.err (!%p5362_p9)
}
  0x73   : > { %5170 = dma.hbm_to_vmem [thread:$0]  (!%p6415_p5), %s246_s8, 128, %s249_s14, %s5583_s15  }
  0x74   : > { %p6418_p10 = scmp.ne.s32.totalorder %s6407_s7, 0 }
  0x75   : > { %p6419_p7 = scmp.eq.s32.totalorder (!%p6418_p10), %s5502_s22, 0 }
  0x76   : > { %257 = sbr.rel (%p6418_p10) target bundleno = 1014 (0x3f6), region = 40 }
  0x7b   : > { %5409 = dma.done.wait (%p6419_p7), [#allocation3], 16   ;;  %p6420_p2 = pmov %p6419_p7 }
  0x7d   : > { %5411 = vsyncadd (%p6420_p2), [#allocation3], 4294967280  ;;  %p6421_p0 = pmov %p6420_p2 }
  0x7f   : > { %5413 = dma.done.wait (%p6421_p0), [#allocation6], 640   ;;  %p6422_p4 = pmov %p6421_p0 }
  0x80   : > { %s271_s12 = sand.u32 1, %s5502_s22   ;;  %s5659_s15 = sand.u32 1, %s5430_s19  }
  0x81   : > { %5415 = vsyncadd (%p6422_p4), [#allocation6], 4294966656  ;;  %s4593_s7 = sshll.u32 %s5659_s15, 12  ;;  %s272_s8 = scalar_lea.sflag [#allocation9], %s271_s12 }
  0x82   : > { %s5662_s28 = scalar_lea.vmem [#allocation8], %s4593_s7  ;;  %p6423_p5 = scmp.ne.s32.totalorder %s6404_s29, 0 }
  0x84   : > { %5417 = dma.done.wait (%p6423_p5), %s272_s8, 65664  }
  0x85   : > { %5419 = vsyncadd (%p6423_p5), %s272_s8, 4294901632  ;;  %v5448_v0 = vmov 0   ;;  %v321_v1 = vld [vmem:[#allocation5] sm:$0xff]  ;;  %vm391_vm0 = vcmask 1043456   ;;  %v322_v2 = vld [vmem:[#allocation5 + $0x8] sm:$0xff]  ;;  %vm387_vm1 = vcmask 64512  }
  0x86   : > { %448 = vmatprep.mubr.bf16.mxu0 %v5448_v0  ;;  %489 = vmatprep.mubr.bf16.mxu1 %v5448_v0  ;;  %v4597_v3 = vcombine.high %v321_v1, %v321_v1  ;;  %v4599_v4 = vcombine.high %v322_v2, %v322_v2  ;;  %v4596_v5 = vcombine.low %v321_v1, %v321_v1  ;;  %v323_v7 = vld [vmem:[#allocation5 + $0x10] sm:$0xff]  ;;  %v324_v8 = vld [vmem:[#allocation5 + $0x18] sm:$0xff]  ;;  %v652_v13 = vld [vmem:[%s5662_s28 + $0x1c0] sm:$0xff]  ;;  %s4594_s29 = sshll.u32 %s5659_s15, 3  ;;  %s5135_s9 = sshll.u32 %s5502_s22, 7 }
  0x87   : > { %v4598_v6 = vcombine.low %v322_v2, %v322_v2  ;;  %v4601_v9 = vcombine.high %v323_v7, %v323_v7  ;;  %v4600_v10 = vcombine.low %v323_v7, %v323_v7  ;;  %v4603_v11 = vcombine.high %v324_v8, %v324_v8  ;;  %v656_v16 = vld [vmem:[%s5662_s28 + $0x1e0] sm:$0xff]  ;;  %v320_v19 = vld [vmem:[#allocation2] sm:$0x1]  ;;  %s6027_s14 = scalar_lea.vmem [#allocation10], %s4594_s29  ;;  %s315_s10 = scalar_lea.vmem [#allocation11], %s4594_s29 }
  0x88   : > { %v4602_v12 = vcombine.low %v324_v8, %v324_v8  ;;  %4604 = vmatprep.subr.msk.bf16.mxu0 %vm391_vm0, %v4597_v3  ;;  %4606 = vmatprep.subr.msk.bf16.mxu1 %vm391_vm0, %v4599_v4  ;;  %v393_v14 = vsel %vm391_vm0, %v4596_v5, 0  ;;  %v780_v17 = vld [vmem:[%s5662_s28 + $0x5c0] sm:$0xff]  ;;  %v4669_v22 = vcombine.high %v652_v13, %v656_v16  ;;  %v4668_v28 = vcombine.low %v652_v13, %v656_v16  ;;  %s4456_s13 = sshll.u32 %s315_s10, 4  ;;  %s4454_s23 = scalar_lea.hbm %s6392_s5, %s5135_s9  ;;  %s4457_s13 = int_to_ptr.vmem [resolvable:$true] %s4456_s13 }
  0x89   : > { %v399_v15 = vsel %vm391_vm0, %v4598_v6, 0  ;;  %v784_v18 = vld [vmem:[%s5662_s28 + $0x5e0] sm:$0xff]  ;;  %431 = vmatpush1.bf16.msra.mxu0 %v393_v14  ;;  %v405_v20 = vsel %vm391_vm0, %v4600_v10, 0  ;;  %s4442_s25 = scalar_lea.sflag [#allocation4], %s5659_s15  ;;  %s5366_s26 = scalar_lea.vmem %s4457_s13, 128 }
  0x8a   : > { %472 = vmatpush1.bf16.msra.mxu1 %v399_v15  ;;  %4608 = vmatprep.subr.msk.bf16.mxu0 %vm391_vm0, %v4601_v9  ;;  %v411_v21 = vsel %vm391_vm0, %v4602_v12, 0  ;;  %v4797_v23 = vcombine.high %v780_v17, %v784_v18  ;;  %v644_v24 = vld [vmem:[%s5662_s28 + $0x180] sm:$0xff]  ;;  %v4796_v29 = vcombine.low %v780_v17, %v784_v18  ;;  %p5367_p11 = scmp.ne.s32.totalorder %s4457_s13, %s5366_s26  ;;  %p6424_p1 = scmp.ne.s32.totalorder %s6405_s30, 0 }
  0x8b   : > { %4610 = vmatprep.subr.msk.bf16.mxu1 %vm391_vm0, %v4603_v11  ;;  %v648_v25 = vld [vmem:[%s5662_s28 + $0x1a0] sm:$0xff]  ;;  %s5450_s22 = smov [#allocation11]  }
  0x8c   : > { %4605 = vmatmul.mubr.msk.bf16.vlgmr.msra.gmra.mxu0 %vm387_vm1, %v320_v19  ;;  %v772_v26 = vld [vmem:[%s5662_s28 + $0x580] sm:$0xff]  ;;  %v4661_v30 = vcombine.high %v644_v24, %v648_v25  ;;  %v4660_v36 = vcombine.low %v644_v24, %v648_v25  ;;  %p5368_p6 = pnand %p5367_p11, %p6424_p1  ;;  %s5370_s17 = sshll.u32 %s5450_s22, 4  ;;  %s5371_s17 = int_to_ptr.vmem [resolvable:$false] %s5370_s17 }
  0x8d   : > { %4607 = vmatmul.mubr.msk.bf16.vlgmr.msra.gmra.mxu1 %vm387_vm1, %v320_v19  ;;  %513 = vmatpush1.bf16.msra.mxu0 %v405_v20  ;;  %v776_v27 = vld [vmem:[%s5662_s28 + $0x5a0] sm:$0xff]  ;;  %s5372_s11 = scalar_lea.vmem %s5371_s17, 256  ;;  %p5373_p8 = scmp.lt.s32.totalorder %s4457_s13, %s5371_s17 }
  0x8e   : > { %530 = vmatprep.mubr.bf16.mxu0 %v5448_v0  ;;  %554 = vmatpush1.bf16.msra.mxu1 %v411_v21  ;;  %v4789_v31 = vcombine.high %v772_v26, %v776_v27  ;;  %v636_v32 = vld [vmem:[%s5662_s28 + $0x140] sm:$0xff]  ;;  %v4788_v37 = vcombine.low %v772_v26, %v776_v27  ;;  %p5369_p13 = pneg %p5368_p6  ;;  %p5374_p3 = scmp.lt.s32.totalorder %s5372_s11, %s5366_s26 }
  0x8f   : > { %571 = vmatprep.mubr.bf16.mxu1 %v5448_v0  ;;  %3710 = vmatprep.subr.bf16.mxu0 %v4669_v22  ;;  %v640_v33 = vld [vmem:[%s5662_s28 + $0x160] sm:$0xff] }
  0x90   : > { %3751 = vmatprep.subr.bf16.mxu1 %v4797_v23  ;;  %v764_v34 = vld [vmem:[%s5662_s28 + $0x540] sm:$0xff]  ;;  %v4653_v38 = vcombine.high %v636_v32, %v640_v33  ;;  %v4652_v44 = vcombine.low %v636_v32, %v640_v33  ;;  %p5375_p12 = por %p5374_p3, %p5373_p8 }
  0x91   : > { %v768_v35 = vld [vmem:[%s5662_s28 + $0x560] sm:$0xff] }
  0x92   : > { %v4781_v39 = vcombine.high %v764_v34, %v768_v35  ;;  %v628_v40 = vld [vmem:[%s5662_s28 + $0x100] sm:$0xff]  ;;  %v4780_v45 = vcombine.low %v764_v34, %v768_v35  ;;  %p5376_p9 = pnand %p5375_p12, %p5369_p13 }
  0x93   : > { %v632_v41 = vld [vmem:[%s5662_s28 + $0x120] sm:$0xff] }
  0x94   : > { %4609 = vmatmul.mubr.msk.bf16.vlgmr.msra.gmra.mxu0 %vm387_vm1, %v320_v19  ;;  %v756_v42 = vld [vmem:[%s5662_s28 + $0x500] sm:$0xff]  ;;  %v4645_v46 = vcombine.high %v628_v40, %v632_v41  ;;  %v4644_v52 = vcombine.low %v628_v40, %v632_v41 }
  0x95   : > { %4611 = vmatmul.mubr.msk.bf16.vlgmr.msra.gmra.mxu1 %vm387_vm1, %v320_v19  ;;  %3711 = vmatpush1.bf16.msra.mxu0 %v4668_v28  ;;  %v760_v43 = vld [vmem:[%s5662_s28 + $0x520] sm:$0xff] }
  0x96   : > { %3752 = vmatpush1.bf16.msra.mxu1 %v4796_v29  ;;  %3712 = vmatprep.subr.bf16.mxu0 %v4661_v30  ;;  %v4773_v47 = vcombine.high %v756_v42, %v760_v43  ;;  %v620_v48 = vld [vmem:[%s5662_s28 + $0xc0] sm:$0xff]  ;;  %v4772_v53 = vcombine.low %v756_v42, %v760_v43 }
  0x97   : > { %3753 = vmatprep.subr.bf16.mxu1 %v4789_v31  ;;  %v624_v49 = vld [vmem:[%s5662_s28 + $0xe0] sm:$0xff] }
  0x98   : > { %v748_v50 = vld [vmem:[%s5662_s28 + $0x4c0] sm:$0xff]  ;;  %v4637_v54 = vcombine.high %v620_v48, %v624_v49  ;;  %v4636_v60 = vcombine.low %v620_v48, %v624_v49 }
  0x99   : > { %3713 = vmatpush1.bf16.msra.mxu0 %v4660_v36  ;;  %v752_v51 = vld [vmem:[%s5662_s28 + $0x4e0] sm:$0xff] }
  0x9a   : > { %3754 = vmatpush1.bf16.msra.mxu1 %v4788_v37  ;;  %3714 = vmatprep.subr.bf16.mxu0 %v4653_v38  ;;  %v4765_v55 = vcombine.high %v748_v50, %v752_v51  ;;  %v612_v56 = vld [vmem:[%s5662_s28 + $0x80] sm:$0xff]  ;;  %v4764_v61 = vcombine.low %v748_v50, %v752_v51 }
  0x9b   : > { %3755 = vmatprep.subr.bf16.mxu1 %v4781_v39  ;;  %v616_v57 = vld [vmem:[%s5662_s28 + $0xa0] sm:$0xff] }
  0x9c   : > { %v740_v58 = vld [vmem:[%s5662_s28 + $0x480] sm:$0xff]  ;;  %v4629_v62 = vcombine.high %v612_v56, %v616_v57  ;;  %v4628_v4 = vcombine.low %v612_v56, %v616_v57 }
  0x9d   : > { %3715 = vmatpush1.bf16.msra.mxu0 %v4652_v44  ;;  %v744_v59 = vld [vmem:[%s5662_s28 + $0x4a0] sm:$0xff] }
  0x9e   : > { %3756 = vmatpush1.bf16.msra.mxu1 %v4780_v45  ;;  %3716 = vmatprep.subr.bf16.mxu0 %v4645_v46  ;;  %v4757_v63 = vcombine.high %v740_v58, %v744_v59  ;;  %v604_v0 = vld [vmem:[%s5662_s28 + $0x40] sm:$0xff]  ;;  %v4756_v5 = vcombine.low %v740_v58, %v744_v59 }
  0x9f   : > { %3757 = vmatprep.subr.bf16.mxu1 %v4773_v47  ;;  %v608_v1 = vld [vmem:[%s5662_s28 + $0x60] sm:$0xff] }
  0xa0   : > { %v732_v2 = vld [vmem:[%s5662_s28 + $0x440] sm:$0xff]  ;;  %v4621_v6 = vcombine.high %v604_v0, %v608_v1  ;;  %v4620_v12 = vcombine.low %v604_v0, %v608_v1 }
  0xa1   : > { %3717 = vmatpush1.bf16.msra.mxu0 %v4644_v52  ;;  %v736_v3 = vld [vmem:[%s5662_s28 + $0x460] sm:$0xff] }
  0xa2   : > { %3758 = vmatpush1.bf16.msra.mxu1 %v4772_v53  ;;  %3718 = vmatprep.subr.bf16.mxu0 %v4637_v54  ;;  %v4749_v7 = vcombine.high %v732_v2, %v736_v3  ;;  %v596_v8 = vld [vmem:[%s5662_s28] sm:$0xff]  ;;  %v4748_v13 = vcombine.low %v732_v2, %v736_v3 }
  0xa3   : > { %3759 = vmatprep.subr.bf16.mxu1 %v4765_v55  ;;  %v600_v9 = vld [vmem:[%s5662_s28 + $0x20] sm:$0xff] }
  0xa4   : > { %v724_v10 = vld [vmem:[%s5662_s28 + $0x400] sm:$0xff]  ;;  %v4613_v14 = vcombine.high %v596_v8, %v600_v9  ;;  %v4612_v20 = vcombine.low %v596_v8, %v600_v9 }
  0xa5   : > { %3719 = vmatpush1.bf16.msra.mxu0 %v4636_v60  ;;  %v728_v11 = vld [vmem:[%s5662_s28 + $0x420] sm:$0xff] }
  0xa6   : > { %3760 = vmatpush1.bf16.msra.mxu1 %v4764_v61  ;;  %3720 = vmatprep.subr.bf16.mxu0 %v4629_v62  ;;  %v4741_v15 = vcombine.high %v724_v10, %v728_v11  ;;  %v716_v16 = vld [vmem:[%s5662_s28 + $0x3c0] sm:$0xff]  ;;  %v4740_v21 = vcombine.low %v724_v10, %v728_v11 }
  0xa7   : > { %3761 = vmatprep.subr.bf16.mxu1 %v4757_v63  ;;  %v720_v17 = vld [vmem:[%s5662_s28 + $0x3e0] sm:$0xff] }
  0xa8   : > { %v844_v18 = vld [vmem:[%s5662_s28 + $0x7c0] sm:$0xff]  ;;  %v4733_v22 = vcombine.high %v716_v16, %v720_v17  ;;  %v4732_v28 = vcombine.low %v716_v16, %v720_v17 }
  0xa9   : > { %3721 = vmatpush1.bf16.msra.mxu0 %v4628_v4  ;;  %v848_v19 = vld [vmem:[%s5662_s28 + $0x7e0] sm:$0xff] }
  0xaa   : > { %3762 = vmatpush1.bf16.msra.mxu1 %v4756_v5  ;;  %3722 = vmatprep.subr.bf16.mxu0 %v4621_v6  ;;  %v4861_v23 = vcombine.high %v844_v18, %v848_v19  ;;  %v708_v24 = vld [vmem:[%s5662_s28 + $0x380] sm:$0xff]  ;;  %v4860_v29 = vcombine.low %v844_v18, %v848_v19 }
  0xab   : > { %3763 = vmatprep.subr.bf16.mxu1 %v4749_v7  ;;  %v712_v25 = vld [vmem:[%s5662_s28 + $0x3a0] sm:$0xff] }
  0xac   : > { %v836_v26 = vld [vmem:[%s5662_s28 + $0x780] sm:$0xff]  ;;  %v4725_v30 = vcombine.high %v708_v24, %v712_v25  ;;  %v4724_v36 = vcombine.low %v708_v24, %v712_v25 }
  0xad   : > { %3723 = vmatpush1.bf16.msra.mxu0 %v4620_v12  ;;  %v840_v27 = vld [vmem:[%s5662_s28 + $0x7a0] sm:$0xff] }
  0xae   : > { %3764 = vmatpush1.bf16.msra.mxu1 %v4748_v13  ;;  %3724 = vmatprep.subr.bf16.mxu0 %v4613_v14  ;;  %v4853_v31 = vcombine.high %v836_v26, %v840_v27  ;;  %v700_v32 = vld [vmem:[%s5662_s28 + $0x340] sm:$0xff]  ;;  %v4852_v37 = vcombine.low %v836_v26, %v840_v27  ;;  %v327_v26 = vlaneseq }
  0xaf   : > { %3765 = vmatprep.subr.bf16.mxu1 %v4741_v15  ;;  %v704_v33 = vld [vmem:[%s5662_s28 + $0x360] sm:$0xff] }
  0xb0   : > { %v828_v34 = vld [vmem:[%s5662_s28 + $0x740] sm:$0xff]  ;;  %v4717_v38 = vcombine.high %v700_v32, %v704_v33  ;;  %v4716_v44 = vcombine.low %v700_v32, %v704_v33  ;;  %v5760_v27 = vshrl.u32 %v327_v26, 7 }
  0xb1   : > { %3725 = vmatpush1.bf16.msra.mxu0 %v4612_v20  ;;  %v832_v35 = vld [vmem:[%s5662_s28 + $0x760] sm:$0xff] }
  0xb2   : > { %3766 = vmatpush1.bf16.msra.mxu1 %v4740_v21  ;;  %3726 = vmatprep.subr.bf16.mxu0 %v4733_v22  ;;  %v4845_v39 = vcombine.high %v828_v34, %v832_v35  ;;  %v692_v40 = vld [vmem:[%s5662_s28 + $0x300] sm:$0xff]  ;;  %v4844_v45 = vcombine.low %v828_v34, %v832_v35  ;;  %v341_v32 = vsub.s32 3, %v5760_v27 }
  0xb3   : > { %3767 = vmatprep.subr.bf16.mxu1 %v4861_v23  ;;  %v696_v41 = vld [vmem:[%s5662_s28 + $0x320] sm:$0xff] }
  0xb4   : > { %v820_v42 = vld [vmem:[%s5662_s28 + $0x700] sm:$0xff]  ;;  %v4709_v46 = vcombine.high %v692_v40, %v696_v41  ;;  %v4708_v52 = vcombine.low %v692_v40, %v696_v41 }
  0xb5   : > { %3727 = vmatpush2.bf16.msra.mxu0 %v4732_v28  ;;  %v824_v43 = vld [vmem:[%s5662_s28 + $0x720] sm:$0xff]  ;;  %v329_v28 = vsub.s32 0, %v5760_v27 }
  0xb6   : > { %3768 = vmatpush2.bf16.msra.mxu1 %v4860_v29  ;;  %3728 = vmatprep.subr.bf16.mxu0 %v4725_v30  ;;  %v4837_v47 = vcombine.high %v820_v42, %v824_v43  ;;  %v684_v48 = vld [vmem:[%s5662_s28 + $0x2c0] sm:$0xff]  ;;  %v4836_v53 = vcombine.low %v820_v42, %v824_v43  ;;  %v337_v29 = vsub.s32 2, %v5760_v27  ;;  %v5764_v30 = vld [vmem:[#allocation7] sm:$0xff]  ;;  %v349_v43 = vsub.s32 5, %v5760_v27 }
  0xb7   : > { %3769 = vmatprep.subr.bf16.mxu1 %v4853_v31  ;;  %v688_v49 = vld [vmem:[%s5662_s28 + $0x2e0] sm:$0xff]  ;;  %v333_v31 = vsub.s32 1, %v5760_v27  ;;  %v330_v33 = vrot.slane %v5764_v30, %v329_v28 }
  0xb8   : > { %v812_v50 = vld [vmem:[%s5662_s28 + $0x6c0] sm:$0xff]  ;;  %v4701_v54 = vcombine.high %v684_v48, %v688_v49  ;;  %v4700_v60 = vcombine.low %v684_v48, %v688_v49  ;;  %v338_v34 = vrot.slane %v5764_v30, %v337_v29 }
  0xb9   : > { %3729 = vmatpush2.bf16.msra.mxu0 %v4724_v36  ;;  %v816_v51 = vld [vmem:[%s5662_s28 + $0x6e0] sm:$0xff]  ;;  %v334_v35 = vrot.slane %v5764_v30, %v333_v31  ;;  %v342_v36 = vrot.slane %v5764_v30, %v341_v32 }
  0xba   : > { %3770 = vmatpush2.bf16.msra.mxu1 %v4852_v37  ;;  %3730 = vmatprep.subr.bf16.mxu0 %v4717_v38  ;;  %v4829_v55 = vcombine.high %v812_v50, %v816_v51  ;;  %v676_v56 = vld [vmem:[%s5662_s28 + $0x280] sm:$0xff]  ;;  %v4828_v61 = vcombine.low %v812_v50, %v816_v51 }
  0xbb   : > { %3771 = vmatprep.subr.bf16.mxu1 %v4845_v39  ;;  %v680_v57 = vld [vmem:[%s5662_s28 + $0x2a0] sm:$0xff] }
  0xbc   : > { %v804_v58 = vld [vmem:[%s5662_s28 + $0x680] sm:$0xff]  ;;  %v4693_v62 = vcombine.high %v676_v56, %v680_v57  ;;  %v4692_v0 = vcombine.low %v676_v56, %v680_v57 }
  0xbd   : > { %3731 = vmatpush2.bf16.msra.mxu0 %v4716_v44  ;;  %v808_v59 = vld [vmem:[%s5662_s28 + $0x6a0] sm:$0xff] }
  0xbe   : > { %3772 = vmatpush2.bf16.msra.mxu1 %v4844_v45  ;;  %3732 = vmatprep.subr.bf16.mxu0 %v4709_v46  ;;  %v4821_v63 = vcombine.high %v804_v58, %v808_v59  ;;  %v4820_v1 = vcombine.low %v804_v58, %v808_v59  ;;  %v668_v2 = vld [vmem:[%s5662_s28 + $0x240] sm:$0xff] }
  0xbf   : > { %3773 = vmatprep.subr.bf16.mxu1 %v4837_v47  ;;  %v672_v3 = vld [vmem:[%s5662_s28 + $0x260] sm:$0xff]  ;;  %v357_v47 = vsub.s32 7, %v5760_v27 }
  0xc0   : > { %v796_v4 = vld [vmem:[%s5662_s28 + $0x640] sm:$0xff]  ;;  %v4685_v5 = vcombine.high %v668_v2, %v672_v3  ;;  %v4684_v7 = vcombine.low %v668_v2, %v672_v3 }
  0xc1   : > { %3733 = vmatpush2.bf16.msra.mxu0 %v4708_v52  ;;  %v800_v6 = vld [vmem:[%s5662_s28 + $0x660] sm:$0xff] }
  0xc2   : > { %3774 = vmatpush2.bf16.msra.mxu1 %v4836_v53  ;;  %3734 = vmatprep.subr.bf16.mxu0 %v4701_v54  ;;  %v4812_v8 = vcombine.low %v796_v4, %v800_v6  ;;  %v4813_v9 = vcombine.high %v796_v4, %v800_v6  ;;  %v660_v10 = vld [vmem:[%s5662_s28 + $0x200] sm:$0xff] }
  0xc3   : > { %3775 = vmatprep.subr.bf16.mxu1 %v4829_v55  ;;  %v664_v11 = vld [vmem:[%s5662_s28 + $0x220] sm:$0xff] }
  0xc4   : > { %v788_v12 = vld [vmem:[%s5662_s28 + $0x600] sm:$0xff]  ;;  %v4677_v13 = vcombine.high %v660_v10, %v664_v11  ;;  %v4676_v15 = vcombine.low %v660_v10, %v664_v11 }
  0xc5   : > { %3735 = vmatpush2.bf16.msra.mxu0 %v4700_v60  ;;  %v792_v14 = vld [vmem:[%s5662_s28 + $0x620] sm:$0xff] }
  0xc6   : > { %3776 = vmatpush2.bf16.msra.mxu1 %v4828_v61  ;;  %3736 = vmatprep.subr.bf16.mxu0 %v4693_v62  ;;  %v4804_v16 = vcombine.low %v788_v12, %v792_v14  ;;  %v4805_v17 = vcombine.high %v788_v12, %v792_v14  ;;  %v5745_v18 = vld [vmem:[%s5662_s28 + $0x9c0] sm:$0xff]  ;;  %v350_v62 = vrot.slane %v5764_v30, %v349_v43 }
  0xc7   : > { %3777 = vmatprep.subr.bf16.mxu1 %v4821_v63  ;;  %v5748_v19 = vld [vmem:[%s5662_s28 + $0x9e0] sm:$0xff]  ;;  %v358_v63 = vrot.slane %v5764_v30, %v357_v47 }
  0xc8   : > { %v5751_v20 = vld [vmem:[%s5662_s28 + $0xdc0] sm:$0xff]  ;;  %v4925_v21 = vcombine.high %v5745_v18, %v5748_v19  ;;  %v4924_v23 = vcombine.low %v5745_v18, %v5748_v19 }
  0xc9   : > { %3737 = vmatpush2.bf16.msra.mxu0 %v4692_v0  ;;  %v1040_v22 = vld [vmem:[%s5662_s28 + $0xde0] sm:$0xff] }
  0xca   : > { %3778 = vmatpush2.bf16.msra.mxu1 %v4820_v1  ;;  %3738 = vmatprep.subr.bf16.mxu0 %v4685_v5  ;;  %v5052_v24 = vcombine.low %v5751_v20, %v1040_v22  ;;  %v5053_v25 = vcombine.high %v5751_v20, %v1040_v22  ;;  %v900_v51 = vld [vmem:[%s5662_s28 + $0x980] sm:$0xff] }
  0xcb   : > { %3779 = vmatprep.subr.bf16.mxu1 %v4813_v9  ;;  %v904_v54 = vld [vmem:[%s5662_s28 + $0x9a0] sm:$0xff] }
  0xcc   : > { %v1028_v55 = vld [vmem:[%s5662_s28 + $0xd80] sm:$0xff]  ;;  %v4917_v1 = vcombine.high %v900_v51, %v904_v54  ;;  %v4916_v9 = vcombine.low %v900_v51, %v904_v54 }
  0xcd   : > { %3739 = vmatpush2.bf16.msra.mxu0 %v4684_v7  ;;  %v1032_v56 = vld [vmem:[%s5662_s28 + $0xda0] sm:$0xff] }
  0xce   : > { %3780 = vmatpush2.bf16.msra.mxu1 %v4812_v8  ;;  %3740 = vmatprep.subr.bf16.mxu0 %v4677_v13  ;;  %v5045_v2 = vcombine.high %v1028_v55, %v1032_v56  ;;  %v892_v3 = vld [vmem:[%s5662_s28 + $0x940] sm:$0xff]  ;;  %v5044_v12 = vcombine.low %v1028_v55, %v1032_v56 }
  0xcf   : > { %3781 = vmatprep.subr.bf16.mxu1 %v4805_v17  ;;  %v896_v6 = vld [vmem:[%s5662_s28 + $0x960] sm:$0xff] }
  0xd0   : > { %v1020_v7 = vld [vmem:[%s5662_s28 + $0xd40] sm:$0xff] }
  0xd1   : > { %3741 = vmatpush2.bf16.msra.mxu0 %v4676_v15  ;;  %v1024_v8 = vld [vmem:[%s5662_s28 + $0xd60] sm:$0xff]  ;;  %v4909_v15 = vcombine.high %v892_v3, %v896_v6 }
  0xd2   : > { %3782 = vmatpush2.bf16.msra.mxu1 %v4804_v16  ;;  %3792 = vmatprep.subr.bf16.mxu0 %v4925_v21  ;;  %v5037_v16 = vcombine.high %v1020_v7, %v1024_v8  ;;  %v884_v17 = vld [vmem:[%s5662_s28 + $0x900] sm:$0xff] }
  0xd3   : > { %3833 = vmatprep.subr.bf16.mxu1 %v5053_v25  ;;  %v888_v20 = vld [vmem:[%s5662_s28 + $0x920] sm:$0xff] }
  0xd4   : > { %v1012_v21 = vld [vmem:[%s5662_s28 + $0xd00] sm:$0xff] }
  0xd5   : > { %v1016_v22 = vld [vmem:[%s5662_s28 + $0xd20] sm:$0xff] }
  0xd6   : > { %v996_v51 = vld [vmem:[%s5662_s28 + $0xc80] sm:$0xff] }
 0x14c   : > { %v450_v37 = vpop.f32.mrf.mxu0 }
 0x14d   : > { %v491_v38 = vpop.f32.mrf.mxu1  ;;  %v451_v39 = vadd.f32 %v450_v37, %v330_v33  ;;  %v4901_v37 = vcombine.high %v884_v17, %v888_v20 }
 0x14e   : > { %v492_v40 = vadd.f32 %v491_v38, %v338_v34  ;;  %v452_v41 = vpop.f32.mrf.mxu0  ;;  %v5036_v34 = vcombine.low %v1020_v7, %v1024_v8  ;;  %v5029_v38 = vcombine.high %v1012_v21, %v1016_v22  ;;  %v852_v7 = vld [vmem:[%s5662_s28 + $0x800] sm:$0xff] }
 0x14f   : > { %v493_v42 = vpop.f32.mrf.mxu1  ;;  %v453_v45 = vadd.f32 %v452_v41, %v334_v35  ;;  %v580_v48 = vmax.f32 %v451_v39, 0.0  ;;  %v876_v39 = vld [vmem:[%s5662_s28 + $0x8c0] sm:$0xff] }
 0x150   : > { %v582_v44 = vmax.f32 %v492_v40, 0.0  ;;  %v494_v46 = vadd.f32 %v493_v42, %v342_v36  ;;  %v454_v49 = vpop.f32.mrf.mxu0  ;;  %v880_v40 = vld [vmem:[%s5662_s28 + $0x8e0] sm:$0xff] }
 0x151   : > { %v495_v50 = vpop.f32.mrf.mxu1  ;;  %v581_v52 = vmax.f32 %v453_v45, 0.0  ;;  %v5798_v0 = vpack.c.bf16 %v580_v48, %v580_v48  ;;  %v1004_v41 = vld [vmem:[%s5662_s28 + $0xcc0] sm:$0xff]  ;;  %v5028_v45 = vcombine.low %v1012_v21, %v1016_v22 }
 0x152   : > { %v583_v53 = vmax.f32 %v494_v46, 0.0  ;;  %v5786_v57 = vpack.c.bf16 %v582_v44, %v582_v44  ;;  %v455_v58 = vpop.f32.mrf.mxu0  ;;  %v1008_v42 = vld [vmem:[%s5662_s28 + $0xce0] sm:$0xff]  ;;  %v4900_v44 = vcombine.low %v884_v17, %v888_v20  ;;  %v4893_v46 = vcombine.high %v876_v39, %v880_v40 }
 0x153   : > { %v496_v59 = vpop.f32.mrf.mxu1  ;;  %v5788_v60 = vpack.c.bf16 %v581_v52, %v581_v52  ;;  %v5021_v48 = vcombine.high %v1004_v41, %v1008_v42  ;;  %v868_v49 = vld [vmem:[%s5662_s28 + $0x880] sm:$0xff]  ;;  %v5020_v54 = vcombine.low %v1004_v41, %v1008_v42 }
 0x154   : > { %v5790_v61 = vpack.c.bf16 %v583_v53, %v583_v53  ;;  %v5801_v4 = vpop.f32.mrf.mxu0  ;;  %v872_v50 = vld [vmem:[%s5662_s28 + $0x8a0] sm:$0xff]  ;;  %v4892_v53 = vcombine.low %v876_v39, %v880_v40 }
 0x155   : > { %v5803_v5 = vpop.f32.mrf.mxu1  ;;  %3742 = vmatprep.mubr.bf16.mxu0 %v5788_v60  ;;  %v1000_v52 = vld [vmem:[%s5662_s28 + $0xca0] sm:$0xff]  ;;  %v4885_v55 = vcombine.high %v868_v49, %v872_v50 }
 0x156   : > { %3783 = vmatprep.mubr.bf16.mxu1 %v5790_v61  ;;  %3743 = vmatmul.mubr.bf16.vlgmr.msra.gmra.mxu0 %v5798_v0  ;;  %v534_v10 = vpop.f32.mrf.mxu0  ;;  %v5013_v56 = vcombine.high %v996_v51, %v1000_v52  ;;  %v860_v58 = vld [vmem:[%s5662_s28 + $0x840] sm:$0xff] }
 0x157   : > { %3784 = vmatmul.mubr.bf16.vlgmr.msra.gmra.mxu1 %v5786_v57  ;;  %v575_v11 = vpop.f32.mrf.mxu1  ;;  %3793 = vmatpush1.bf16.msra.mxu0 %v4924_v23  ;;  %v535_v13 = vadd.f32 %v534_v10, %v350_v62  ;;  %v4908_v23 = vcombine.low %v892_v3, %v896_v6  ;;  %v864_v59 = vld [vmem:[%s5662_s28 + $0x860] sm:$0xff] }
 0x158   : > { %3834 = vmatpush1.bf16.msra.mxu1 %v5052_v24  ;;  %v576_v14 = vadd.f32 %v575_v11, %v358_v63  ;;  %3794 = vmatprep.subr.bf16.mxu0 %v4917_v1  ;;  %v536_v18 = vpop.f32.mrf.mxu0  ;;  %v988_v62 = vld [vmem:[%s5662_s28 + $0xc40] sm:$0xff]  ;;  %v4884_v1 = vcombine.low %v868_v49, %v872_v50  ;;  %v4877_v3 = vcombine.high %v860_v58, %v864_v59 }
 0x159   : > { %3835 = vmatprep.subr.bf16.mxu1 %v5045_v2  ;;  %v577_v19 = vpop.f32.mrf.mxu1  ;;  %v585_v25 = vmax.f32 %v535_v13, 0.0  ;;  %v992_v63 = vld [vmem:[%s5662_s28 + $0xc60] sm:$0xff]  ;;  %v5012_v2 = vcombine.low %v996_v51, %v1000_v52  ;;  %v4876_v11 = vcombine.low %v860_v58, %v864_v59 }
 0x15a   : > { %v587_v26 = vmax.f32 %v576_v14, 0.0  ;;  %v537_v24 = vpop.f32.mrf.mxu0  ;;  %v5005_v6 = vcombine.high %v988_v62, %v992_v63  ;;  %v856_v8 = vld [vmem:[%s5662_s28 + $0x820] sm:$0xff] }
 0x15b   : > { %v578_v33 = vpop.f32.mrf.mxu1  ;;  %3795 = vmatpush1.bf16.msra.mxu0 %v4916_v9  ;;  %v5816_v35 = vpack.c.bf16 %v585_v25, %v585_v25  ;;  %v980_v9 = vld [vmem:[%s5662_s28 + $0xc00] sm:$0xff]  ;;  %v4869_v13 = vcombine.high %v852_v7, %v856_v8  ;;  %v4868_v19 = vcombine.low %v852_v7, %v856_v8 }
 0x15c   : > { %3836 = vmatpush1.bf16.msra.mxu1 %v5044_v12  ;;  %v5818_v36 = vpack.c.bf16 %v587_v26, %v587_v26  ;;  %3796 = vmatprep.subr.bf16.mxu0 %v4909_v15  ;;  %v984_v10 = vld [vmem:[%s5662_s28 + $0xc20] sm:$0xff]  ;;  %v5004_v12 = vcombine.low %v988_v62, %v992_v63 }
 0x15d   : > { %3837 = vmatprep.subr.bf16.mxu1 %v5037_v16  ;;  %3824 = vmatprep.mubr.bf16.mxu0 %v5816_v35  ;;  %v4997_v14 = vcombine.high %v980_v9, %v984_v10  ;;  %v972_v15 = vld [vmem:[%s5662_s28 + $0xbc0] sm:$0xff]  ;;  %v4996_v20 = vcombine.low %v980_v9, %v984_v10 }
 0x15e   : > { %3865 = vmatprep.mubr.bf16.mxu1 %v5818_v36  ;;  %v976_v16 = vld [vmem:[%s5662_s28 + $0xbe0] sm:$0xff] }
 0x15f   : > { %3797 = vmatpush1.bf16.msra.mxu0 %v4908_v23  ;;  %v1100_v17 = vld [vmem:[%s5662_s28 + $0xfc0] sm:$0xff]  ;;  %v4989_v21 = vcombine.high %v972_v15, %v976_v16  ;;  %v4988_v33 = vcombine.low %v972_v15, %v976_v16 }
 0x160   : > { %3838 = vmatpush1.bf16.msra.mxu1 %v5036_v34  ;;  %3798 = vmatprep.subr.bf16.mxu0 %v4901_v37  ;;  %v1104_v18 = vld [vmem:[%s5662_s28 + $0xfe0] sm:$0xff] }
 0x161   : > { %3839 = vmatprep.subr.bf16.mxu1 %v5029_v38  ;;  %v5117_v22 = vcombine.high %v1100_v17, %v1104_v18  ;;  %v964_v25 = vld [vmem:[%s5662_s28 + $0xb80] sm:$0xff]  ;;  %v5116_v34 = vcombine.low %v1100_v17, %v1104_v18 }
 0x162   : > { %v968_v26 = vld [vmem:[%s5662_s28 + $0xba0] sm:$0xff] }
 0x163   : > { %3799 = vmatpush1.bf16.msra.mxu0 %v4900_v44  ;;  %v1092_v23 = vld [vmem:[%s5662_s28 + $0xf80] sm:$0xff]  ;;  %v4981_v37 = vcombine.high %v964_v25, %v968_v26  ;;  %v4980_v44 = vcombine.low %v964_v25, %v968_v26 }
 0x164   : > { %3840 = vmatpush1.bf16.msra.mxu1 %v5028_v45  ;;  %3800 = vmatprep.subr.bf16.mxu0 %v4893_v46  ;;  %v1096_v24 = vld [vmem:[%s5662_s28 + $0xfa0] sm:$0xff] }
 0x165   : > { %3841 = vmatprep.subr.bf16.mxu1 %v5021_v48  ;;  %v5109_v38 = vcombine.high %v1092_v23, %v1096_v24  ;;  %v956_v39 = vld [vmem:[%s5662_s28 + $0xb40] sm:$0xff]  ;;  %v5108_v45 = vcombine.low %v1092_v23, %v1096_v24 }
 0x166   : > { %v960_v40 = vld [vmem:[%s5662_s28 + $0xb60] sm:$0xff] }
 0x167   : > { %3801 = vmatpush1.bf16.msra.mxu0 %v4892_v53  ;;  %v1084_v41 = vld [vmem:[%s5662_s28 + $0xf40] sm:$0xff]  ;;  %v4973_v46 = vcombine.high %v956_v39, %v960_v40  ;;  %v4972_v53 = vcombine.low %v956_v39, %v960_v40 }
 0x168   : > { %3842 = vmatpush1.bf16.msra.mxu1 %v5020_v54  ;;  %3802 = vmatprep.subr.bf16.mxu0 %v4885_v55  ;;  %v1088_v42 = vld [vmem:[%s5662_s28 + $0xf60] sm:$0xff] }
 0x169   : > { %3843 = vmatprep.subr.bf16.mxu1 %v5013_v56  ;;  %v5101_v48 = vcombine.high %v1084_v41, %v1088_v42  ;;  %v948_v49 = vld [vmem:[%s5662_s28 + $0xb00] sm:$0xff]  ;;  %v5100_v54 = vcombine.low %v1084_v41, %v1088_v42 }
 0x16a   : > { %v952_v50 = vld [vmem:[%s5662_s28 + $0xb20] sm:$0xff] }
 0x16b   : > { %3803 = vmatpush1.bf16.msra.mxu0 %v4884_v1  ;;  %v1076_v51 = vld [vmem:[%s5662_s28 + $0xf00] sm:$0xff]  ;;  %v4965_v55 = vcombine.high %v948_v49, %v952_v50  ;;  %v4964_v1 = vcombine.low %v948_v49, %v952_v50  ;;  %v785_v49 = vld [vmem:[%s5662_s28 + $0x5e8] sm:$0xff] }
 0x16c   : > { %3844 = vmatpush1.bf16.msra.mxu1 %v5012_v2  ;;  %3804 = vmatprep.subr.bf16.mxu0 %v4877_v3  ;;  %v1080_v52 = vld [vmem:[%s5662_s28 + $0xf20] sm:$0xff] }
 0x16d   : > { %3845 = vmatprep.subr.bf16.mxu1 %v5005_v6  ;;  %v5093_v56 = vcombine.high %v1076_v51, %v1080_v52  ;;  %v940_v58 = vld [vmem:[%s5662_s28 + $0xac0] sm:$0xff]  ;;  %v5092_v2 = vcombine.low %v1076_v51, %v1080_v52 }
 0x16e   : > { %v944_v59 = vld [vmem:[%s5662_s28 + $0xae0] sm:$0xff] }
 0x16f   : > { %3805 = vmatpush1.bf16.msra.mxu0 %v4876_v11  ;;  %v1068_v62 = vld [vmem:[%s5662_s28 + $0xec0] sm:$0xff]  ;;  %v4957_v3 = vcombine.high %v940_v58, %v944_v59  ;;  %v353_v11 = vsub.s32 6, %v5760_v27 }
 0x170   : > { %3846 = vmatpush1.bf16.msra.mxu1 %v5004_v12  ;;  %3806 = vmatprep.subr.bf16.mxu0 %v4869_v13  ;;  %v1072_v63 = vld [vmem:[%s5662_s28 + $0xee0] sm:$0xff]  ;;  %v4956_v12 = vcombine.low %v940_v58, %v944_v59  ;;  %v773_v58 = vld [vmem:[%s5662_s28 + $0x588] sm:$0xff] }
 0x171   : > { %3847 = vmatprep.subr.bf16.mxu1 %v4997_v14  ;;  %v5085_v6 = vcombine.high %v1068_v62, %v1072_v63  ;;  %v932_v7 = vld [vmem:[%s5662_s28 + $0xa80] sm:$0xff]  ;;  %v5084_v13 = vcombine.low %v1068_v62, %v1072_v63  ;;  %v345_v14 = vsub.s32 4, %v5760_v27  ;;  %v777_v59 = vld [vmem:[%s5662_s28 + $0x5a8] sm:$0xff] }
 0x172   : > { %v936_v8 = vld [vmem:[%s5662_s28 + $0xaa0] sm:$0xff] }
 0x173   : > { %3807 = vmatpush1.bf16.msra.mxu0 %v4868_v19  ;;  %v1060_v9 = vld [vmem:[%s5662_s28 + $0xe80] sm:$0xff]  ;;  %v4949_v15 = vcombine.high %v932_v7, %v936_v8  ;;  %v346_v26 = vrot.slane %v5764_v30, %v345_v14 }
 0x174   : > { %3848 = vmatpush1.bf16.msra.mxu1 %v4996_v20  ;;  %3808 = vmatprep.subr.bf16.mxu0 %v4989_v21  ;;  %v1064_v10 = vld [vmem:[%s5662_s28 + $0xea0] sm:$0xff]  ;;  %v354_v21 = vrot.slane %v5764_v30, %v353_v11 }
 0x175   : > { %3849 = vmatprep.subr.bf16.mxu1 %v5117_v22  ;;  %v5077_v16 = vcombine.high %v1060_v9, %v1064_v10  ;;  %v924_v17 = vld [vmem:[%s5662_s28 + $0xa40] sm:$0xff]  ;;  %v4948_v22 = vcombine.low %v932_v7, %v936_v8  ;;  %v5076_v25 = vcombine.low %v1060_v9, %v1064_v10  ;;  %v533_v30 = vadd.f32 %v5801_v4, %v346_v26  ;;  %v641_v7 = vld [vmem:[%s5662_s28 + $0x168] sm:$0xff] }
 0x176   : > { %v928_v18 = vld [vmem:[%s5662_s28 + $0xa60] sm:$0xff]  ;;  %v574_v39 = vadd.f32 %v5803_v5, %v354_v21  ;;  %v765_v8 = vld [vmem:[%s5662_s28 + $0x548] sm:$0xff] }
 0x177   : > { %3809 = vmatpush2.bf16.msra.mxu0 %v4988_v33  ;;  %v1052_v19 = vld [vmem:[%s5662_s28 + $0xe40] sm:$0xff]  ;;  %v4941_v23 = vcombine.high %v924_v17, %v928_v18  ;;  %v4940_v40 = vcombine.low %v924_v17, %v928_v18  ;;  %v584_v52 = vmax.f32 %v533_v30, 0.0  ;;  %v769_v9 = vld [vmem:[%s5662_s28 + $0x568] sm:$0xff] }
 0x178   : > { %3850 = vmatpush2.bf16.msra.mxu1 %v5116_v34  ;;  %3810 = vmatprep.subr.bf16.mxu0 %v4981_v37  ;;  %v1056_v20 = vld [vmem:[%s5662_s28 + $0xe60] sm:$0xff]  ;;  %v586_v50 = vmax.f32 %v574_v39, 0.0  ;;  %v633_v17 = vld [vmem:[%s5662_s28 + $0x128] sm:$0xff]  ;;  %v4782_v21 = vcombine.low %v765_v8, %v769_v9 }
 0x179   : > { %3851 = vmatprep.subr.bf16.mxu1 %v5109_v38  ;;  %v5069_v24 = vcombine.high %v1052_v19, %v1056_v20  ;;  %v916_v33 = vld [vmem:[%s5662_s28 + $0xa00] sm:$0xff]  ;;  %v5068_v41 = vcombine.low %v1052_v19, %v1056_v20  ;;  %v5890_v63 = vpack.c.bf16 %v584_v52, %v584_v52  ;;  %v757_v18 = vld [vmem:[%s5662_s28 + $0x508] sm:$0xff] }
 0x17a   : > { %v920_v34 = vld [vmem:[%s5662_s28 + $0xa20] sm:$0xff]  ;;  %v761_v19 = vld [vmem:[%s5662_s28 + $0x528] sm:$0xff] }
 0x17b   : > { %3811 = vmatpush2.bf16.msra.mxu0 %v4980_v44  ;;  %v1044_v37 = vld [vmem:[%s5662_s28 + $0xe00] sm:$0xff]  ;;  %v4933_v42 = vcombine.high %v916_v33, %v920_v34  ;;  %v4932_v5 = vcombine.low %v916_v33, %v920_v34  ;;  %v621_v26 = vld [vmem:[%s5662_s28 + $0xc8] sm:$0xff] }
 0x17c   : > { %3852 = vmatpush2.bf16.msra.mxu1 %v5108_v45  ;;  %3812 = vmatprep.subr.bf16.mxu0 %v4973_v46  ;;  %v1048_v38 = vld [vmem:[%s5662_s28 + $0xe20] sm:$0xff]  ;;  %v653_v45 = vld [vmem:[%s5662_s28 + $0x1c8] sm:$0xff] }
 0x17d   : > { %3853 = vmatprep.subr.bf16.mxu1 %v5101_v48  ;;  %v5061_v44 = vcombine.high %v1044_v37, %v1048_v38  ;;  %v657_v46 = vld [vmem:[%s5662_s28 + $0x1e8] sm:$0xff]  ;;  %v5060_v51 = vcombine.low %v1044_v37, %v1048_v38  ;;  %v4774_v37 = vcombine.low %v757_v18, %v761_v19 }
 0x17e   : > { %v781_v48 = vld [vmem:[%s5662_s28 + $0x5c8] sm:$0xff]  ;;  %v4671_v4 = vcombine.high %v653_v45, %v657_v46  ;;  %v4670_v62 = vcombine.low %v653_v45, %v657_v46 }
 0x17f   : > { %3813 = vmatpush2.bf16.msra.mxu0 %v4972_v53  ;;  %v4799_v53 = vcombine.high %v781_v48, %v785_v49  ;;  %v753_v33 = vld [vmem:[%s5662_s28 + $0x4e8] sm:$0xff] }
 0x180   : > { %3854 = vmatpush2.bf16.msra.mxu1 %v5100_v54  ;;  %3814 = vmatprep.subr.bf16.mxu0 %v4965_v55  ;;  %v645_v54 = vld [vmem:[%s5662_s28 + $0x188] sm:$0xff]  ;;  %v5885_v55 = vpack.c.bf16 %v586_v50, %v586_v50 }
 0x181   : > { %3855 = vmatprep.subr.bf16.mxu1 %v5093_v56  ;;  %v649_v56 = vld [vmem:[%s5662_s28 + $0x1a8] sm:$0xff] }
 0x182   : > { %v4662_v10 = vcombine.low %v645_v54, %v649_v56  ;;  %v741_v30 = vld [vmem:[%s5662_s28 + $0x488] sm:$0xff] }
 0x183   : > { %3815 = vmatpush2.bf16.msra.mxu0 %v4964_v1  ;;  %v4798_v1 = vcombine.low %v781_v48, %v785_v49  ;;  %v605_v49 = vld [vmem:[%s5662_s28 + $0x48] sm:$0xff] }
 0x184   : > { %3856 = vmatpush2.bf16.msra.mxu1 %v5092_v2  ;;  %3816 = vmatprep.subr.bf16.mxu0 %v4957_v3  ;;  %v4663_v2 = vcombine.high %v645_v54, %v649_v56  ;;  %v4791_v3 = vcombine.high %v773_v58, %v777_v59  ;;  %v609_v50 = vld [vmem:[%s5662_s28 + $0x68] sm:$0xff] }
 0x185   : > { %3857 = vmatprep.subr.bf16.mxu1 %v5085_v6  ;;  %v637_v6 = vld [vmem:[%s5662_s28 + $0x148] sm:$0xff] }
 0x186   : > { %v4654_v20 = vcombine.low %v637_v6, %v641_v7  ;;  %v597_v56 = vld [vmem:[%s5662_s28 + $0x8] sm:$0xff] }
 0x187   : > { %3817 = vmatpush2.bf16.msra.mxu0 %v4956_v12  ;;  %v4790_v12 = vcombine.low %v773_v58, %v777_v59  ;;  %v601_v58 = vld [vmem:[%s5662_s28 + $0x28] sm:$0xff] }
 0x188   : > { %3858 = vmatpush2.bf16.msra.mxu1 %v5084_v13  ;;  %3818 = vmatprep.subr.bf16.mxu0 %v4949_v15  ;;  %v4655_v13 = vcombine.high %v637_v6, %v641_v7  ;;  %v4783_v15 = vcombine.high %v765_v8, %v769_v9  ;;  %v725_v59 = vld [vmem:[%s5662_s28 + $0x408] sm:$0xff] }
 0x189   : > { %3859 = vmatprep.subr.bf16.mxu1 %v5077_v16  ;;  %v629_v16 = vld [vmem:[%s5662_s28 + $0x108] sm:$0xff] }
 0x18a   : > { %v4646_v34 = vcombine.low %v629_v16, %v633_v17  ;;  %v717_v7 = vld [vmem:[%s5662_s28 + $0x3c8] sm:$0xff] }
 0x18b   : > { %3819 = vmatpush2.bf16.msra.mxu0 %v4948_v22  ;;  %v4647_v22 = vcombine.high %v629_v16, %v633_v17  ;;  %v721_v8 = vld [vmem:[%s5662_s28 + $0x3e8] sm:$0xff] }
 0x18c   : > { %3860 = vmatpush2.bf16.msra.mxu1 %v5076_v25  ;;  %3820 = vmatprep.subr.bf16.mxu0 %v4941_v23  ;;  %v4775_v25 = vcombine.high %v757_v18, %v761_v19  ;;  %v625_v23 = vld [vmem:[%s5662_s28 + $0xe8] sm:$0xff] }
 0x18d   : > { %3861 = vmatprep.subr.bf16.mxu1 %v5069_v24  ;;  %v749_v24 = vld [vmem:[%s5662_s28 + $0x4c8] sm:$0xff]  ;;  %v4639_v38 = vcombine.high %v621_v26, %v625_v23 }
 0x18e   : > { %v4767_v39 = vcombine.high %v749_v24, %v753_v33  ;;  %v4766_v45 = vcombine.low %v749_v24, %v753_v33  ;;  %v845_v9 = vld [vmem:[%s5662_s28 + $0x7c8] sm:$0xff] }
 0x18f   : > { %3821 = vmatpush2.bf16.msra.mxu0 %v4940_v40  ;;  %v613_v40 = vld [vmem:[%s5662_s28 + $0x88] sm:$0xff] }
 0x190   : > { %3862 = vmatpush2.bf16.msra.mxu1 %v5068_v41  ;;  %3822 = vmatprep.subr.bf16.mxu0 %v4933_v42  ;;  %v617_v41 = vld [vmem:[%s5662_s28 + $0xa8] sm:$0xff] }
 0x191   : > { %3863 = vmatprep.subr.bf16.mxu1 %v5061_v44  ;;  %v745_v42 = vld [vmem:[%s5662_s28 + $0x4a8] sm:$0xff]  ;;  %v4638_v44 = vcombine.low %v621_v26, %v625_v23  ;;  %v4631_v46 = vcombine.high %v613_v40, %v617_v41  ;;  %v4630_v52 = vcombine.low %v613_v40, %v617_v41 }
 0x192   : > { %v4759_v48 = vcombine.high %v741_v30, %v745_v42  ;;  %v709_v17 = vld [vmem:[%s5662_s28 + $0x388] sm:$0xff] }
 0x193   : > { %3823 = vmatpush2.bf16.msra.mxu0 %v4932_v5  ;;  %v733_v5 = vld [vmem:[%s5662_s28 + $0x448] sm:$0xff] }
 0x194   : > { %3864 = vmatpush2.bf16.msra.mxu1 %v5060_v51  ;;  %3874 = vmatprep.subr.bf16.mxu0 %v4671_v4  ;;  %v737_v51 = vld [vmem:[%s5662_s28 + $0x468] sm:$0xff]  ;;  %v4758_v4 = vcombine.low %v741_v30, %v745_v42 }
 0x195   : > { %3915 = vmatprep.subr.bf16.mxu1 %v4799_v53  ;;  %v4623_v53 = vcombine.high %v605_v49, %v609_v50  ;;  %v4751_v54 = vcombine.high %v733_v5, %v737_v51  ;;  %v713_v18 = vld [vmem:[%s5662_s28 + $0x3a8] sm:$0xff] }
 0x196   : > { %3825 = vmatmul.mubr.bf16.vlgmr.msra.gmra.mxu0 %v5890_v63  ;;  %v837_v19 = vld [vmem:[%s5662_s28 + $0x788] sm:$0xff] }
 0x197   : > { %3866 = vmatmul.mubr.bf16.vlgmr.msra.gmra.mxu1 %v5885_v55  ;;  %3875 = vmatpush1.bf16.msra.mxu0 %v4670_v62  ;;  %v729_v62 = vld [vmem:[%s5662_s28 + $0x428] sm:$0xff] }
 0x198   : > { %3906 = vmatprep.mubr.bf16.mxu0 %v5788_v60  ;;  %3916 = vmatpush1.bf16.msra.mxu1 %v4798_v1  ;;  %v4622_v1 = vcombine.low %v605_v49, %v609_v50  ;;  %v4743_v6 = vcombine.high %v725_v59, %v729_v62  ;;  %v701_v23 = vld [vmem:[%s5662_s28 + $0x348] sm:$0xff] }
 0x199   : > { %3947 = vmatprep.mubr.bf16.mxu1 %v5790_v61  ;;  %3876 = vmatprep.subr.bf16.mxu0 %v4663_v2  ;;  %v4750_v2 = vcombine.low %v733_v5, %v737_v51  ;;  %v705_v24 = vld [vmem:[%s5662_s28 + $0x368] sm:$0xff] }
 0x19a   : > { %3917 = vmatprep.subr.bf16.mxu1 %v4791_v3  ;;  %v4615_v3 = vcombine.high %v597_v56, %v601_v58  ;;  %v829_v33 = vld [vmem:[%s5662_s28 + $0x748] sm:$0xff] }
 0x19b   : > { %3877 = vmatpush1.bf16.msra.mxu0 %v4662_v10  ;;  %v849_v10 = vld [vmem:[%s5662_s28 + $0x7e8] sm:$0xff] }
 0x19c   : > { %3918 = vmatpush1.bf16.msra.mxu1 %v4790_v12  ;;  %3878 = vmatprep.subr.bf16.mxu0 %v4655_v13  ;;  %v4614_v12 = vcombine.low %v597_v56, %v601_v58  ;;  %v4742_v13 = vcombine.low %v725_v59, %v729_v62  ;;  %v4863_v16 = vcombine.high %v845_v9, %v849_v10  ;;  %v693_v41 = vld [vmem:[%s5662_s28 + $0x308] sm:$0xff] }
 0x19d   : > { %3919 = vmatprep.subr.bf16.mxu1 %v4783_v15  ;;  %v4735_v15 = vcombine.high %v717_v7, %v721_v8  ;;  %v697_v30 = vld [vmem:[%s5662_s28 + $0x328] sm:$0xff] }
 0x19e   : > { %v821_v42 = vld [vmem:[%s5662_s28 + $0x708] sm:$0xff] }
 0x19f   : > { %3879 = vmatpush1.bf16.msra.mxu0 %v4654_v20  ;;  %v841_v20 = vld [vmem:[%s5662_s28 + $0x7a8] sm:$0xff] }
 0x1a0   : > { %3920 = vmatpush1.bf16.msra.mxu1 %v4782_v21  ;;  %3880 = vmatprep.subr.bf16.mxu0 %v4647_v22  ;;  %v4734_v21 = vcombine.low %v717_v7, %v721_v8  ;;  %v4862_v22 = vcombine.low %v845_v9, %v849_v10  ;;  %v4855_v26 = vcombine.high %v837_v19, %v841_v20  ;;  %v685_v50 = vld [vmem:[%s5662_s28 + $0x2c8] sm:$0xff] }
 0x1a1   : > { %3921 = vmatprep.subr.bf16.mxu1 %v4775_v25  ;;  %v4727_v25 = vcombine.high %v709_v17, %v713_v18  ;;  %v689_v5 = vld [vmem:[%s5662_s28 + $0x2e8] sm:$0xff] }
 0x1a2   : > { %v813_v51 = vld [vmem:[%s5662_s28 + $0x6c8] sm:$0xff] }
 0x1a3   : > { %3881 = vmatpush1.bf16.msra.mxu0 %v4646_v34  ;;  %v833_v34 = vld [vmem:[%s5662_s28 + $0x768] sm:$0xff] }
 0x1a4   : > { %3922 = vmatpush1.bf16.msra.mxu1 %v4774_v37  ;;  %3882 = vmatprep.subr.bf16.mxu0 %v4639_v38  ;;  %v4726_v37 = vcombine.low %v709_v17, %v713_v18  ;;  %v4854_v38 = vcombine.low %v837_v19, %v841_v20  ;;  %v4847_v40 = vcombine.high %v829_v33, %v833_v34  ;;  %v677_v58 = vld [vmem:[%s5662_s28 + $0x288] sm:$0xff] }
 0x1a5   : > { %3923 = vmatprep.subr.bf16.mxu1 %v4767_v39  ;;  %v4719_v39 = vcombine.high %v701_v23, %v705_v24  ;;  %v681_v59 = vld [vmem:[%s5662_s28 + $0x2a8] sm:$0xff] }
 0x1a6   : > { %v805_v62 = vld [vmem:[%s5662_s28 + $0x688] sm:$0xff] }
 0x1a7   : > { %3883 = vmatpush1.bf16.msra.mxu0 %v4638_v44  ;;  %v825_v44 = vld [vmem:[%s5662_s28 + $0x728] sm:$0xff] }
 0x1a8   : > { %3924 = vmatpush1.bf16.msra.mxu1 %v4766_v45  ;;  %3884 = vmatprep.subr.bf16.mxu0 %v4631_v46  ;;  %v4718_v45 = vcombine.low %v701_v23, %v705_v24  ;;  %v4846_v46 = vcombine.low %v829_v33, %v833_v34  ;;  %v4839_v49 = vcombine.high %v821_v42, %v825_v44  ;;  %v669_v8 = vld [vmem:[%s5662_s28 + $0x248] sm:$0xff] }
 0x1a9   : > { %3925 = vmatprep.subr.bf16.mxu1 %v4759_v48  ;;  %v4711_v48 = vcombine.high %v693_v41, %v697_v30  ;;  %v673_v9 = vld [vmem:[%s5662_s28 + $0x268] sm:$0xff] }
 0x1aa   : > { %v797_v10 = vld [vmem:[%s5662_s28 + $0x648] sm:$0xff] }
 0x1ab   : > { %3885 = vmatpush1.bf16.msra.mxu0 %v4630_v52  ;;  %v817_v52 = vld [vmem:[%s5662_s28 + $0x6e8] sm:$0xff] }
 0x1ac   : > { %3926 = vmatpush1.bf16.msra.mxu1 %v4758_v4  ;;  %3886 = vmatprep.subr.bf16.mxu0 %v4623_v53  ;;  %v4710_v4 = vcombine.low %v693_v41, %v697_v30  ;;  %v4838_v53 = vcombine.low %v821_v42, %v825_v44  ;;  %v4831_v56 = vcombine.high %v813_v51, %v817_v52  ;;  %v661_v18 = vld [vmem:[%s5662_s28 + $0x208] sm:$0xff] }
 0x1ad   : > { %3927 = vmatprep.subr.bf16.mxu1 %v4751_v54  ;;  %v4703_v54 = vcombine.high %v685_v50, %v689_v5  ;;  %v665_v19 = vld [vmem:[%s5662_s28 + $0x228] sm:$0xff] }
 0x1ae   : > { %v789_v20 = vld [vmem:[%s5662_s28 + $0x608] sm:$0xff] }
 0x1af   : > { %3887 = vmatpush1.bf16.msra.mxu0 %v4622_v1  ;;  %v809_v1 = vld [vmem:[%s5662_s28 + $0x6a8] sm:$0xff] }
 0x1b0   : > { %3928 = vmatpush1.bf16.msra.mxu1 %v4750_v2  ;;  %3888 = vmatprep.subr.bf16.mxu0 %v4615_v3  ;;  %v4702_v2 = vcombine.low %v685_v50, %v689_v5  ;;  %v4830_v3 = vcombine.low %v813_v51, %v817_v52  ;;  %v4823_v7 = vcombine.high %v805_v62, %v809_v1  ;;  %v909_v24 = vld [vmem:[%s5662_s28 + $0x9c8] sm:$0xff] }
 0x1b1   : > { %3929 = vmatprep.subr.bf16.mxu1 %v4743_v6  ;;  %v4695_v6 = vcombine.high %v677_v58, %v681_v59  ;;  %v913_v33 = vld [vmem:[%s5662_s28 + $0x9e8] sm:$0xff] }
 0x1b2   : > { %v1037_v34 = vld [vmem:[%s5662_s28 + $0xdc8] sm:$0xff]  ;;  %v4926_v44 = vcombine.low %v909_v24, %v913_v33 }
 0x1b3   : > { %3889 = vmatpush1.bf16.msra.mxu0 %v4614_v12  ;;  %v801_v12 = vld [vmem:[%s5662_s28 + $0x668] sm:$0xff] }
 0x1b4   : > { %3930 = vmatpush1.bf16.msra.mxu1 %v4742_v13  ;;  %3890 = vmatprep.subr.bf16.mxu0 %v4735_v15  ;;  %v4694_v13 = vcombine.low %v677_v58, %v681_v59  ;;  %v4822_v15 = vcombine.low %v805_v62, %v809_v1  ;;  %v4815_v17 = vcombine.high %v797_v10, %v801_v12  ;;  %v901_v30 = vld [vmem:[%s5662_s28 + $0x988] sm:$0xff] }
 0x1b5   : > { %3931 = vmatprep.subr.bf16.mxu1 %v4863_v16  ;;  %v4687_v16 = vcombine.high %v669_v8, %v673_v9  ;;  %v905_v42 = vld [vmem:[%s5662_s28 + $0x9a8] sm:$0xff] }
 0x1b6   : > { %v893_v50 = vld [vmem:[%s5662_s28 + $0x948] sm:$0xff] }
 0x1b7   : > { %3891 = vmatpush2.bf16.msra.mxu0 %v4734_v21  ;;  %v793_v21 = vld [vmem:[%s5662_s28 + $0x628] sm:$0xff] }
 0x1b8   : > { %3932 = vmatpush2.bf16.msra.mxu1 %v4862_v22  ;;  %3892 = vmatprep.subr.bf16.mxu0 %v4727_v25  ;;  %v4686_v22 = vcombine.low %v669_v8, %v673_v9  ;;  %v4814_v25 = vcombine.low %v797_v10, %v801_v12  ;;  %v4807_v23 = vcombine.high %v789_v20, %v793_v21  ;;  %v897_v5 = vld [vmem:[%s5662_s28 + $0x968] sm:$0xff] }
 0x1b9   : > { %3933 = vmatprep.subr.bf16.mxu1 %v4855_v26  ;;  %v4679_v26 = vcombine.high %v661_v18, %v665_v19  ;;  %v1021_v52 = vld [vmem:[%s5662_s28 + $0xd48] sm:$0xff] }
 0x1ba   : > { %v885_v59 = vld [vmem:[%s5662_s28 + $0x908] sm:$0xff] }
 0x1bb   : > { %3893 = vmatpush2.bf16.msra.mxu0 %v4726_v37  ;;  %v1041_v37 = vld [vmem:[%s5662_s28 + $0xde8] sm:$0xff] }
 0x1bc   : > { %3934 = vmatpush2.bf16.msra.mxu1 %v4854_v38  ;;  %3894 = vmatprep.subr.bf16.mxu0 %v4719_v39  ;;  %v4678_v38 = vcombine.low %v661_v18, %v665_v19  ;;  %v4806_v39 = vcombine.low %v789_v20, %v793_v21  ;;  %v5055_v41 = vcombine.high %v1037_v34, %v1041_v37  ;;  %v889_v62 = vld [vmem:[%s5662_s28 + $0x928] sm:$0xff] }
 0x1bd   : > { %3935 = vmatprep.subr.bf16.mxu1 %v4847_v40  ;;  %v4927_v40 = vcombine.high %v909_v24, %v913_v33  ;;  %v1013_v1 = vld [vmem:[%s5662_s28 + $0xd08] sm:$0xff] }
 0x1be   : > { %v877_v9 = vld [vmem:[%s5662_s28 + $0x8c8] sm:$0xff] }
 0x1bf   : > { %3895 = vmatpush2.bf16.msra.mxu0 %v4718_v45  ;;  %v1029_v45 = vld [vmem:[%s5662_s28 + $0xd88] sm:$0xff] }
 0x1c0   : > { %3936 = vmatpush2.bf16.msra.mxu1 %v4846_v46  ;;  %3896 = vmatprep.subr.bf16.mxu0 %v4711_v48  ;;  %v1033_v46 = vld [vmem:[%s5662_s28 + $0xda8] sm:$0xff]  ;;  %v5054_v48 = vcombine.low %v1037_v34, %v1041_v37 }
 0x1c1   : > { %3937 = vmatprep.subr.bf16.mxu1 %v4839_v49  ;;  %v4919_v49 = vcombine.high %v901_v30, %v905_v42  ;;  %v5047_v51 = vcombine.high %v1029_v45, %v1033_v46  ;;  %v881_v10 = vld [vmem:[%s5662_s28 + $0x8e8] sm:$0xff] }
 0x1c2   : > { %v1005_v12 = vld [vmem:[%s5662_s28 + $0xcc8] sm:$0xff] }
 0x1c3   : > { %3897 = vmatpush2.bf16.msra.mxu0 %v4710_v4  ;;  %v1025_v4 = vld [vmem:[%s5662_s28 + $0xd68] sm:$0xff] }
 0x1c4   : > { %3938 = vmatpush2.bf16.msra.mxu1 %v4838_v53  ;;  %3898 = vmatprep.subr.bf16.mxu0 %v4703_v54  ;;  %v4918_v53 = vcombine.low %v901_v30, %v905_v42  ;;  %v5046_v54 = vcombine.low %v1029_v45, %v1033_v46  ;;  %v5039_v58 = vcombine.high %v1021_v52, %v1025_v4  ;;  %v869_v19 = vld [vmem:[%s5662_s28 + $0x888] sm:$0xff] }
 0x1c5   : > { %3939 = vmatprep.subr.bf16.mxu1 %v4831_v56  ;;  %v4911_v56 = vcombine.high %v893_v50, %v897_v5  ;;  %v873_v20 = vld [vmem:[%s5662_s28 + $0x8a8] sm:$0xff] }
 0x1c6   : > { %v997_v21 = vld [vmem:[%s5662_s28 + $0xc88] sm:$0xff] }
 0x1c7   : > { %3899 = vmatpush2.bf16.msra.mxu0 %v4702_v2  ;;  %v1017_v2 = vld [vmem:[%s5662_s28 + $0xd28] sm:$0xff] }
 0x1c8   : > { %3940 = vmatpush2.bf16.msra.mxu1 %v4830_v3  ;;  %3900 = vmatprep.subr.bf16.mxu0 %v4695_v6  ;;  %v4910_v3 = vcombine.low %v893_v50, %v897_v5  ;;  %v5038_v6 = vcombine.low %v1021_v52, %v1025_v4  ;;  %v5031_v8 = vcombine.high %v1013_v1, %v1017_v2  ;;  %v861_v33 = vld [vmem:[%s5662_s28 + $0x848] sm:$0xff] }
 0x1c9   : > { %3941 = vmatprep.subr.bf16.mxu1 %v4823_v7  ;;  %v4903_v7 = vcombine.high %v885_v59, %v889_v62  ;;  %v865_v34 = vld [vmem:[%s5662_s28 + $0x868] sm:$0xff] }
 0x1ca   : > { %v989_v37 = vld [vmem:[%s5662_s28 + $0xc48] sm:$0xff] }
 0x1cb   : > { %3901 = vmatpush2.bf16.msra.mxu0 %v4694_v13  ;;  %v1009_v13 = vld [vmem:[%s5662_s28 + $0xce8] sm:$0xff] }
 0x1cc   : > { %3942 = vmatpush2.bf16.msra.mxu1 %v4822_v15  ;;  %3902 = vmatprep.subr.bf16.mxu0 %v4687_v16  ;;  %v4902_v15 = vcombine.low %v885_v59, %v889_v62  ;;  %v5030_v16 = vcombine.low %v1013_v1, %v1017_v2  ;;  %v5023_v18 = vcombine.high %v1005_v12, %v1009_v13  ;;  %v853_v42 = vld [vmem:[%s5662_s28 + $0x808] sm:$0xff] }
 0x1cd   : > { %3943 = vmatprep.subr.bf16.mxu1 %v4815_v17  ;;  %v4895_v17 = vcombine.high %v877_v9, %v881_v10  ;;  %v981_v45 = vld [vmem:[%s5662_s28 + $0xc08] sm:$0xff] }
 0x1ce   : > { %v985_v46 = vld [vmem:[%s5662_s28 + $0xc28] sm:$0xff] }
 0x1cf   : > { %3903 = vmatpush2.bf16.msra.mxu0 %v4686_v22  ;;  %v1001_v22 = vld [vmem:[%s5662_s28 + $0xca8] sm:$0xff]  ;;  %v4999_v5 = vcombine.high %v981_v45, %v985_v46 }
 0x1d0   : > { %3944 = vmatpush2.bf16.msra.mxu1 %v4814_v25  ;;  %3904 = vmatprep.subr.bf16.mxu0 %v4679_v26  ;;  %v4894_v25 = vcombine.low %v877_v9, %v881_v10  ;;  %v5022_v26 = vcombine.low %v1005_v12, %v1009_v13  ;;  %v5015_v24 = vcombine.high %v997_v21, %v1001_v22  ;;  %v977_v52 = vld [vmem:[%s5662_s28 + $0xbe8] sm:$0xff] }
 0x1d1   : > { %3945 = vmatprep.subr.bf16.mxu1 %v4807_v23  ;;  %v4887_v23 = vcombine.high %v869_v19, %v873_v20  ;;  %v1101_v4 = vld [vmem:[%s5662_s28 + $0xfc8] sm:$0xff] }
 0x1d2   : > { %v965_v62 = vld [vmem:[%s5662_s28 + $0xb88] sm:$0xff] }
 0x1d3   : > { %3905 = vmatpush2.bf16.msra.mxu0 %v4678_v38  ;;  %v993_v38 = vld [vmem:[%s5662_s28 + $0xc68] sm:$0xff] }
 0x1d4   : > { %3946 = vmatpush2.bf16.msra.mxu1 %v4806_v39  ;;  %3956 = vmatprep.subr.bf16.mxu0 %v4927_v40  ;;  %v4886_v39 = vcombine.low %v869_v19, %v873_v20  ;;  %v5014_v40 = vcombine.low %v997_v21, %v1001_v22  ;;  %v5007_v30 = vcombine.high %v989_v37, %v993_v38  ;;  %v969_v1 = vld [vmem:[%s5662_s28 + $0xba8] sm:$0xff] }
 0x1d5   : > { %3997 = vmatprep.subr.bf16.mxu1 %v5055_v41  ;;  %v4879_v41 = vcombine.high %v861_v33, %v865_v34  ;;  %v1093_v2 = vld [vmem:[%s5662_s28 + $0xf88] sm:$0xff] }
 0x1d6   : > { %3907 = vmatmul.mubr.bf16.vlgmr.msra.gmra.mxu0 %v5798_v0  ;;  %v957_v10 = vld [vmem:[%s5662_s28 + $0xb48] sm:$0xff] }
 0x1d7   : > { %3948 = vmatmul.mubr.bf16.vlgmr.msra.gmra.mxu1 %v5786_v57  ;;  %3957 = vmatpush1.bf16.msra.mxu0 %v4926_v44  ;;  %v857_v44 = vld [vmem:[%s5662_s28 + $0x828] sm:$0xff] }
 0x1d8   : > { %3988 = vmatprep.mubr.bf16.mxu0 %v5816_v35  ;;  %3998 = vmatpush1.bf16.msra.mxu1 %v5054_v48  ;;  %v4878_v48 = vcombine.low %v861_v33, %v865_v34  ;;  %v4871_v50 = vcombine.high %v853_v42, %v857_v44  ;;  %v961_v12 = vld [vmem:[%s5662_s28 + $0xb68] sm:$0xff] }
 0x1d9   : > { %4029 = vmatprep.mubr.bf16.mxu1 %v5818_v36  ;;  %3958 = vmatprep.subr.bf16.mxu0 %v4919_v49  ;;  %v5006_v49 = vcombine.low %v989_v37, %v993_v38  ;;  %v1085_v13 = vld [vmem:[%s5662_s28 + $0xf48] sm:$0xff] }
 0x1da   : > { %3999 = vmatprep.subr.bf16.mxu1 %v5047_v51  ;;  %v973_v51 = vld [vmem:[%s5662_s28 + $0xbc8] sm:$0xff] }
 0x1db   : > { %3959 = vmatpush1.bf16.msra.mxu0 %v4918_v53  ;;  %v1105_v53 = vld [vmem:[%s5662_s28 + $0xfe8] sm:$0xff] }
 0x1dc   : > { %4000 = vmatpush1.bf16.msra.mxu1 %v5046_v54  ;;  %3960 = vmatprep.subr.bf16.mxu0 %v4911_v56  ;;  %v4870_v54 = vcombine.low %v853_v42, %v857_v44  ;;  %v4998_v56 = vcombine.low %v981_v45, %v985_v46  ;;  %v5119_v59 = vcombine.high %v1101_v4, %v1105_v53  ;;  %v949_v20 = vld [vmem:[%s5662_s28 + $0xb08] sm:$0xff] }
 0x1dd   : > { %4001 = vmatprep.subr.bf16.mxu1 %v5039_v58  ;;  %v4991_v58 = vcombine.high %v973_v51, %v977_v52  ;;  %v953_v21 = vld [vmem:[%s5662_s28 + $0xb28] sm:$0xff] }
 0x1de   : > { %v1077_v22 = vld [vmem:[%s5662_s28 + $0xf08] sm:$0xff] }
 0x1df   : > { %3961 = vmatpush1.bf16.msra.mxu0 %v4910_v3  ;;  %v1097_v3 = vld [vmem:[%s5662_s28 + $0xfa8] sm:$0xff] }
 0x1e0   : > { %4002 = vmatpush1.bf16.msra.mxu1 %v5038_v6  ;;  %3962 = vmatprep.subr.bf16.mxu0 %v4903_v7  ;;  %v4990_v6 = vcombine.low %v973_v51, %v977_v52  ;;  %v5118_v7 = vcombine.low %v1101_v4, %v1105_v53  ;;  %v5111_v9 = vcombine.high %v1093_v2, %v1097_v3  ;;  %v941_v34 = vld [vmem:[%s5662_s28 + $0xac8] sm:$0xff] }
 0x1e1   : > { %4003 = vmatprep.subr.bf16.mxu1 %v5031_v8  ;;  %v4983_v8 = vcombine.high %v965_v62, %v969_v1  ;;  %v945_v37 = vld [vmem:[%s5662_s28 + $0xae8] sm:$0xff] }
 0x1e2   : > { %v1069_v38 = vld [vmem:[%s5662_s28 + $0xec8] sm:$0xff] }
 0x1e3   : > { %3963 = vmatpush1.bf16.msra.mxu0 %v4902_v15  ;;  %v1089_v15 = vld [vmem:[%s5662_s28 + $0xf68] sm:$0xff] }
 0x1e4   : > { %4004 = vmatpush1.bf16.msra.mxu1 %v5030_v16  ;;  %3964 = vmatprep.subr.bf16.mxu0 %v4895_v17  ;;  %v4982_v16 = vcombine.low %v965_v62, %v969_v1  ;;  %v5110_v17 = vcombine.low %v1093_v2, %v1097_v3  ;;  %v5103_v19 = vcombine.high %v1085_v13, %v1089_v15  ;;  %v933_v44 = vld [vmem:[%s5662_s28 + $0xa88] sm:$0xff] }
 0x1e5   : > { %4005 = vmatprep.subr.bf16.mxu1 %v5023_v18  ;;  %v4975_v18 = vcombine.high %v957_v10, %v961_v12  ;;  %v937_v45 = vld [vmem:[%s5662_s28 + $0xaa8] sm:$0xff] }
 0x1e6   : > { %v1061_v46 = vld [vmem:[%s5662_s28 + $0xe88] sm:$0xff] }
 0x1e7   : > { %3965 = vmatpush1.bf16.msra.mxu0 %v4894_v25  ;;  %v1081_v25 = vld [vmem:[%s5662_s28 + $0xf28] sm:$0xff] }
 0x1e8   : > { %4006 = vmatpush1.bf16.msra.mxu1 %v5022_v26  ;;  %3966 = vmatprep.subr.bf16.mxu0 %v4887_v23  ;;  %v4974_v26 = vcombine.low %v957_v10, %v961_v12  ;;  %v5102_v23 = vcombine.low %v1085_v13, %v1089_v15  ;;  %v5095_v33 = vcombine.high %v1077_v22, %v1081_v25  ;;  %v925_v52 = vld [vmem:[%s5662_s28 + $0xa48] sm:$0xff]  ;;  %v654_v12 = vld [vmem:[%s5662_s28 + $0x1d0] sm:$0xff] }
 0x1e9   : > { %4007 = vmatprep.subr.bf16.mxu1 %v5015_v24  ;;  %v4967_v24 = vcombine.high %v949_v20, %v953_v21  ;;  %v929_v4 = vld [vmem:[%s5662_s28 + $0xa68] sm:$0xff]  ;;  %v658_v13 = vld [vmem:[%s5662_s28 + $0x1f0] sm:$0xff] }
 0x1ea   : > { %v1053_v53 = vld [vmem:[%s5662_s28 + $0xe48] sm:$0xff]  ;;  %v782_v15 = vld [vmem:[%s5662_s28 + $0x5d0] sm:$0xff] }
 0x1eb   : > { %3967 = vmatpush1.bf16.msra.mxu0 %v4886_v39  ;;  %v1073_v39 = vld [vmem:[%s5662_s28 + $0xee8] sm:$0xff] }
 0x1ec   : > { %4008 = vmatpush1.bf16.msra.mxu1 %v5014_v40  ;;  %3968 = vmatprep.subr.bf16.mxu0 %v4879_v41  ;;  %v4966_v40 = vcombine.low %v949_v20, %v953_v21  ;;  %v5094_v41 = vcombine.low %v1077_v22, %v1081_v25  ;;  %v5087_v42 = vcombine.high %v1069_v38, %v1073_v39  ;;  %v917_v1 = vld [vmem:[%s5662_s28 + $0xa08] sm:$0xff]  ;;  %v646_v22 = vld [vmem:[%s5662_s28 + $0x190] sm:$0xff] }
 0x1ed   : > { %4009 = vmatprep.subr.bf16.mxu1 %v5007_v30  ;;  %v4959_v30 = vcombine.high %v941_v34, %v945_v37  ;;  %v921_v2 = vld [vmem:[%s5662_s28 + $0xa28] sm:$0xff]  ;;  %v650_v25 = vld [vmem:[%s5662_s28 + $0x1b0] sm:$0xff] }
 0x1ee   : > { %v1045_v3 = vld [vmem:[%s5662_s28 + $0xe08] sm:$0xff] }
 0x1ef   : > { %3969 = vmatpush1.bf16.msra.mxu0 %v4878_v48  ;;  %v1065_v48 = vld [vmem:[%s5662_s28 + $0xea8] sm:$0xff] }
 0x1f0   : > { %4010 = vmatpush1.bf16.msra.mxu1 %v5006_v49  ;;  %3970 = vmatprep.subr.bf16.mxu0 %v4871_v50  ;;  %v4958_v49 = vcombine.low %v941_v34, %v945_v37  ;;  %v5086_v50 = vcombine.low %v1069_v38, %v1073_v39  ;;  %v5079_v51 = vcombine.high %v1061_v46, %v1065_v48  ;;  %v6030_v20 = vld [vmem:[%s6027_s14] sm:$0xff]  ;;  %v638_v39 = vld [vmem:[%s5662_s28 + $0x150] sm:$0xff] }
 0x1f1   : > { %4011 = vmatprep.subr.bf16.mxu1 %v4999_v5  ;;  %v4951_v5 = vcombine.high %v933_v44, %v937_v45  ;;  %v1117_v37 = vrot.slane %v6030_v20, %v333_v31  ;;  %v4665_v38 = vcombine.high %v646_v22, %v650_v25 }
 0x1f3   : > { %3971 = vmatpush1.bf16.msra.mxu0 %v4870_v54  ;;  %v1057_v54 = vld [vmem:[%s5662_s28 + $0xe68] sm:$0xff] }
 0x1f4   : > { %4012 = vmatpush1.bf16.msra.mxu1 %v4998_v56  ;;  %3972 = vmatprep.subr.bf16.mxu0 %v4991_v58  ;;  %v4950_v56 = vcombine.low %v933_v44, %v937_v45  ;;  %v5078_v58 = vcombine.low %v1061_v46, %v1065_v48  ;;  %v5071_v62 = vcombine.high %v1053_v53, %v1057_v54  ;;  %v770_v44 = vld [vmem:[%s5662_s28 + $0x570] sm:$0xff] }
 0x1f5   : > { %4013 = vmatprep.subr.bf16.mxu1 %v5119_v59  ;;  %v4943_v59 = vcombine.high %v925_v52, %v929_v4  ;;  %v4664_v46 = vcombine.low %v646_v22, %v650_v25  ;;  %v742_v22 = vld [vmem:[%s5662_s28 + $0x490] sm:$0xff] }
 0x1f6   : > { %v746_v25 = vld [vmem:[%s5662_s28 + $0x4b0] sm:$0xff] }
 0x1f7   : > { %3973 = vmatpush2.bf16.msra.mxu0 %v4990_v6  ;;  %v1049_v6 = vld [vmem:[%s5662_s28 + $0xe28] sm:$0xff] }
 0x1f8   : > { %4014 = vmatpush2.bf16.msra.mxu1 %v5118_v7  ;;  %3974 = vmatprep.subr.bf16.mxu0 %v4983_v8  ;;  %v4942_v7 = vcombine.low %v925_v52, %v929_v4  ;;  %v5070_v8 = vcombine.low %v1053_v53, %v1057_v54  ;;  %v5063_v10 = vcombine.high %v1045_v3, %v1049_v6  ;;  %v630_v4 = vld [vmem:[%s5662_s28 + $0x110] sm:$0xff] }
 0x1f9   : > { %4015 = vmatprep.subr.bf16.mxu1 %v5111_v9  ;;  %v4935_v9 = vcombine.high %v917_v1, %v921_v2  ;;  %v634_v53 = vld [vmem:[%s5662_s28 + $0x130] sm:$0xff] }
 0x1fb   : > { %3975 = vmatpush2.bf16.msra.mxu0 %v4982_v16  ;;  %v786_v16 = vld [vmem:[%s5662_s28 + $0x5f0] sm:$0xff] }
 0x1fc   : > { %4016 = vmatpush2.bf16.msra.mxu1 %v5110_v17  ;;  %3976 = vmatprep.subr.bf16.mxu0 %v4975_v18  ;;  %v4934_v17 = vcombine.low %v917_v1, %v921_v2  ;;  %v5062_v18 = vcombine.low %v1045_v3, %v1049_v6  ;;  %v4801_v21 = vcombine.high %v782_v15, %v786_v16 }
 0x1fd   : > { %4017 = vmatprep.subr.bf16.mxu1 %v5103_v19  ;;  %v4673_v19 = vcombine.high %v654_v12, %v658_v13  ;;  %v4800_v34 = vcombine.low %v782_v15, %v786_v16  ;;  %v4648_v15 = vcombine.low %v630_v4, %v634_v53 }
 0x1ff   : > { %3977 = vmatpush2.bf16.msra.mxu0 %v4974_v26  ;;  %v4672_v26 = vcombine.low %v654_v12, %v658_v13  ;;  %v750_v12 = vld [vmem:[%s5662_s28 + $0x4d0] sm:$0xff] }
 0x200   : > { %4018 = vmatpush2.bf16.msra.mxu1 %v5102_v23  ;;  %3978 = vmatprep.subr.bf16.mxu0 %v4967_v24  ;;  %v1113_v23 = vrot.slane %v6030_v20, %v329_v28  ;;  %v774_v24 = vld [vmem:[%s5662_s28 + $0x590] sm:$0xff] }
 0x201   : > { %4019 = vmatprep.subr.bf16.mxu1 %v5095_v33  ;;  %v778_v33 = vld [vmem:[%s5662_s28 + $0x5b0] sm:$0xff] }
 0x202   : > { %v766_v28 = vld [vmem:[%s5662_s28 + $0x550] sm:$0xff] }
 0x203   : > { %3979 = vmatpush2.bf16.msra.mxu0 %v4966_v40  ;;  %v642_v40 = vld [vmem:[%s5662_s28 + $0x170] sm:$0xff]  ;;  %v4785_v52 = vcombine.high %v766_v28, %v770_v44  ;;  %v4784_v6 = vcombine.low %v766_v28, %v770_v44 }
 0x204   : > { %4020 = vmatpush2.bf16.msra.mxu1 %v5094_v41  ;;  %3980 = vmatprep.subr.bf16.mxu0 %v4959_v30  ;;  %v4656_v1 = vcombine.low %v638_v39, %v642_v40  ;;  %v754_v13 = vld [vmem:[%s5662_s28 + $0x4f0] sm:$0xff] }
 0x205   : > { %4021 = vmatprep.subr.bf16.mxu1 %v5087_v42  ;;  %v4793_v42 = vcombine.high %v774_v24, %v778_v33  ;;  %v598_v28 = vld [vmem:[%s5662_s28 + $0x10] sm:$0xff] }
 0x206   : > { %v602_v44 = vld [vmem:[%s5662_s28 + $0x30] sm:$0xff] }
 0x207   : > { %3981 = vmatpush2.bf16.msra.mxu0 %v4958_v49  ;;  %v4792_v49 = vcombine.low %v774_v24, %v778_v33  ;;  %v4761_v33 = vcombine.high %v742_v22, %v746_v25 }
 0x208   : > { %4022 = vmatpush2.bf16.msra.mxu1 %v5086_v50  ;;  %3982 = vmatprep.subr.bf16.mxu0 %v4951_v5  ;;  %v4657_v50 = vcombine.high %v638_v39, %v642_v40  ;;  %v738_v39 = vld [vmem:[%s5662_s28 + $0x470] sm:$0xff] }
 0x209   : > { %4023 = vmatprep.subr.bf16.mxu1 %v5079_v51 }
 0x20b   : > { %3983 = vmatpush2.bf16.msra.mxu0 %v4950_v56 }
 0x20c   : > { %4024 = vmatpush2.bf16.msra.mxu1 %v5078_v58  ;;  %3984 = vmatprep.subr.bf16.mxu0 %v4943_v59  ;;  %v758_v58 = vld [vmem:[%s5662_s28 + $0x510] sm:$0xff] }
 0x20d   : > { %4025 = vmatprep.subr.bf16.mxu1 %v5071_v62  ;;  %v762_v59 = vld [vmem:[%s5662_s28 + $0x530] sm:$0xff] }
 0x20e   : > { %v4776_v16 = vcombine.low %v758_v58, %v762_v59 }
 0x20f   : > { %3985 = vmatpush2.bf16.msra.mxu0 %v4942_v7  ;;  %v4649_v7 = vcombine.high %v630_v4, %v634_v53  ;;  %v846_v4 = vld [vmem:[%s5662_s28 + $0x7d0] sm:$0xff] }
 0x210   : > { %4026 = vmatpush2.bf16.msra.mxu1 %v5070_v8  ;;  %3986 = vmatprep.subr.bf16.mxu0 %v4935_v9  ;;  %v4777_v8 = vcombine.high %v758_v58, %v762_v59  ;;  %v622_v9 = vld [vmem:[%s5662_s28 + $0xd0] sm:$0xff] }
 0x211   : > { %4027 = vmatprep.subr.bf16.mxu1 %v5063_v10  ;;  %v626_v10 = vld [vmem:[%s5662_s28 + $0xf0] sm:$0xff] }
 0x212   : > { %v850_v53 = vld [vmem:[%s5662_s28 + $0x7f0] sm:$0xff] }
 0x213   : > { %3987 = vmatpush2.bf16.msra.mxu0 %v4934_v17  ;;  %v4641_v17 = vcombine.high %v622_v9, %v626_v10  ;;  %v4865_v59 = vcombine.high %v846_v4, %v850_v53 }
 0x214   : > { %4028 = vmatpush2.bf16.msra.mxu1 %v5062_v18  ;;  %4038 = vmatprep.subr.bf16.mxu0 %v4673_v19  ;;  %v4769_v18 = vcombine.high %v750_v12, %v754_v13  ;;  %v614_v19 = vld [vmem:[%s5662_s28 + $0x90] sm:$0xff] }
 0x215   : > { %4079 = vmatprep.subr.bf16.mxu1 %v4801_v21  ;;  %v618_v21 = vld [vmem:[%s5662_s28 + $0xb0] sm:$0xff] }
 0x216   : > { %3989 = vmatmul.mubr.bf16.vlgmr.msra.gmra.mxu0 %v5890_v63  ;;  %v3744_v41 = vpop.f32.mrf.mxu0  ;;  %v4633_v24 = vcombine.high %v614_v19, %v618_v21  ;;  %v4632_v40 = vcombine.low %v614_v19, %v618_v21 }
 0x217   : > { %v3785_v30 = vpop.f32.mrf.mxu1  ;;  %4030 = vmatmul.mubr.bf16.vlgmr.msra.gmra.mxu1 %v5885_v55  ;;  %v3745_v45 = vadd.f32 %v3744_v41, %v1113_v23  ;;  %4039 = vmatpush1.bf16.msra.mxu0 %v4672_v26  ;;  %v4640_v26 = vcombine.low %v622_v9, %v626_v10  ;;  %v4768_v23 = vcombine.low %v750_v12, %v754_v13  ;;  %v702_v12 = vld [vmem:[%s5662_s28 + $0x350] sm:$0xff] }
 0x218   : > { %4070 = vmatprep.mubr.bf16.mxu0 %v5788_v60  ;;  %4080 = vmatpush1.bf16.msra.mxu1 %v4800_v34  ;;  %v3746_v31 = vpop.f32.mrf.mxu0  ;;  %v606_v34 = vld [vmem:[%s5662_s28 + $0x50] sm:$0xff]  ;;  %v4760_v41 = vcombine.low %v742_v22, %v746_v25 }
 0x219   : > { %v3787_v48 = vpop.f32.mrf.mxu1  ;;  %v6049_v5 = vadd.f32 %v3785_v30, %v3745_v45  ;;  %4111 = vmatprep.mubr.bf16.mxu1 %v5790_v61  ;;  %v3747_v51 = vadd.f32 %v3746_v31, %v1117_v37  ;;  %4040 = vmatprep.subr.bf16.mxu0 %v4665_v38  ;;  %v610_v37 = vld [vmem:[%s5662_s28 + $0x70] sm:$0xff] }
 0x21a   : > { %4081 = vmatprep.subr.bf16.mxu1 %v4793_v42  ;;  %v3748_v54 = vpop.f32.mrf.mxu0  ;;  %v734_v38 = vld [vmem:[%s5662_s28 + $0x450] sm:$0xff]  ;;  %v4625_v30 = vcombine.high %v606_v34, %v610_v37  ;;  %v4624_v31 = vcombine.low %v606_v34, %v610_v37 }
 0x21b   : > { %v3789_v56 = vpop.f32.mrf.mxu1  ;;  %v6056_v62 = vadd.f32 %v3787_v48, %v3747_v51  ;;  %4041 = vmatpush1.bf16.msra.mxu0 %v4664_v46  ;;  %v4753_v42 = vcombine.high %v734_v38, %v738_v39  ;;  %v726_v45 = vld [vmem:[%s5662_s28 + $0x410] sm:$0xff]  ;;  %v4752_v48 = vcombine.low %v734_v38, %v738_v39  ;;  %v4616_v54 = vcombine.low %v598_v28, %v602_v44 }
 0x21c   : > { %4082 = vmatpush1.bf16.msra.mxu1 %v4792_v49  ;;  %v3749_v2 = vpop.f32.mrf.mxu0  ;;  %4042 = vmatprep.subr.bf16.mxu0 %v4657_v50  ;;  %v730_v46 = vld [vmem:[%s5662_s28 + $0x430] sm:$0xff]  ;;  %v4617_v49 = vcombine.high %v598_v28, %v602_v44 }
 0x21d   : > { %v3790_v3 = vpop.f32.mrf.mxu1  ;;  %4083 = vmatprep.subr.bf16.mxu1 %v4785_v52  ;;  %v4745_v50 = vcombine.high %v726_v45, %v730_v46  ;;  %v718_v51 = vld [vmem:[%s5662_s28 + $0x3d0] sm:$0xff]  ;;  %v4744_v56 = vcombine.low %v726_v45, %v730_v46 }
 0x21e   : > { %v722_v52 = vld [vmem:[%s5662_s28 + $0x3f0] sm:$0xff] }
 0x21f   : > { %4043 = vmatpush1.bf16.msra.mxu0 %v4656_v1  ;;  %v4737_v58 = vcombine.high %v718_v51, %v722_v52  ;;  %v710_v1 = vld [vmem:[%s5662_s28 + $0x390] sm:$0xff] }
 0x220   : > { %4084 = vmatpush1.bf16.msra.mxu1 %v4784_v6  ;;  %4044 = vmatprep.subr.bf16.mxu0 %v4649_v7  ;;  %v714_v2 = vld [vmem:[%s5662_s28 + $0x3b0] sm:$0xff]  ;;  %v4736_v7 = vcombine.low %v718_v51, %v722_v52 }
 0x221   : > { %4085 = vmatprep.subr.bf16.mxu1 %v4777_v8  ;;  %v838_v3 = vld [vmem:[%s5662_s28 + $0x790] sm:$0xff]  ;;  %v4864_v8 = vcombine.low %v846_v4, %v850_v53  ;;  %v4729_v9 = vcombine.high %v710_v1, %v714_v2 }
 0x222   : > { %v842_v6 = vld [vmem:[%s5662_s28 + $0x7b0] sm:$0xff] }
 0x223   : > { %4045 = vmatpush1.bf16.msra.mxu0 %v4648_v15  ;;  %v4857_v10 = vcombine.high %v838_v3, %v842_v6  ;;  %v706_v13 = vld [vmem:[%s5662_s28 + $0x370] sm:$0xff] }
 0x224   : > { %4086 = vmatpush1.bf16.msra.mxu1 %v4776_v16  ;;  %4046 = vmatprep.subr.bf16.mxu0 %v4641_v17  ;;  %v830_v15 = vld [vmem:[%s5662_s28 + $0x750] sm:$0xff]  ;;  %v4728_v17 = vcombine.low %v710_v1, %v714_v2  ;;  %v4721_v19 = vcombine.high %v702_v12, %v706_v13 }
 0x225   : > { %4087 = vmatprep.subr.bf16.mxu1 %v4769_v18  ;;  %v834_v16 = vld [vmem:[%s5662_s28 + $0x770] sm:$0xff]  ;;  %v4856_v18 = vcombine.low %v838_v3, %v842_v6 }
 0x226   : > { %v4849_v21 = vcombine.high %v830_v15, %v834_v16  ;;  %v694_v22 = vld [vmem:[%s5662_s28 + $0x310] sm:$0xff] }
 0x227   : > { %4047 = vmatpush1.bf16.msra.mxu0 %v4640_v26  ;;  %v698_v25 = vld [vmem:[%s5662_s28 + $0x330] sm:$0xff] }
 0x228   : > { %4088 = vmatpush1.bf16.msra.mxu1 %v4768_v23  ;;  %4048 = vmatprep.subr.bf16.mxu0 %v4633_v24  ;;  %v822_v26 = vld [vmem:[%s5662_s28 + $0x710] sm:$0xff]  ;;  %v4720_v24 = vcombine.low %v702_v12, %v706_v13  ;;  %v4713_v34 = vcombine.high %v694_v22, %v698_v25 }
 0x229   : > { %4089 = vmatprep.subr.bf16.mxu1 %v4761_v33  ;;  %v826_v23 = vld [vmem:[%s5662_s28 + $0x730] sm:$0xff]  ;;  %v4848_v33 = vcombine.low %v830_v15, %v834_v16 }
 0x22a   : > { %v4841_v37 = vcombine.high %v822_v26, %v826_v23  ;;  %v686_v38 = vld [vmem:[%s5662_s28 + $0x2d0] sm:$0xff] }
 0x22b   : > { %4049 = vmatpush1.bf16.msra.mxu0 %v4632_v40  ;;  %v690_v39 = vld [vmem:[%s5662_s28 + $0x2f0] sm:$0xff] }
 0x22c   : > { %4090 = vmatpush1.bf16.msra.mxu1 %v4760_v41  ;;  %4050 = vmatprep.subr.bf16.mxu0 %v4625_v30  ;;  %v814_v40 = vld [vmem:[%s5662_s28 + $0x6d0] sm:$0xff]  ;;  %v4712_v30 = vcombine.low %v694_v22, %v698_v25  ;;  %v4705_v28 = vcombine.high %v686_v38, %v690_v39 }
 0x22d   : > { %4091 = vmatprep.subr.bf16.mxu1 %v4753_v42  ;;  %v818_v41 = vld [vmem:[%s5662_s28 + $0x6f0] sm:$0xff]  ;;  %v4840_v42 = vcombine.low %v822_v26, %v826_v23 }
 0x22e   : > { %v4833_v44 = vcombine.high %v814_v40, %v818_v41  ;;  %v678_v45 = vld [vmem:[%s5662_s28 + $0x290] sm:$0xff] }
 0x22f   : > { %4051 = vmatpush1.bf16.msra.mxu0 %v4624_v31  ;;  %v682_v46 = vld [vmem:[%s5662_s28 + $0x2b0] sm:$0xff] }
 0x230   : > { %4092 = vmatpush1.bf16.msra.mxu1 %v4752_v48  ;;  %4052 = vmatprep.subr.bf16.mxu0 %v4617_v49  ;;  %v806_v31 = vld [vmem:[%s5662_s28 + $0x690] sm:$0xff]  ;;  %v4704_v49 = vcombine.low %v686_v38, %v690_v39  ;;  %v4697_v51 = vcombine.high %v678_v45, %v682_v46 }
 0x231   : > { %4093 = vmatprep.subr.bf16.mxu1 %v4745_v50  ;;  %v810_v48 = vld [vmem:[%s5662_s28 + $0x6b0] sm:$0xff]  ;;  %v4832_v50 = vcombine.low %v814_v40, %v818_v41 }
 0x232   : > { %v4825_v52 = vcombine.high %v806_v31, %v810_v48  ;;  %v670_v4 = vld [vmem:[%s5662_s28 + $0x250] sm:$0xff] }
 0x233   : > { %4053 = vmatpush1.bf16.msra.mxu0 %v4616_v54  ;;  %v674_v53 = vld [vmem:[%s5662_s28 + $0x270] sm:$0xff] }
 0x234   : > { %4094 = vmatpush1.bf16.msra.mxu1 %v4744_v56  ;;  %4054 = vmatprep.subr.bf16.mxu0 %v4737_v58  ;;  %v798_v54 = vld [vmem:[%s5662_s28 + $0x650] sm:$0xff]  ;;  %v4696_v58 = vcombine.low %v678_v45, %v682_v46  ;;  %v4689_v1 = vcombine.high %v670_v4, %v674_v53 }
 0x235   : > { %4095 = vmatprep.subr.bf16.mxu1 %v4865_v59  ;;  %v802_v56 = vld [vmem:[%s5662_s28 + $0x670] sm:$0xff]  ;;  %v4824_v59 = vcombine.low %v806_v31, %v810_v48 }
 0x236   : > { %v4817_v2 = vcombine.high %v798_v54, %v802_v56  ;;  %v662_v3 = vld [vmem:[%s5662_s28 + $0x210] sm:$0xff] }
 0x237   : > { %4055 = vmatpush2.bf16.msra.mxu0 %v4736_v7  ;;  %v666_v6 = vld [vmem:[%s5662_s28 + $0x230] sm:$0xff] }
 0x238   : > { %4096 = vmatpush2.bf16.msra.mxu1 %v4864_v8  ;;  %4056 = vmatprep.subr.bf16.mxu0 %v4729_v9  ;;  %v790_v7 = vld [vmem:[%s5662_s28 + $0x610] sm:$0xff]  ;;  %v4688_v9 = vcombine.low %v670_v4, %v674_v53  ;;  %v4681_v12 = vcombine.high %v662_v3, %v666_v6 }
 0x239   : > { %4097 = vmatprep.subr.bf16.mxu1 %v4857_v10  ;;  %v794_v8 = vld [vmem:[%s5662_s28 + $0x630] sm:$0xff]  ;;  %v4816_v10 = vcombine.low %v798_v54, %v802_v56 }
 0x23a   : > { %v4809_v13 = vcombine.high %v790_v7, %v794_v8  ;;  %v910_v15 = vld [vmem:[%s5662_s28 + $0x9d0] sm:$0xff] }
 0x23b   : > { %4057 = vmatpush2.bf16.msra.mxu0 %v4728_v17  ;;  %v914_v16 = vld [vmem:[%s5662_s28 + $0x9f0] sm:$0xff] }
 0x23c   : > { %4098 = vmatpush2.bf16.msra.mxu1 %v4856_v18  ;;  %4058 = vmatprep.subr.bf16.mxu0 %v4721_v19  ;;  %v1038_v17 = vld [vmem:[%s5662_s28 + $0xdd0] sm:$0xff]  ;;  %v4680_v19 = vcombine.low %v662_v3, %v666_v6  ;;  %v4929_v22 = vcombine.high %v910_v15, %v914_v16 }
 0x23d   : > { %4099 = vmatprep.subr.bf16.mxu1 %v4849_v21  ;;  %v1042_v18 = vld [vmem:[%s5662_s28 + $0xdf0] sm:$0xff]  ;;  %v4808_v21 = vcombine.low %v790_v7, %v794_v8 }
 0x23e   : > { %v5057_v25 = vcombine.high %v1038_v17, %v1042_v18  ;;  %v902_v26 = vld [vmem:[%s5662_s28 + $0x990] sm:$0xff] }
 0x23f   : > { %4059 = vmatpush2.bf16.msra.mxu0 %v4720_v24  ;;  %v906_v23 = vld [vmem:[%s5662_s28 + $0x9b0] sm:$0xff]  ;;  %v4928_v24 = vcombine.low %v910_v15, %v914_v16 }
 0x240   : > { %4100 = vmatpush2.bf16.msra.mxu1 %v4848_v33  ;;  %4060 = vmatprep.subr.bf16.mxu0 %v4713_v34  ;;  %v1030_v33 = vld [vmem:[%s5662_s28 + $0xd90] sm:$0xff]  ;;  %v4921_v38 = vcombine.high %v902_v26, %v906_v23  ;;  %v4920_v46 = vcombine.low %v902_v26, %v906_v23 }
 0x241   : > { %4101 = vmatprep.subr.bf16.mxu1 %v4841_v37  ;;  %v1034_v34 = vld [vmem:[%s5662_s28 + $0xdb0] sm:$0xff]  ;;  %v5056_v37 = vcombine.low %v1038_v17, %v1042_v18 }
 0x242   : > { %v894_v39 = vld [vmem:[%s5662_s28 + $0x950] sm:$0xff] }
 0x243   : > { %4061 = vmatpush2.bf16.msra.mxu0 %v4712_v30  ;;  %v898_v40 = vld [vmem:[%s5662_s28 + $0x970] sm:$0xff] }
 0x244   : > { %4102 = vmatpush2.bf16.msra.mxu1 %v4840_v42  ;;  %4062 = vmatprep.subr.bf16.mxu0 %v4705_v28  ;;  %v5049_v42 = vcombine.high %v1030_v33, %v1034_v34  ;;  %v1022_v28 = vld [vmem:[%s5662_s28 + $0xd50] sm:$0xff] }
 0x245   : > { %4103 = vmatprep.subr.bf16.mxu1 %v4833_v44  ;;  %v1026_v44 = vld [vmem:[%s5662_s28 + $0xd70] sm:$0xff] }
 0x246   : > { %v886_v4 = vld [vmem:[%s5662_s28 + $0x910] sm:$0xff] }
 0x247   : > { %4063 = vmatpush2.bf16.msra.mxu0 %v4704_v49  ;;  %v5048_v49 = vcombine.low %v1030_v33, %v1034_v34  ;;  %v890_v53 = vld [vmem:[%s5662_s28 + $0x930] sm:$0xff] }
 0x248   : > { %4104 = vmatpush2.bf16.msra.mxu1 %v4832_v50  ;;  %4064 = vmatprep.subr.bf16.mxu0 %v4697_v51  ;;  %v4913_v50 = vcombine.high %v894_v39, %v898_v40  ;;  %v4905_v7 = vcombine.high %v886_v4, %v890_v53  ;;  %v1006_v15 = vld [vmem:[%s5662_s28 + $0xcd0] sm:$0xff]  ;;  %v4904_v18 = vcombine.low %v886_v4, %v890_v53 }
 0x249   : > { %4105 = vmatprep.subr.bf16.mxu1 %v4825_v52  ;;  %v1010_v16 = vld [vmem:[%s5662_s28 + $0xcf0] sm:$0xff] }
 0x24a   : > { %v874_v26 = vld [vmem:[%s5662_s28 + $0x8b0] sm:$0xff]  ;;  %v5024_v34 = vcombine.low %v1006_v15, %v1010_v16 }
 0x24b   : > { %4065 = vmatpush2.bf16.msra.mxu0 %v4696_v58  ;;  %v1014_v58 = vld [vmem:[%s5662_s28 + $0xd10] sm:$0xff] }
 0x24c   : > { %4106 = vmatpush2.bf16.msra.mxu1 %v4824_v59  ;;  %4066 = vmatprep.subr.bf16.mxu0 %v4689_v1  ;;  %v1018_v59 = vld [vmem:[%s5662_s28 + $0xd30] sm:$0xff] }
 0x24d   : > { %4107 = vmatprep.subr.bf16.mxu1 %v4817_v2  ;;  %v4912_v2 = vcombine.low %v894_v39, %v898_v40  ;;  %v998_v23 = vld [vmem:[%s5662_s28 + $0xc90] sm:$0xff] }
 0x24e   : > { %v862_v39 = vld [vmem:[%s5662_s28 + $0x850] sm:$0xff] }
 0x24f   : > { %4067 = vmatpush2.bf16.msra.mxu0 %v4688_v9  ;;  %v866_v40 = vld [vmem:[%s5662_s28 + $0x870] sm:$0xff] }
 0x250   : > { %4108 = vmatpush2.bf16.msra.mxu1 %v4816_v10  ;;  %4068 = vmatprep.subr.bf16.mxu0 %v4681_v12  ;;  %v5033_v10 = vcombine.high %v1014_v58, %v1018_v59  ;;  %v878_v12 = vld [vmem:[%s5662_s28 + $0x8d0] sm:$0xff] }
 0x251   : > { %4109 = vmatprep.subr.bf16.mxu1 %v4809_v13  ;;  %v882_v13 = vld [vmem:[%s5662_s28 + $0x8f0] sm:$0xff] }
 0x252   : > { %v4896_v33 = vcombine.low %v878_v12, %v882_v13  ;;  %v974_v4 = vld [vmem:[%s5662_s28 + $0xbd0] sm:$0xff] }
 0x253   : > { %4069 = vmatpush2.bf16.msra.mxu0 %v4680_v19  ;;  %v5032_v19 = vcombine.low %v1014_v58, %v1018_v59  ;;  %v978_v53 = vld [vmem:[%s5662_s28 + $0xbf0] sm:$0xff] }
 0x254   : > { %4110 = vmatpush2.bf16.msra.mxu1 %v4808_v21  ;;  %4120 = vmatprep.subr.bf16.mxu0 %v4929_v22  ;;  %v4897_v21 = vcombine.high %v878_v12, %v882_v13  ;;  %v5025_v22 = vcombine.high %v1006_v15, %v1010_v16  ;;  %v958_v13 = vld [vmem:[%s5662_s28 + $0xb50] sm:$0xff] }
 0x255   : > { %4161 = vmatprep.subr.bf16.mxu1 %v5057_v25  ;;  %v870_v25 = vld [vmem:[%s5662_s28 + $0x890] sm:$0xff] }
 0x256   : > { %v3826_v41 = vpop.f32.mrf.mxu0  ;;  %4071 = vmatmul.mubr.bf16.vlgmr.msra.gmra.mxu0 %v5798_v0  ;;  %v962_v15 = vld [vmem:[%s5662_s28 + $0xb70] sm:$0xff] }
 0x257   : > { %v3867_v30 = vpop.f32.mrf.mxu1  ;;  %v3827_v45 = vadd.f32 %v3826_v41, %v6049_v5  ;;  %4112 = vmatmul.mubr.bf16.vlgmr.msra.gmra.mxu1 %v5786_v57  ;;  %4121 = vmatpush1.bf16.msra.mxu0 %v4928_v24  ;;  %v5041_v5 = vcombine.high %v1022_v28, %v1026_v44  ;;  %v1002_v24 = vld [vmem:[%s5662_s28 + $0xcb0] sm:$0xff] }
 0x258   : > { %4152 = vmatprep.mubr.bf16.mxu0 %v5816_v35  ;;  %4162 = vmatpush1.bf16.msra.mxu1 %v5056_v37  ;;  %v3828_v31 = vpop.f32.mrf.mxu0  ;;  %v4889_v37 = vcombine.high %v870_v25, %v874_v26  ;;  %v990_v41 = vld [vmem:[%s5662_s28 + $0xc50] sm:$0xff] }
 0x259   : > { %v3869_v48 = vpop.f32.mrf.mxu1  ;;  %v3868_v51 = vadd.f32 %v3867_v30, %v3827_v45  ;;  %4193 = vmatprep.mubr.bf16.mxu1 %v5818_v36  ;;  %v3829_v52 = vadd.f32 %v3828_v31, %v6056_v62  ;;  %4122 = vmatprep.subr.bf16.mxu0 %v4921_v38  ;;  %v5040_v62 = vcombine.low %v1022_v28, %v1026_v44  ;;  %v994_v30 = vld [vmem:[%s5662_s28 + $0xc70] sm:$0xff] }
 0x25a   : > { %v3830_v54 = vpop.f32.mrf.mxu0  ;;  %4163 = vmatprep.subr.bf16.mxu1 %v5049_v42  ;;  %v5017_v38 = vcombine.high %v998_v23, %v1002_v24  ;;  %v4888_v42 = vcombine.low %v870_v25, %v874_v26  ;;  %v5016_v28 = vcombine.low %v998_v23, %v1002_v24  ;;  %v4881_v44 = vcombine.high %v862_v39, %v866_v40  ;;  %v858_v31 = vld [vmem:[%s5662_s28 + $0x830] sm:$0xff] }
 0x25b   : > { %v3871_v56 = vpop.f32.mrf.mxu1  ;;  %v3870_v1 = vadd.f32 %v3869_v48, %v3829_v52  ;;  %4123 = vmatpush1.bf16.msra.mxu0 %v4920_v46  ;;  %v4366_v8 = vmax.f32 %v3868_v51, 0.0  ;;  %v5009_v45 = vcombine.high %v990_v41, %v994_v30  ;;  %v854_v46 = vld [vmem:[%s5662_s28 + $0x810] sm:$0xff]  ;;  %v5008_v51 = vcombine.low %v990_v41, %v994_v30 }
 0x25c   : > { %4164 = vmatpush1.bf16.msra.mxu1 %v5048_v49  ;;  %v3831_v3 = vpop.f32.mrf.mxu0  ;;  %4124 = vmatprep.subr.bf16.mxu0 %v4913_v50  ;;  %v982_v48 = vld [vmem:[%s5662_s28 + $0xc10] sm:$0xff]  ;;  %v4880_v50 = vcombine.low %v862_v39, %v866_v40  ;;  %v4873_v52 = vcombine.high %v854_v46, %v858_v31  ;;  %v4872_v58 = vcombine.low %v854_v46, %v858_v31 }
 0x25d   : > { %v3872_v6 = vpop.f32.mrf.mxu1  ;;  %v4367_v9 = vmax.f32 %v3870_v1, 0.0  ;;  %4165 = vmatprep.subr.bf16.mxu1 %v5041_v5  ;;  %v986_v49 = vld [vmem:[%s5662_s28 + $0xc30] sm:$0xff]  ;;  %v4993_v1 = vcombine.high %v974_v4, %v978_v53 }
 0x25e   : > { %v5001_v5 = vcombine.high %v982_v48, %v986_v49  ;;  %v1102_v54 = vld [vmem:[%s5662_s28 + $0xfd0] sm:$0xff]  ;;  %v5000_v59 = vcombine.low %v982_v48, %v986_v49 }
 0x25f   : > { %v6132_v17 = vpack.c.bf16 %v4367_v9, %v4366_v8  ;;  %4125 = vmatpush1.bf16.msra.mxu0 %v4912_v2  ;;  %v1106_v56 = vld [vmem:[%s5662_s28 + $0xff0] sm:$0xff]  ;;  %v4992_v8 = vcombine.low %v974_v4, %v978_v53 }
 0x260   : > { %4166 = vmatpush1.bf16.msra.mxu1 %v5040_v62  ;;  %4126 = vmatprep.subr.bf16.mxu0 %v4905_v7  ;;  %v5121_v2 = vcombine.high %v1102_v54, %v1106_v56  ;;  %v966_v3 = vld [vmem:[%s5662_s28 + $0xb90] sm:$0xff]  ;;  %v5120_v9 = vcombine.low %v1102_v54, %v1106_v56 }
 0x261   : > { %4167 = vmatprep.subr.bf16.mxu1 %v5033_v10  ;;  %v970_v6 = vld [vmem:[%s5662_s28 + $0xbb0] sm:$0xff] }
 0x262   : > { %v1094_v62 = vld [vmem:[%s5662_s28 + $0xf90] sm:$0xff]  ;;  %v4985_v10 = vcombine.high %v966_v3, %v970_v6 }
 0x263   : > { %4127 = vmatpush1.bf16.msra.mxu0 %v4904_v18  ;;  %v1098_v7 = vld [vmem:[%s5662_s28 + $0xfb0] sm:$0xff] }
 0x264   : > { %4168 = vmatpush1.bf16.msra.mxu1 %v5032_v19  ;;  %4128 = vmatprep.subr.bf16.mxu0 %v4897_v21  ;;  %v5113_v12 = vcombine.high %v1094_v62, %v1098_v7  ;;  %v1086_v16 = vld [vmem:[%s5662_s28 + $0xf50] sm:$0xff]  ;;  %v4984_v19 = vcombine.low %v966_v3, %v970_v6  ;;  %v5112_v21 = vcombine.low %v1094_v62, %v1098_v7 }
 0x265   : > { %4169 = vmatprep.subr.bf16.mxu1 %v5025_v22  ;;  %v1090_v18 = vld [vmem:[%s5662_s28 + $0xf70] sm:$0xff]  ;;  %v4977_v22 = vcombine.high %v958_v13, %v962_v15 }
 0x266   : > { %v5105_v25 = vcombine.high %v1086_v16, %v1090_v18  ;;  %v950_v26 = vld [vmem:[%s5662_s28 + $0xb10] sm:$0xff] }
 0x267   : > { %4129 = vmatpush1.bf16.msra.mxu0 %v4896_v33  ;;  %v954_v23 = vld [vmem:[%s5662_s28 + $0xb30] sm:$0xff] }
 0x268   : > { %4170 = vmatpush1.bf16.msra.mxu1 %v5024_v34  ;;  %4130 = vmatprep.subr.bf16.mxu0 %v4889_v37  ;;  %v1078_v24 = vld [vmem:[%s5662_s28 + $0xf10] sm:$0xff]  ;;  %v4976_v34 = vcombine.low %v958_v13, %v962_v15  ;;  %v5104_v37 = vcombine.low %v1086_v16, %v1090_v18  ;;  %v655_v15 = vld [vmem:[%s5662_s28 + $0x1d8] sm:$0xff] }
 0x269   : > { %4171 = vmatprep.subr.bf16.mxu1 %v5017_v38  ;;  %v1082_v33 = vld [vmem:[%s5662_s28 + $0xf30] sm:$0xff]  ;;  %v4969_v38 = vcombine.high %v950_v26, %v954_v23  ;;  %v659_v16 = vld [vmem:[%s5662_s28 + $0x1f8] sm:$0xff] }
 0x26a   : > { %v5097_v39 = vcombine.high %v1078_v24, %v1082_v33  ;;  %v942_v40 = vld [vmem:[%s5662_s28 + $0xad0] sm:$0xff]  ;;  %v783_v18 = vld [vmem:[%s5662_s28 + $0x5d8] sm:$0xff] }
 0x26b   : > { %4131 = vmatpush1.bf16.msra.mxu0 %v4888_v42  ;;  %v946_v41 = vld [vmem:[%s5662_s28 + $0xaf0] sm:$0xff] }
 0x26c   : > { %4172 = vmatpush1.bf16.msra.mxu1 %v5016_v28  ;;  %4132 = vmatprep.subr.bf16.mxu0 %v4881_v44  ;;  %v1070_v30 = vld [vmem:[%s5662_s28 + $0xed0] sm:$0xff]  ;;  %v4968_v28 = vcombine.low %v950_v26, %v954_v23  ;;  %v5096_v44 = vcombine.low %v1078_v24, %v1082_v33  ;;  %v647_v23 = vld [vmem:[%s5662_s28 + $0x198] sm:$0xff]  ;;  %v1121_v33 = vrot.slane %v6030_v20, %v337_v29 }
 0x26d   : > { %4173 = vmatprep.subr.bf16.mxu1 %v5009_v45  ;;  %v1074_v42 = vld [vmem:[%s5662_s28 + $0xef0] sm:$0xff]  ;;  %v4961_v45 = vcombine.high %v942_v40, %v946_v41  ;;  %v651_v24 = vld [vmem:[%s5662_s28 + $0x1b8] sm:$0xff] }
 0x26e   : > { %v5089_v46 = vcombine.high %v1070_v30, %v1074_v42  ;;  %v934_v31 = vld [vmem:[%s5662_s28 + $0xa90] sm:$0xff]  ;;  %v767_v29 = vld [vmem:[%s5662_s28 + $0x558] sm:$0xff] }
 0x26f   : > { %4133 = vmatpush1.bf16.msra.mxu0 %v4880_v50  ;;  %v938_v48 = vld [vmem:[%s5662_s28 + $0xab0] sm:$0xff] }
 0x270   : > { %4174 = vmatpush1.bf16.msra.mxu1 %v5008_v51  ;;  %4134 = vmatprep.subr.bf16.mxu0 %v4873_v52  ;;  %v1062_v49 = vld [vmem:[%s5662_s28 + $0xe90] sm:$0xff]  ;;  %v4960_v51 = vcombine.low %v942_v40, %v946_v41  ;;  %v5088_v52 = vcombine.low %v1070_v30, %v1074_v42  ;;  %v1125_v40 = vrot.slane %v6030_v20, %v341_v32  ;;  %v639_v30 = vld [vmem:[%s5662_s28 + $0x158] sm:$0xff] }
 0x271   : > { %4175 = vmatprep.subr.bf16.mxu1 %v5001_v5  ;;  %v1066_v50 = vld [vmem:[%s5662_s28 + $0xeb0] sm:$0xff]  ;;  %v4953_v5 = vcombine.high %v934_v31, %v938_v48  ;;  %v4667_v41 = vcombine.high %v647_v23, %v651_v24  ;;  %v643_v42 = vld [vmem:[%s5662_s28 + $0x178] sm:$0xff] }
 0x272   : > { %v5081_v4 = vcombine.high %v1062_v49, %v1066_v50  ;;  %v926_v53 = vld [vmem:[%s5662_s28 + $0xa50] sm:$0xff] }
 0x273   : > { %4135 = vmatpush1.bf16.msra.mxu0 %v4872_v58  ;;  %v930_v54 = vld [vmem:[%s5662_s28 + $0xa70] sm:$0xff] }
 0x274   : > { %4176 = vmatpush1.bf16.msra.mxu1 %v5000_v59  ;;  %4136 = vmatprep.subr.bf16.mxu0 %v4993_v1  ;;  %v1054_v56 = vld [vmem:[%s5662_s28 + $0xe50] sm:$0xff]  ;;  %v4952_v59 = vcombine.low %v934_v31, %v938_v48  ;;  %v5080_v1 = vcombine.low %v1062_v49, %v1066_v50  ;;  %v4666_v48 = vcombine.low %v647_v23, %v651_v24 }
 0x275   : > { %4177 = vmatprep.subr.bf16.mxu1 %v5121_v2  ;;  %v1058_v58 = vld [vmem:[%s5662_s28 + $0xe70] sm:$0xff]  ;;  %v4945_v2 = vcombine.high %v926_v53, %v930_v54  ;;  %v4659_v49 = vcombine.high %v639_v30, %v643_v42 }
 0x276   : > { %v5073_v3 = vcombine.high %v1054_v56, %v1058_v58  ;;  %v918_v6 = vld [vmem:[%s5662_s28 + $0xa10] sm:$0xff] }
 0x277   : > { %4137 = vmatpush2.bf16.msra.mxu0 %v4992_v8  ;;  %v922_v62 = vld [vmem:[%s5662_s28 + $0xa30] sm:$0xff] }
 0x278   : > { %4178 = vmatpush2.bf16.msra.mxu1 %v5120_v9  ;;  %4138 = vmatprep.subr.bf16.mxu0 %v4985_v10  ;;  %v1046_v7 = vld [vmem:[%s5662_s28 + $0xe10] sm:$0xff]  ;;  %v4944_v9 = vcombine.low %v926_v53, %v930_v54  ;;  %v5072_v10 = vcombine.low %v1054_v56, %v1058_v58  ;;  %v635_v53 = vld [vmem:[%s5662_s28 + $0x138] sm:$0xff] }
 0x279   : > { %4179 = vmatprep.subr.bf16.mxu1 %v5113_v12  ;;  %v1050_v8 = vld [vmem:[%s5662_s28 + $0xe30] sm:$0xff]  ;;  %v4937_v12 = vcombine.high %v918_v6, %v922_v62  ;;  %v763_v56 = vld [vmem:[%s5662_s28 + $0x538] sm:$0xff] }
 0x27a   : > { %v5065_v13 = vcombine.high %v1046_v7, %v1050_v8 }
 0x27b   : > { %4139 = vmatpush2.bf16.msra.mxu0 %v4984_v19  ;;  %v787_v19 = vld [vmem:[%s5662_s28 + $0x5f8] sm:$0xff] }
 0x27c   : > { %4180 = vmatpush2.bf16.msra.mxu1 %v5112_v21  ;;  %4140 = vmatprep.subr.bf16.mxu0 %v4977_v22  ;;  %v4936_v21 = vcombine.low %v918_v6, %v922_v62  ;;  %v5064_v22 = vcombine.low %v1046_v7, %v1050_v8  ;;  %v4803_v26 = vcombine.high %v783_v18, %v787_v19  ;;  %v623_v7 = vld [vmem:[%s5662_s28 + $0xd8] sm:$0xff] }
 0x27d   : > { %4181 = vmatprep.subr.bf16.mxu1 %v5105_v25  ;;  %v4675_v25 = vcombine.high %v655_v15, %v659_v16  ;;  %v627_v8 = vld [vmem:[%s5662_s28 + $0xf8] sm:$0xff] }
 0x27f   : > { %4141 = vmatpush2.bf16.msra.mxu0 %v4976_v34  ;;  %v4674_v34 = vcombine.low %v655_v15, %v659_v16  ;;  %v4643_v15 = vcombine.high %v623_v7, %v627_v8 }
 0x280   : > { %4182 = vmatpush2.bf16.msra.mxu1 %v5104_v37  ;;  %4142 = vmatprep.subr.bf16.mxu0 %v4969_v38  ;;  %v775_v37 = vld [vmem:[%s5662_s28 + $0x598] sm:$0xff] }
 0x281   : > { %4183 = vmatprep.subr.bf16.mxu1 %v5097_v39  ;;  %v779_v38 = vld [vmem:[%s5662_s28 + $0x5b8] sm:$0xff]  ;;  %v4802_v39 = vcombine.low %v783_v18, %v787_v19 }
 0x282   : > { %v4794_v20 = vcombine.low %v775_v37, %v779_v38  ;;  %v615_v18 = vld [vmem:[%s5662_s28 + $0x98] sm:$0xff] }
 0x283   : > { %4143 = vmatpush2.bf16.msra.mxu0 %v4968_v28  ;;  %v619_v19 = vld [vmem:[%s5662_s28 + $0xb8] sm:$0xff] }
 0x284   : > { %4184 = vmatpush2.bf16.msra.mxu1 %v5096_v44  ;;  %4144 = vmatprep.subr.bf16.mxu0 %v4961_v45  ;;  %v4795_v44 = vcombine.high %v775_v37, %v779_v38  ;;  %v771_v45 = vld [vmem:[%s5662_s28 + $0x578] sm:$0xff]  ;;  %v4635_v23 = vcombine.high %v615_v18, %v619_v19 }
 0x285   : > { %4185 = vmatprep.subr.bf16.mxu1 %v5089_v46  ;;  %v735_v37 = vld [vmem:[%s5662_s28 + $0x458] sm:$0xff] }
 0x286   : > { %v739_v38 = vld [vmem:[%s5662_s28 + $0x478] sm:$0xff] }
 0x287   : > { %4145 = vmatpush2.bf16.msra.mxu0 %v4960_v51 }
 0x288   : > { %4186 = vmatpush2.bf16.msra.mxu1 %v5088_v52  ;;  %4146 = vmatprep.subr.bf16.mxu0 %v4953_v5  ;;  %v4787_v5 = vcombine.high %v767_v29, %v771_v45 }
 0x289   : > { %4187 = vmatprep.subr.bf16.mxu1 %v5081_v4  ;;  %v631_v4 = vld [vmem:[%s5662_s28 + $0x118] sm:$0xff] }
 0x28b   : > { %4147 = vmatpush2.bf16.msra.mxu0 %v4952_v59 }
 0x28c   : > { %4188 = vmatpush2.bf16.msra.mxu1 %v5080_v1  ;;  %4148 = vmatprep.subr.bf16.mxu0 %v4945_v2  ;;  %v4658_v1 = vcombine.low %v639_v30, %v643_v42  ;;  %v4786_v2 = vcombine.low %v767_v29, %v771_v45  ;;  %v4755_v30 = vcombine.high %v735_v37, %v739_v38  ;;  %v599_v42 = vld [vmem:[%s5662_s28 + $0x18] sm:$0xff] }
 0x28d   : > { %4189 = vmatprep.subr.bf16.mxu1 %v5073_v3  ;;  %v4651_v3 = vcombine.high %v631_v4, %v635_v53  ;;  %v731_v29 = vld [vmem:[%s5662_s28 + $0x438] sm:$0xff] }
 0x28f   : > { %4149 = vmatpush2.bf16.msra.mxu0 %v4944_v9  ;;  %v751_v9 = vld [vmem:[%s5662_s28 + $0x4d8] sm:$0xff] }
 0x290   : > { %4190 = vmatpush2.bf16.msra.mxu1 %v5072_v10  ;;  %4150 = vmatprep.subr.bf16.mxu0 %v4937_v12  ;;  %v755_v10 = vld [vmem:[%s5662_s28 + $0x4f8] sm:$0xff]  ;;  %v4650_v12 = vcombine.low %v631_v4, %v635_v53 }
 0x291   : > { %4191 = vmatprep.subr.bf16.mxu1 %v5065_v13  ;;  %v4771_v16 = vcombine.high %v751_v9, %v755_v10 }
 0x293   : > { %4151 = vmatpush2.bf16.msra.mxu0 %v4936_v21  ;;  %v743_v21 = vld [vmem:[%s5662_s28 + $0x498] sm:$0xff] }
 0x294   : > { %4192 = vmatpush2.bf16.msra.mxu1 %v5064_v22  ;;  %4202 = vmatprep.subr.bf16.mxu0 %v4675_v25  ;;  %v747_v22 = vld [vmem:[%s5662_s28 + $0x4b8] sm:$0xff]  ;;  %v4642_v25 = vcombine.low %v623_v7, %v627_v8 }
 0x295   : > { %4243 = vmatprep.subr.bf16.mxu1 %v4803_v26  ;;  %v4770_v26 = vcombine.low %v751_v9, %v755_v10  ;;  %v4763_v24 = vcombine.high %v743_v21, %v747_v22  ;;  %v831_v7 = vld [vmem:[%s5662_s28 + $0x758] sm:$0xff] }
 0x296   : > { %v3908_v28 = vpop.f32.mrf.mxu0  ;;  %4153 = vmatmul.mubr.bf16.vlgmr.msra.gmra.mxu0 %v5890_v63  ;;  %v835_v8 = vld [vmem:[%s5662_s28 + $0x778] sm:$0xff] }
 0x297   : > { %v3909_v46 = vadd.f32 %v3908_v28, %v1121_v33  ;;  %v3949_v31 = vpop.f32.mrf.mxu1  ;;  %4194 = vmatmul.mubr.bf16.vlgmr.msra.gmra.mxu1 %v5885_v55  ;;  %4203 = vmatpush1.bf16.msra.mxu0 %v4674_v34  ;;  %v607_v33 = vld [vmem:[%s5662_s28 + $0x58] sm:$0xff] }
 0x298   : > { %4234 = vmatprep.mubr.bf16.mxu0 %v5788_v60  ;;  %4244 = vmatpush1.bf16.msra.mxu1 %v4802_v39  ;;  %v3910_v32 = vpop.f32.mrf.mxu0  ;;  %v759_v60 = vld [vmem:[%s5662_s28 + $0x518] sm:$0xff]  ;;  %v4634_v39 = vcombine.low %v615_v18, %v619_v19 }
 0x299   : > { %v6199_v50 = vadd.f32 %v3949_v31, %v3909_v46  ;;  %4275 = vmatprep.mubr.bf16.mxu1 %v5790_v61  ;;  %v3911_v51 = vadd.f32 %v3910_v32, %v1125_v40  ;;  %v3951_v52 = vpop.f32.mrf.mxu1  ;;  %4204 = vmatprep.subr.bf16.mxu0 %v4667_v41  ;;  %v4779_v62 = vcombine.high %v759_v60, %v763_v56  ;;  %v611_v34 = vld [vmem:[%s5662_s28 + $0x78] sm:$0xff] }
 0x29a   : > { %v3912_v54 = vpop.f32.mrf.mxu0  ;;  %4245 = vmatprep.subr.bf16.mxu1 %v4795_v44  ;;  %v4778_v13 = vcombine.low %v759_v60, %v763_v56  ;;  %v4762_v40 = vcombine.low %v743_v21, %v747_v22  ;;  %v4627_v41 = vcombine.high %v607_v33, %v611_v34  ;;  %v603_v28 = vld [vmem:[%s5662_s28 + $0x38] sm:$0xff]  ;;  %v4626_v45 = vcombine.low %v607_v33, %v611_v34 }
 0x29b   : > { %v6206_v58 = vadd.f32 %v3951_v52, %v3911_v51  ;;  %v3953_v59 = vpop.f32.mrf.mxu1  ;;  %4205 = vmatpush1.bf16.msra.mxu0 %v4666_v48  ;;  %v727_v44 = vld [vmem:[%s5662_s28 + $0x418] sm:$0xff]  ;;  %v4754_v46 = vcombine.low %v735_v37, %v739_v38  ;;  %v4619_v31 = vcombine.high %v599_v42, %v603_v28  ;;  %v4618_v52 = vcombine.low %v599_v42, %v603_v28 }
 0x29c   : > { %4246 = vmatpush1.bf16.msra.mxu1 %v4794_v20  ;;  %v3913_v61 = vpop.f32.mrf.mxu0  ;;  %4206 = vmatprep.subr.bf16.mxu0 %v4659_v49  ;;  %v4747_v48 = vcombine.high %v727_v44, %v731_v29  ;;  %v719_v32 = vld [vmem:[%s5662_s28 + $0x3d8] sm:$0xff]  ;;  %v4850_v22 = vcombine.low %v831_v7, %v835_v8 }
 0x29d   : > { %v3954_v6 = vpop.f32.mrf.mxu1  ;;  %4247 = vmatprep.subr.bf16.mxu1 %v4787_v5  ;;  %v723_v20 = vld [vmem:[%s5662_s28 + $0x3f8] sm:$0xff]  ;;  %v4746_v5 = vcombine.low %v727_v44, %v731_v29 }
 0x29e   : > { %v847_v49 = vld [vmem:[%s5662_s28 + $0x7d8] sm:$0xff]  ;;  %v4739_v4 = vcombine.high %v719_v32, %v723_v20 }
 0x29f   : > { %4207 = vmatpush1.bf16.msra.mxu0 %v4658_v1  ;;  %v851_v51 = vld [vmem:[%s5662_s28 + $0x7f8] sm:$0xff]  ;;  %v4738_v1 = vcombine.low %v719_v32, %v723_v20 }
 0x2a0   : > { %4248 = vmatpush1.bf16.msra.mxu1 %v4786_v2  ;;  %4208 = vmatprep.subr.bf16.mxu0 %v4651_v3  ;;  %v4867_v53 = vcombine.high %v847_v49, %v851_v51  ;;  %v711_v54 = vld [vmem:[%s5662_s28 + $0x398] sm:$0xff]  ;;  %v4866_v61 = vcombine.low %v847_v49, %v851_v51 }
 0x2a1   : > { %4249 = vmatprep.subr.bf16.mxu1 %v4779_v62  ;;  %v715_v60 = vld [vmem:[%s5662_s28 + $0x3b8] sm:$0xff] }
 0x2a2   : > { %v839_v56 = vld [vmem:[%s5662_s28 + $0x798] sm:$0xff]  ;;  %v4731_v2 = vcombine.high %v711_v54, %v715_v60  ;;  %v4730_v9 = vcombine.low %v711_v54, %v715_v60 }
 0x2a3   : > { %4209 = vmatpush1.bf16.msra.mxu0 %v4650_v12  ;;  %v843_v59 = vld [vmem:[%s5662_s28 + $0x7b8] sm:$0xff] }
 0x2a4   : > { %4250 = vmatpush1.bf16.msra.mxu1 %v4778_v13  ;;  %4210 = vmatprep.subr.bf16.mxu0 %v4643_v15  ;;  %v4859_v3 = vcombine.high %v839_v56, %v843_v59  ;;  %v703_v6 = vld [vmem:[%s5662_s28 + $0x358] sm:$0xff]  ;;  %v4858_v10 = vcombine.low %v839_v56, %v843_v59  ;;  %v4851_v13 = vcombine.high %v831_v7, %v835_v8 }
 0x2a5   : > { %4251 = vmatprep.subr.bf16.mxu1 %v4771_v16  ;;  %v707_v62 = vld [vmem:[%s5662_s28 + $0x378] sm:$0xff] }
 0x2a6   : > { %v4723_v12 = vcombine.high %v703_v6, %v707_v62  ;;  %v695_v15 = vld [vmem:[%s5662_s28 + $0x318] sm:$0xff]  ;;  %v4722_v21 = vcombine.low %v703_v6, %v707_v62 }
 0x2a7   : > { %4211 = vmatpush1.bf16.msra.mxu0 %v4642_v25  ;;  %v699_v16 = vld [vmem:[%s5662_s28 + $0x338] sm:$0xff] }
 0x2a8   : > { %4252 = vmatpush1.bf16.msra.mxu1 %v4770_v26  ;;  %4212 = vmatprep.subr.bf16.mxu0 %v4635_v23  ;;  %v823_v18 = vld [vmem:[%s5662_s28 + $0x718] sm:$0xff]  ;;  %v4715_v25 = vcombine.high %v695_v15, %v699_v16  ;;  %v4714_v37 = vcombine.low %v695_v15, %v699_v16 }
 0x2a9   : > { %4253 = vmatprep.subr.bf16.mxu1 %v4763_v24  ;;  %v827_v19 = vld [vmem:[%s5662_s28 + $0x738] sm:$0xff] }
 0x2aa   : > { %v4843_v26 = vcombine.high %v823_v18, %v827_v19  ;;  %v687_v23 = vld [vmem:[%s5662_s28 + $0x2d8] sm:$0xff]  ;;  %v4842_v38 = vcombine.low %v823_v18, %v827_v19 }
 0x2ab   : > { %4213 = vmatpush1.bf16.msra.mxu0 %v4634_v39  ;;  %v691_v24 = vld [vmem:[%s5662_s28 + $0x2f8] sm:$0xff] }
 0x2ac   : > { %4254 = vmatpush1.bf16.msra.mxu1 %v4762_v40  ;;  %4214 = vmatprep.subr.bf16.mxu0 %v4627_v41  ;;  %v815_v33 = vld [vmem:[%s5662_s28 + $0x6d8] sm:$0xff]  ;;  %v4707_v39 = vcombine.high %v687_v23, %v691_v24  ;;  %v4706_v44 = vcombine.low %v687_v23, %v691_v24 }
 0x2ad   : > { %4255 = vmatprep.subr.bf16.mxu1 %v4755_v30  ;;  %v819_v34 = vld [vmem:[%s5662_s28 + $0x6f8] sm:$0xff] }
 0x2ae   : > { %v4835_v40 = vcombine.high %v815_v33, %v819_v34  ;;  %v679_v41 = vld [vmem:[%s5662_s28 + $0x298] sm:$0xff]  ;;  %v4834_v29 = vcombine.low %v815_v33, %v819_v34 }
 0x2af   : > { %4215 = vmatpush1.bf16.msra.mxu0 %v4626_v45  ;;  %v683_v30 = vld [vmem:[%s5662_s28 + $0x2b8] sm:$0xff] }
 0x2b0   : > { %4256 = vmatpush1.bf16.msra.mxu1 %v4754_v46  ;;  %4216 = vmatprep.subr.bf16.mxu0 %v4619_v31  ;;  %v807_v42 = vld [vmem:[%s5662_s28 + $0x698] sm:$0xff]  ;;  %v4699_v45 = vcombine.high %v679_v41, %v683_v30  ;;  %v4698_v49 = vcombine.low %v679_v41, %v683_v30 }
 0x2b1   : > { %4257 = vmatprep.subr.bf16.mxu1 %v4747_v48  ;;  %v811_v28 = vld [vmem:[%s5662_s28 + $0x6b8] sm:$0xff] }
 0x2b2   : > { %v4827_v46 = vcombine.high %v807_v42, %v811_v28  ;;  %v671_v31 = vld [vmem:[%s5662_s28 + $0x258] sm:$0xff]  ;;  %v4826_v51 = vcombine.low %v807_v42, %v811_v28 }
 0x2b3   : > { %4217 = vmatpush1.bf16.msra.mxu0 %v4618_v52  ;;  %v675_v48 = vld [vmem:[%s5662_s28 + $0x278] sm:$0xff] }
 0x2b4   : > { %4258 = vmatpush1.bf16.msra.mxu1 %v4746_v5  ;;  %4218 = vmatprep.subr.bf16.mxu0 %v4739_v4  ;;  %v799_v32 = vld [vmem:[%s5662_s28 + $0x658] sm:$0xff]  ;;  %v4691_v52 = vcombine.high %v671_v31, %v675_v48  ;;  %v4690_v56 = vcombine.low %v671_v31, %v675_v48 }
 0x2b5   : > { %4259 = vmatprep.subr.bf16.mxu1 %v4867_v53  ;;  %v803_v20 = vld [vmem:[%s5662_s28 + $0x678] sm:$0xff] }
 0x2b6   : > { %v4819_v5 = vcombine.high %v799_v32, %v803_v20  ;;  %v663_v4 = vld [vmem:[%s5662_s28 + $0x218] sm:$0xff]  ;;  %v4818_v59 = vcombine.low %v799_v32, %v803_v20 }
 0x2b7   : > { %4219 = vmatpush2.bf16.msra.mxu0 %v4738_v1  ;;  %v667_v53 = vld [vmem:[%s5662_s28 + $0x238] sm:$0xff] }
 0x2b8   : > { %4260 = vmatpush2.bf16.msra.mxu1 %v4866_v61  ;;  %4220 = vmatprep.subr.bf16.mxu0 %v4731_v2  ;;  %v791_v54 = vld [vmem:[%s5662_s28 + $0x618] sm:$0xff]  ;;  %v4683_v1 = vcombine.high %v663_v4, %v667_v53  ;;  %v4682_v7 = vcombine.low %v663_v4, %v667_v53 }
 0x2b9   : > { %4261 = vmatprep.subr.bf16.mxu1 %v4859_v3  ;;  %v795_v60 = vld [vmem:[%s5662_s28 + $0x638] sm:$0xff] }
 0x2ba   : > { %v4811_v61 = vcombine.high %v791_v54, %v795_v60  ;;  %v911_v2 = vld [vmem:[%s5662_s28 + $0x9d8] sm:$0xff]  ;;  %v4810_v8 = vcombine.low %v791_v54, %v795_v60 }
 0x2bb   : > { %4221 = vmatpush2.bf16.msra.mxu0 %v4730_v9  ;;  %v915_v3 = vld [vmem:[%s5662_s28 + $0x9f8] sm:$0xff] }
 0x2bc   : > { %4262 = vmatpush2.bf16.msra.mxu1 %v4858_v10  ;;  %4222 = vmatprep.subr.bf16.mxu0 %v4723_v12  ;;  %v1039_v6 = vld [vmem:[%s5662_s28 + $0xdd8] sm:$0xff]  ;;  %v4931_v9 = vcombine.high %v911_v2, %v915_v3  ;;  %v4930_v15 = vcombine.low %v911_v2, %v915_v3 }
 0x2bd   : > { %4263 = vmatprep.subr.bf16.mxu1 %v4851_v13  ;;  %v1043_v62 = vld [vmem:[%s5662_s28 + $0xdf8] sm:$0xff] }
 0x2be   : > { %v5059_v10 = vcombine.high %v1039_v6, %v1043_v62  ;;  %v903_v12 = vld [vmem:[%s5662_s28 + $0x998] sm:$0xff]  ;;  %v5058_v19 = vcombine.low %v1039_v6, %v1043_v62 }
 0x2bf   : > { %4223 = vmatpush2.bf16.msra.mxu0 %v4722_v21  ;;  %v907_v13 = vld [vmem:[%s5662_s28 + $0x9b8] sm:$0xff]  ;;  %v5449_v21 = vmov 1966171168  }
 0x2c0   : > { %4264 = vmatpush2.bf16.msra.mxu1 %v4850_v22  ;;  %4224 = vmatprep.subr.bf16.mxu0 %v4715_v25  ;;  %v1031_v16 = vld [vmem:[%s5662_s28 + $0xd98] sm:$0xff]  ;;  %v4395_v22 = vunpack.c.l.s4 %v5449_v21  ;;  %v4923_v25 = vcombine.high %v903_v12, %v907_v13 }
 0x2c1   : > { %4265 = vmatprep.subr.bf16.mxu1 %v4843_v26  ;;  %v1035_v18 = vld [vmem:[%s5662_s28 + $0xdb8] sm:$0xff] }
 0x2c2   : > { %v895_v26 = vld [vmem:[%s5662_s28 + $0x958] sm:$0xff]  ;;  %v5051_v33 = vcombine.high %v1031_v16, %v1035_v18  ;;  %v5050_v30 = vcombine.low %v1031_v16, %v1035_v18  ;;  %v4396_v42 = vunpack.c.0.s8 %v4395_v22 }
 0x2c3   : > { %4225 = vmatpush2.bf16.msra.mxu0 %v4714_v37  ;;  %v899_v23 = vld [vmem:[%s5662_s28 + $0x978] sm:$0xff] }
 0x2c4   : > { %4266 = vmatpush2.bf16.msra.mxu1 %v4842_v38  ;;  %4226 = vmatprep.subr.bf16.mxu0 %v4707_v39  ;;  %v1023_v34 = vld [vmem:[%s5662_s28 + $0xd58] sm:$0xff]  ;;  %v4914_v20 = vcombine.low %v895_v26, %v899_v23 }
 0x2c5   : > { %4267 = vmatprep.subr.bf16.mxu1 %v4835_v40  ;;  %v1027_v37 = vld [vmem:[%s5662_s28 + $0xd78] sm:$0xff]  ;;  %v4922_v40 = vcombine.low %v903_v12, %v907_v13 }
 0x2c6   : > { %v1019_v31 = vld [vmem:[%s5662_s28 + $0xd38] sm:$0xff] }
 0x2c7   : > { %4227 = vmatpush2.bf16.msra.mxu0 %v4706_v44  ;;  %v879_v54 = vld [vmem:[%s5662_s28 + $0x8d8] sm:$0xff] }
 0x2c8   : > { %4268 = vmatpush2.bf16.msra.mxu1 %v4834_v29  ;;  %4228 = vmatprep.subr.bf16.mxu0 %v4699_v45  ;;  %v887_v29 = vld [vmem:[%s5662_s28 + $0x918] sm:$0xff] }
 0x2c9   : > { %4269 = vmatprep.subr.bf16.mxu1 %v4827_v46  ;;  %v891_v45 = vld [vmem:[%s5662_s28 + $0x938] sm:$0xff] }
 0x2ca   : > { %v883_v60 = vld [vmem:[%s5662_s28 + $0x8f8] sm:$0xff] }
 0x2cb   : > { %4229 = vmatpush2.bf16.msra.mxu0 %v4698_v49  ;;  %v4907_v49 = vcombine.high %v887_v29, %v891_v45  ;;  %v4899_v3 = vcombine.high %v879_v54, %v883_v60  ;;  %v1003_v12 = vld [vmem:[%s5662_s28 + $0xcb8] sm:$0xff] }
 0x2cc   : > { %4270 = vmatpush2.bf16.msra.mxu1 %v4826_v51  ;;  %4230 = vmatprep.subr.bf16.mxu0 %v4691_v52  ;;  %v6279_v51 = vsub.s32 %v4396_v42, %v5760_v27  ;;  %v867_v21 = vld [vmem:[%s5662_s28 + $0x878] sm:$0xff] }
 0x2cd   : > { %4271 = vmatprep.subr.bf16.mxu1 %v4819_v5  ;;  %v991_v22 = vld [vmem:[%s5662_s28 + $0xc58] sm:$0xff] }
 0x2ce   : > { %v4400_v6 = vrot.slane %v6132_v17, %v6279_v51  ;;  %v975_v42 = vld [vmem:[%s5662_s28 + $0xbd8] sm:$0xff] }
 0x2cf   : > { %4231 = vmatpush2.bf16.msra.mxu0 %v4690_v56  ;;  %v1007_v56 = vld [vmem:[%s5662_s28 + $0xcd8] sm:$0xff] }
 0x2d0   : > { %4272 = vmatpush2.bf16.msra.mxu1 %v4818_v59  ;;  %4232 = vmatprep.subr.bf16.mxu0 %v4683_v1  ;;  %v1011_v59 = vld [vmem:[%s5662_s28 + $0xcf8] sm:$0xff] }
 0x2d1   : > { %4273 = vmatprep.subr.bf16.mxu1 %v4811_v61  ;;  %v4906_v61 = vcombine.low %v887_v29, %v891_v45  ;;  %v5026_v16 = vcombine.low %v1007_v56, %v1011_v59 }
 0x2d3   : > { %4233 = vmatpush2.bf16.msra.mxu0 %v4682_v7  ;;  %v5027_v7 = vcombine.high %v1007_v56, %v1011_v59 }
 0x2d4   : > { %4274 = vmatpush2.bf16.msra.mxu1 %v4810_v8  ;;  %4284 = vmatprep.subr.bf16.mxu0 %v4931_v9  ;;  %v871_v8 = vld [vmem:[%s5662_s28 + $0x898] sm:$0xff] }
 0x2d5   : > { %4325 = vmatprep.subr.bf16.mxu1 %v5059_v10  ;;  %v875_v9 = vld [vmem:[%s5662_s28 + $0x8b8] sm:$0xff] }
 0x2d6   : > { %v3990_v24 = vpop.f32.mrf.mxu0  ;;  %4235 = vmatmul.mubr.bf16.vlgmr.msra.gmra.mxu0 %v5798_v0  ;;  %v4915_v0 = vcombine.high %v895_v26, %v899_v23  ;;  %v999_v10 = vld [vmem:[%s5662_s28 + $0xc98] sm:$0xff]  ;;  %v4891_v17 = vcombine.high %v871_v8, %v875_v9  ;;  %v4890_v26 = vcombine.low %v871_v8, %v875_v9 }
 0x2d7   : > { %v3991_v38 = vadd.f32 %v3990_v24, %v6199_v50  ;;  %v4031_v39 = vpop.f32.mrf.mxu1  ;;  %4276 = vmatmul.mubr.bf16.vlgmr.msra.gmra.mxu1 %v5786_v57  ;;  %4285 = vmatpush1.bf16.msra.mxu0 %v4930_v15  ;;  %v5043_v57 = vcombine.high %v1023_v34, %v1027_v37  ;;  %v4898_v15 = vcombine.low %v879_v54, %v883_v60  ;;  %v943_v9 = vld [vmem:[%s5662_s28 + $0xad8] sm:$0xff] }
 0x2d8   : > { %4316 = vmatprep.mubr.bf16.mxu0 %v5816_v35  ;;  %4326 = vmatpush1.bf16.msra.mxu1 %v5058_v19  ;;  %v3992_v41 = vpop.f32.mrf.mxu0  ;;  %v1015_v35 = vld [vmem:[%s5662_s28 + $0xd18] sm:$0xff]  ;;  %v5019_v18 = vcombine.high %v999_v10, %v1003_v12  ;;  %v5018_v23 = vcombine.low %v999_v10, %v1003_v12 }
 0x2d9   : > { %v4032_v28 = vadd.f32 %v4031_v39, %v3991_v38  ;;  %4357 = vmatprep.mubr.bf16.mxu1 %v5818_v36  ;;  %v3993_v50 = vadd.f32 %v3992_v41, %v6206_v58  ;;  %v4033_v44 = vpop.f32.mrf.mxu1  ;;  %4286 = vmatprep.subr.bf16.mxu0 %v4923_v25  ;;  %v5042_v58 = vcombine.low %v1023_v34, %v1027_v37  ;;  %v863_v19 = vld [vmem:[%s5662_s28 + $0x858] sm:$0xff] }
 0x2da   : > { %v3994_v46 = vpop.f32.mrf.mxu0  ;;  %4327 = vmatprep.subr.bf16.mxu1 %v5051_v33  ;;  %v5035_v53 = vcombine.high %v1015_v35, %v1019_v31  ;;  %v5034_v2 = vcombine.low %v1015_v35, %v1019_v31  ;;  %v995_v25 = vld [vmem:[%s5662_s28 + $0xc78] sm:$0xff]  ;;  %v4883_v24 = vcombine.high %v863_v19, %v867_v21 }
 0x2db   : > { %v4034_v48 = vadd.f32 %v4033_v44, %v3993_v50  ;;  %v4035_v32 = vpop.f32.mrf.mxu1  ;;  %4287 = vmatpush1.bf16.msra.mxu0 %v4922_v40  ;;  %v4368_v52 = vmax.f32 %v4032_v28, 0.0  ;;  %v5011_v33 = vcombine.high %v991_v22, %v995_v25  ;;  %v855_v34 = vld [vmem:[%s5662_s28 + $0x818] sm:$0xff]  ;;  %v4882_v40 = vcombine.low %v863_v19, %v867_v21 }
 0x2dc   : > { %4328 = vmatpush1.bf16.msra.mxu1 %v5050_v30  ;;  %v3995_v36 = vpop.f32.mrf.mxu0  ;;  %4288 = vmatprep.subr.bf16.mxu0 %v4915_v0  ;;  %v859_v37 = vld [vmem:[%s5662_s28 + $0x838] sm:$0xff]  ;;  %v5010_v41 = vcombine.low %v991_v22, %v995_v25 }
 0x2dd   : > { %v4369_v5 = vmax.f32 %v4034_v48, 0.0  ;;  %v4036_v4 = vpop.f32.mrf.mxu1  ;;  %4329 = vmatprep.subr.bf16.mxu1 %v5043_v57  ;;  %v983_v38 = vld [vmem:[%s5662_s28 + $0xc18] sm:$0xff]  ;;  %v4875_v30 = vcombine.high %v855_v34, %v859_v37  ;;  %v4874_v57 = vcombine.low %v855_v34, %v859_v37 }
 0x2de   : > { %v987_v39 = vld [vmem:[%s5662_s28 + $0xc38] sm:$0xff] }
 0x2df   : > { %v5125_v1 = vpack.c.bf16 %v4369_v5, %v4368_v52  ;;  %4289 = vmatpush1.bf16.msra.mxu0 %v4914_v20  ;;  %v5003_v0 = vcombine.high %v983_v38, %v987_v39  ;;  %v979_v28 = vld [vmem:[%s5662_s28 + $0xbf8] sm:$0xff]  ;;  %v5002_v29 = vcombine.low %v983_v38, %v987_v39 }
 0x2e0   : > { %4330 = vmatpush1.bf16.msra.mxu1 %v5042_v58  ;;  %4290 = vmatprep.subr.bf16.mxu0 %v4907_v49  ;;  %v1103_v50 = vld [vmem:[%s5662_s28 + $0xfd8] sm:$0xff]  ;;  %v4995_v45 = vcombine.high %v975_v42, %v979_v28  ;;  %v4994_v20 = vcombine.low %v975_v42, %v979_v28 }
 0x2e1   : > { %v4407_v62 = vrot.slane %v5125_v1, %v6279_v51  ;;  %4331 = vmatprep.subr.bf16.mxu1 %v5035_v53  ;;  %v1107_v44 = vld [vmem:[%s5662_s28 + $0xff8] sm:$0xff] }
 0x2e2   : > { %v5123_v46 = vcombine.high %v1103_v50, %v1107_v44  ;;  %v967_v35 = vld [vmem:[%s5662_s28 + $0xb98] sm:$0xff]  ;;  %v5122_v36 = vcombine.low %v1103_v50, %v1107_v44 }
 0x2e3   : > { %v6292_v13 = vcombine.low %v4400_v6, %v4407_v62  ;;  %4291 = vmatpush1.bf16.msra.mxu0 %v4906_v61  ;;  %v971_v31 = vld [vmem:[%s5662_s28 + $0xbb8] sm:$0xff] }
 0x2e4   : > { %4332 = vmatpush1.bf16.msra.mxu1 %v5034_v2  ;;  %4292 = vmatprep.subr.bf16.mxu0 %v4899_v3  ;;  %v1095_v48 = vld [vmem:[%s5662_s28 + $0xf98] sm:$0xff]  ;;  %v4987_v58 = vcombine.high %v967_v35, %v971_v31  ;;  %v4986_v54 = vcombine.low %v967_v35, %v971_v31 }
 0x2e5   : > { %4333 = vmatprep.subr.bf16.mxu1 %v5027_v7  ;;  %v1099_v32 = vld [vmem:[%s5662_s28 + $0xfb8] sm:$0xff] }
 0x2e6   : > { %v5115_v49 = vcombine.high %v1095_v48, %v1099_v32  ;;  %v959_v52 = vld [vmem:[%s5662_s28 + $0xb58] sm:$0xff]  ;;  %v5114_v60 = vcombine.low %v1095_v48, %v1099_v32  ;;  %v5231_v32 = vld [vmem:[%s6027_s14] sm:$0xff] }
 0x2e7   : > { %4293 = vmatpush1.bf16.msra.mxu0 %v4898_v15  ;;  %v963_v5 = vld [vmem:[%s5662_s28 + $0xb78] sm:$0xff] }
 0x2e8   : > { %4334 = vmatpush1.bf16.msra.mxu1 %v5026_v16  ;;  %4294 = vmatprep.subr.bf16.mxu0 %v4891_v17  ;;  %v1087_v4 = vld [vmem:[%s5662_s28 + $0xf58] sm:$0xff]  ;;  %v4979_v56 = vcombine.high %v959_v52, %v963_v5  ;;  %v4978_v6 = vcombine.low %v959_v52, %v963_v5 }
 0x2e9   : > { %4335 = vmatprep.subr.bf16.mxu1 %v5019_v18  ;;  %v1091_v53 = vld [vmem:[%s5662_s28 + $0xf78] sm:$0xff] }
 0x2ea   : > { %v5107_v59 = vcombine.high %v1087_v4, %v1091_v53  ;;  %v951_v1 = vld [vmem:[%s5662_s28 + $0xb18] sm:$0xff]  ;;  %v5106_v62 = vcombine.low %v1087_v4, %v1091_v53 }
 0x2eb   : > { %4295 = vmatpush1.bf16.msra.mxu0 %v4890_v26  ;;  %v955_v61 = vld [vmem:[%s5662_s28 + $0xb38] sm:$0xff] }
 0x2ec   : > { %4336 = vmatpush1.bf16.msra.mxu1 %v5018_v23  ;;  %4296 = vmatprep.subr.bf16.mxu0 %v4883_v24  ;;  %v1079_v2 = vld [vmem:[%s5662_s28 + $0xf18] sm:$0xff]  ;;  %v4971_v7 = vcombine.high %v951_v1, %v955_v61  ;;  %v4970_v16 = vcombine.low %v951_v1, %v955_v61 }
 0x2ed   : > { %4337 = vmatprep.subr.bf16.mxu1 %v5011_v33  ;;  %v1083_v3 = vld [vmem:[%s5662_s28 + $0xf38] sm:$0xff] }
 0x2ee   : > { %v5099_v8 = vcombine.high %v1079_v2, %v1083_v3  ;;  %v947_v10 = vld [vmem:[%s5662_s28 + $0xaf8] sm:$0xff]  ;;  %v5098_v17 = vcombine.low %v1079_v2, %v1083_v3 }
 0x2ef   : > { %4297 = vmatpush1.bf16.msra.mxu0 %v4882_v40  ;;  %v1071_v12 = vld [vmem:[%s5662_s28 + $0xed8] sm:$0xff]  ;;  %v4963_v18 = vcombine.high %v943_v9, %v947_v10  ;;  %v4962_v23 = vcombine.low %v943_v9, %v947_v10 }
 0x2f0   : > { %4338 = vmatpush1.bf16.msra.mxu1 %v5010_v41  ;;  %4298 = vmatprep.subr.bf16.mxu0 %v4875_v30  ;;  %v1075_v15 = vld [vmem:[%s5662_s28 + $0xef8] sm:$0xff] }
 0x2f1   : > { %4339 = vmatprep.subr.bf16.mxu1 %v5003_v0  ;;  %v5091_v19 = vcombine.high %v1071_v12, %v1075_v15  ;;  %v935_v21 = vld [vmem:[%s5662_s28 + $0xa98] sm:$0xff]  ;;  %v5090_v24 = vcombine.low %v1071_v12, %v1075_v15 }
 0x2f2   : > { %v939_v22 = vld [vmem:[%s5662_s28 + $0xab8] sm:$0xff] }
 0x2f3   : > { %4299 = vmatpush1.bf16.msra.mxu0 %v4874_v57  ;;  %v1063_v25 = vld [vmem:[%s5662_s28 + $0xe98] sm:$0xff]  ;;  %v4955_v33 = vcombine.high %v935_v21, %v939_v22  ;;  %v4954_v41 = vcombine.low %v935_v21, %v939_v22 }
 0x2f4   : > { %4340 = vmatpush1.bf16.msra.mxu1 %v5002_v29  ;;  %4300 = vmatprep.subr.bf16.mxu0 %v4995_v45  ;;  %v1067_v26 = vld [vmem:[%s5662_s28 + $0xeb8] sm:$0xff] }
 0x2f5   : > { %4341 = vmatprep.subr.bf16.mxu1 %v5123_v46  ;;  %v5083_v34 = vcombine.high %v1063_v25, %v1067_v26  ;;  %v927_v37 = vld [vmem:[%s5662_s28 + $0xa58] sm:$0xff]  ;;  %v5082_v30 = vcombine.low %v1063_v25, %v1067_v26 }
 0x2f6   : > { %v931_v38 = vld [vmem:[%s5662_s28 + $0xa78] sm:$0xff] }
 0x2f7   : > { %4301 = vmatpush2.bf16.msra.mxu0 %v4994_v20  ;;  %v1055_v39 = vld [vmem:[%s5662_s28 + $0xe58] sm:$0xff]  ;;  %v4947_v0 = vcombine.high %v927_v37, %v931_v38  ;;  %v4946_v29 = vcombine.low %v927_v37, %v931_v38  ;;  %v1129_v20 = vrot.slane %v5231_v32, %v345_v14 }
 0x2f8   : > { %4342 = vmatpush2.bf16.msra.mxu1 %v5122_v36  ;;  %4302 = vmatprep.subr.bf16.mxu0 %v4987_v58  ;;  %v1059_v40 = vld [vmem:[%s5662_s28 + $0xe78] sm:$0xff]  ;;  %v1133_v36 = vrot.slane %v5231_v32, %v349_v43 }
 0x2f9   : > { %4343 = vmatprep.subr.bf16.mxu1 %v5115_v49  ;;  %v5075_v42 = vcombine.high %v1055_v39, %v1059_v40  ;;  %v919_v28 = vld [vmem:[%s5662_s28 + $0xa18] sm:$0xff]  ;;  %v5074_v45 = vcombine.low %v1055_v39, %v1059_v40 }
 0x2fa   : > { %v923_v50 = vld [vmem:[%s5662_s28 + $0xa38] sm:$0xff] }
 0x2fb   : > { %4303 = vmatpush2.bf16.msra.mxu0 %v4986_v54  ;;  %v1047_v44 = vld [vmem:[%s5662_s28 + $0xe18] sm:$0xff]  ;;  %v4939_v46 = vcombine.high %v919_v28, %v923_v50  ;;  %v4938_v31 = vcombine.low %v919_v28, %v923_v50 }
 0x2fc   : > { %4344 = vmatpush2.bf16.msra.mxu1 %v5114_v60  ;;  %4304 = vmatprep.subr.bf16.mxu0 %v4979_v56  ;;  %v1051_v57 = vld [vmem:[%s5662_s28 + $0xe38] sm:$0xff] }
 0x2fd   : > { %4345 = vmatprep.subr.bf16.mxu1 %v5107_v59  ;;  %v5067_v35 = vcombine.high %v1047_v44, %v1051_v57  ;;  %v5066_v48 = vcombine.low %v1047_v44, %v1051_v57 }
 0x2ff   : > { %4305 = vmatpush2.bf16.msra.mxu0 %v4978_v6 }
 0x300   : > { %4346 = vmatpush2.bf16.msra.mxu1 %v5106_v62  ;;  %4306 = vmatprep.subr.bf16.mxu0 %v4971_v7 }
 0x301   : > { %4347 = vmatprep.subr.bf16.mxu1 %v5099_v8 }
 0x303   : > { %4307 = vmatpush2.bf16.msra.mxu0 %v4970_v16 }
 0x304   : > { %4348 = vmatpush2.bf16.msra.mxu1 %v5098_v17  ;;  %4308 = vmatprep.subr.bf16.mxu0 %v4963_v18 }
 0x305   : > { %4349 = vmatprep.subr.bf16.mxu1 %v5091_v19 }
 0x307   : > { %4309 = vmatpush2.bf16.msra.mxu0 %v4962_v23 }
 0x308   : > { %4350 = vmatpush2.bf16.msra.mxu1 %v5090_v24  ;;  %4310 = vmatprep.subr.bf16.mxu0 %v4955_v33  ;;  %v1137_v24 = vrot.slane %v5231_v32, %v353_v11  ;;  %v1141_v33 = vrot.slane %v5231_v32, %v357_v47  ;;  %v4430_v32 = vrot.slane %v6292_v13, %v6279_v51 }
 0x309   : > { %4351 = vmatprep.subr.bf16.mxu1 %v5083_v34 }
 0x30b   : > { %4311 = vmatpush2.bf16.msra.mxu0 %v4954_v41 }
 0x30c   : > { %4352 = vmatpush2.bf16.msra.mxu1 %v5082_v30  ;;  %4312 = vmatprep.subr.bf16.mxu0 %v4947_v0 }
 0x30d   : > { %4353 = vmatprep.subr.bf16.mxu1 %v5075_v42 }
 0x30f   : > { %4313 = vmatpush2.bf16.msra.mxu0 %v4946_v29 }
 0x310   : > { %4354 = vmatpush2.bf16.msra.mxu1 %v5074_v45  ;;  %4314 = vmatprep.subr.bf16.mxu0 %v4939_v46 }
 0x311   : > { %4355 = vmatprep.subr.bf16.mxu1 %v5067_v35 }
 0x313   : > { %4315 = vmatpush2.bf16.msra.mxu0 %v4938_v31 }
 0x314   : > { %4356 = vmatpush2.bf16.msra.mxu1 %v5066_v48 }
 0x316   : > { %v4072_v58 = vpop.f32.mrf.mxu0  ;;  %4317 = vmatmul.mubr.bf16.vlgmr.msra.gmra.mxu0 %v5890_v63 }
 0x317   : > { %v4073_v49 = vadd.f32 %v4072_v58, %v1129_v20  ;;  %v4113_v52 = vpop.f32.mrf.mxu1  ;;  %4358 = vmatmul.mubr.bf16.vlgmr.msra.gmra.mxu1 %v5885_v55 }
 0x318   : > { %v4074_v5 = vpop.f32.mrf.mxu0 }
 0x319   : > { %v4114_v4 = vadd.f32 %v4113_v52, %v4073_v49  ;;  %v4075_v53 = vadd.f32 %v4074_v5, %v1133_v36  ;;  %v4115_v54 = vpop.f32.mrf.mxu1 }
 0x31a   : > { %v4076_v60 = vpop.f32.mrf.mxu0 }
 0x31b   : > { %v4116_v56 = vadd.f32 %v4115_v54, %v4075_v53  ;;  %v4117_v59 = vpop.f32.mrf.mxu1 }
 0x31c   : > { %v4077_v1 = vpop.f32.mrf.mxu0 }
 0x31d   : > { %v4118_v14 = vpop.f32.mrf.mxu1 }
 0x356   : > { %v4154_v61 = vpop.f32.mrf.mxu0 }
 0x357   : > { %v4155_v2 = vadd.f32 %v4154_v61, %v4114_v4  ;;  %v4195_v3 = vpop.f32.mrf.mxu1 }
 0x358   : > { %v4156_v43 = vpop.f32.mrf.mxu0 }
 0x359   : > { %v4196_v6 = vadd.f32 %v4195_v3, %v4155_v2  ;;  %v4157_v62 = vadd.f32 %v4156_v43, %v4116_v56  ;;  %v4197_v63 = vpop.f32.mrf.mxu1 }
 0x35a   : > { %v4158_v7 = vpop.f32.mrf.mxu0 }
 0x35b   : > { %v4198_v8 = vadd.f32 %v4197_v63, %v4157_v62  ;;  %v4199_v9 = vpop.f32.mrf.mxu1  ;;  %v4370_v10 = vmax.f32 %v4196_v6, 0.0 }
 0x35c   : > { %v4159_v55 = vpop.f32.mrf.mxu0 }
 0x35d   : > { %v4371_v12 = vmax.f32 %v4198_v8, 0.0  ;;  %v4200_v15 = vpop.f32.mrf.mxu1 }
 0x35f   : > { %v5126_v16 = vpack.c.bf16 %v4371_v12, %v4370_v10 }
 0x361   : > { %v4414_v35 = vrot.slane %v5126_v16, %v6279_v51 }
 0x396   : > { %v4236_v17 = vpop.f32.mrf.mxu0 }
 0x397   : > { %v4277_v18 = vpop.f32.mrf.mxu1  ;;  %v4237_v34 = vadd.f32 %v4236_v17, %v1137_v24 }
 0x398   : > { %v4238_v19 = vpop.f32.mrf.mxu0 }
 0x399   : > { %v4279_v21 = vpop.f32.mrf.mxu1  ;;  %v4239_v37 = vadd.f32 %v4238_v19, %v1141_v33  ;;  %v4278_v38 = vadd.f32 %v4277_v18, %v4237_v34 }
 0x39a   : > { %v4240_v22 = vpop.f32.mrf.mxu0 }
 0x39b   : > { %v4281_v25 = vpop.f32.mrf.mxu1  ;;  %v4280_v40 = vadd.f32 %v4279_v21, %v4239_v37 }
 0x39c   : > { %v4241_v26 = vpop.f32.mrf.mxu0 }
 0x39d   : > { %v4282_v23 = vpop.f32.mrf.mxu1 }
 0x3d6   : > { %v4318_v39 = vpop.f32.mrf.mxu0 }
 0x3d7   : > { %v4319_v41 = vadd.f32 %v4318_v39, %v4278_v38  ;;  %v4359_v30 = vpop.f32.mrf.mxu1 }
 0x3d8   : > { %v4320_v0 = vpop.f32.mrf.mxu0 }
 0x3d9   : > { %v4360_v42 = vadd.f32 %v4359_v30, %v4319_v41  ;;  %v4321_v28 = vadd.f32 %v4320_v0, %v4280_v40  ;;  %v4361_v50 = vpop.f32.mrf.mxu1 }
 0x3da   : > { %v4322_v44 = vpop.f32.mrf.mxu0 }
 0x3db   : > { %v4362_v57 = vadd.f32 %v4361_v50, %v4321_v28  ;;  %v4363_v29 = vpop.f32.mrf.mxu1  ;;  %v4372_v45 = vmax.f32 %v4360_v42, 0.0 }
 0x3dc   : > { %v4323_v11 = vpop.f32.mrf.mxu0 }
 0x3dd   : > { %v4373_v27 = vmax.f32 %v4362_v57, 0.0  ;;  %v4364_v47 = vpop.f32.mrf.mxu1 }
 0x3df   : > { %v5127_v46 = vpack.c.bf16 %v4373_v27, %v4372_v45 }
 0x3e1   : > { %v4421_v31 = vrot.slane %v5127_v46, %v6279_v51 }
 0x3e3   : > { %v4423_v48 = vcombine.low %v4414_v35, %v4421_v31 }
 0x3e5   : > { %v4437_v20 = vrot.slane %v4423_v48, %v6279_v51 }
 0x3e7   : > { %v4438_v36 = vcombine.low %v4430_v32, %v4437_v20 }
 0x3e9   : > { %4440 = vst [vmem:[%s315_s10] sm:$0xff] %v4438_v36 }
 0x3ea   : > { %5379 = shalt.err (!%p5376_p9)
}
 0x3eb   : > { %s5380_s12 = scalar_lea.hbm %s4454_s23, 128  ;;  %s5384_s8 = scalar_lea.hbm %s6392_s5, 256 }
 0x3ec   : > { %p5381_p10 = scmp.ne.s32.totalorder %s4454_s23, %s5380_s12  ;;  %p5385_p0 = scmp.lt.s32.totalorder %s4454_s23, %s6392_s5 }
 0x3ed   : > { %p5386_p4 = scmp.lt.s32.totalorder %s5384_s8, %s5380_s12 }
 0x3ee   : > { %p5382_p7 = pnand %p5381_p10, %p6424_p1 }
 0x3ef   : > { %p5387_p5 = por %p5386_p4, %p5385_p0 }
 0x3f0   : > { %p5383_p2 = pneg %p5382_p7 }
 0x3f2   : > { %p5388_p11 = pnand %p5387_p5, %p5383_p2 }
 0x3f4   : > { %5391 = shalt.err (!%p5388_p11)
}
 0x3f5   : > { %5152 = dma.vmem_to_hbm [thread:$0]  (%p6424_p1), %s4457_s13, 128, %s4454_s23, %s4442_s25  }
 0x3f6 PF: > { %s4468_s14 = sand.u32 1, %s5426_s18   ;;  %p6425_p6 = scmp.ne.s32.totalorder %s6406_s6, 0 }
 0x3f7   : > { %p6426_p13 = scmp.ge.s32.totalorder %s5438_s21, 2  ;;  %s4469_s9 = scalar_lea.sflag [#allocation4], %s4468_s14 }
 0x3f9   : > { %p5172_p8 = pnand %p6426_p13, %p6425_p6 }
 0x3fb   : > { %p5173_p3 = pneg %p5172_p8 }
 0x3fd   : > { %5421 = dma.done.wait (%p5173_p3), %s4469_s9, 128  }
 0x3fe   : > { %5423 = vsyncadd (%p5173_p3), %s4469_s9, 4294967168  ;;  %p20_p12 = scmp.ge.s32.totalorder %s5506_s24, 4   ;;  %s6427_s18 = smov %s5430_s19 }
 0x3ff   : > { %s6428_s19 = smov %s5434_s20  ;;  %s6429_s20 = smov %s5518_s27 }
 0x400   : > { %s6430_s21 = smov %s5506_s24  ;;  %22 = sbr.rel (!%p20_p12) target bundleno = 9 (0x9), region = 109 }
 0x405   :  { %4474 = vsyncpa [#allocation3], 1 }
 0x406   :  { %4476 = vsyncpa [#allocation3 + $0x1], 1 }
 0x407   :  { %4477 = vsyncpa [#allocation6], 1 }
 0x408   :  { %4478 = vsyncpa [#allocation9], 1 }
 0x409   :  { %4480 = vsyncpa [#allocation9 + $0x1], 1 }
 0x40a   :  { %4481 = vsyncpa [#allocation4], 1 }
 0x40b   :  { %4483 = vsyncpa [#allocation4 + $0x1], 1 }

</bundles_post_ra>
